<compile_context>
chip_gen: v7x
topology: tpu7x:2x2x1
jax: 0.10.0
libtpu: 0.0.40
codegen_flags: <defaults>
</compile_context>

<pallas_src>
import functools

import jax
import jax.numpy as jnp
from jax import lax
from jax.experimental import pallas as pl
from jax.experimental.pallas import tpu as pltpu

_EPS = 1e-5


# ----------------------------------------------------------------------------
# Fused kernel
# ----------------------------------------------------------------------------
def _fused_block_kernel(*refs, stride, downsample, n, h, w, cin, cout,
                        compute_dtype):
    if downsample:
        (x_ref, g1_ref, b1_ref, w1_ref, g2_ref, b2_ref, w2_ref, wd_ref,
         o_ref, ypad_ref, zpad_ref) = refs
    else:
        (x_ref, g1_ref, b1_ref, w1_ref, g2_ref, b2_ref, w2_ref,
         o_ref, ypad_ref, zpad_ref) = refs
        wd_ref = None

    s = stride
    hq, wq = h // s, w // s          # per-phase input extent
    ho, wo = hq, wq                  # conv output extent (k=3, pad=1, H%s==0)
    rows = n * ho * wo

    # ---------------- bn1 + relu (f32, batch statistics) --------------------
    x2 = x_ref[...]                                     # (s*s*rows, cin)
    cnt1 = float(x2.shape[0])
    mean1 = jnp.sum(x2, axis=0, keepdims=True) * (1.0 / cnt1)
    ctr1 = x2 - mean1
    var1 = jnp.sum(ctr1 * ctr1, axis=0, keepdims=True) * (1.0 / cnt1)
    y2 = jnp.maximum(
        ctr1 * lax.rsqrt(var1 + _EPS) * g1_ref[...] + b1_ref[...], 0.0)
    y4 = y2.reshape(s * s * n, hq, wq, cin)

    # ------- scatter y into the zero-padded, phase-split VMEM scratch -------
    ypad_ref[...] = jnp.zeros_like(ypad_ref)
    for a in range(s):
        for b in range(s):
            a2, oh = (a + 1) % s, (a + 1) // s
            b2, ow = (b + 1) % s, (b + 1) // s
            src = (a * s + b) * n
            dst = (a2 * s + b2) * n
            ypad_ref[dst:dst + n, oh:oh + hq, ow:ow + wq, :] = y4[src:src + n]

    # --------- conv1: 9-tap accumulated GEMM (bf16 operands, f32 acc) -------
    acc1 = jnp.zeros((rows, cout), jnp.float32)
    for dy in range(3):
        for dx in range(3):
            pa = ((dy % s) * s + (dx % s)) * n
            tap = ypad_ref[pa:pa + n,
                           dy // s:dy // s + ho,
                           dx // s:dx // s + wo, :]
            tap2 = tap.reshape(rows, cin).astype(compute_dtype)
            acc1 = acc1 + jnp.dot(tap2, w1_ref[dy * 3 + dx],
                                  preferred_element_type=jnp.float32)

    # ------------------------- bn2 + relu (f32) -----------------------------
    cnt2 = float(rows)
    mean2 = jnp.sum(acc1, axis=0, keepdims=True) * (1.0 / cnt2)
    ctr2 = acc1 - mean2
    var2 = jnp.sum(ctr2 * ctr2, axis=0, keepdims=True) * (1.0 / cnt2)
    z = jnp.maximum(
        ctr2 * lax.rsqrt(var2 + _EPS) * g2_ref[...] + b2_ref[...], 0.0)

    # -------- conv2 (3x3, stride 1): padded VMEM scratch + 9-tap GEMM -------
    zpad_ref[...] = jnp.zeros_like(zpad_ref)
    zpad_ref[:, 1:ho + 1, 1:wo + 1, :] = z.reshape(n, ho, wo, cout)

    acc2 = jnp.zeros((rows, cout), jnp.float32)
    for dy in range(3):
        for dx in range(3):
            tap = zpad_ref[:, dy:dy + ho, dx:dx + wo, :]
            tap2 = tap.reshape(rows, cout).astype(compute_dtype)
            acc2 = acc2 + jnp.dot(tap2, w2_ref[dy * 3 + dx],
                                  preferred_element_type=jnp.float32)

    # ------------------------------ residual --------------------------------
    if downsample:
        # 1x1 conv, stride s, applied to relu(bn1(x)) == phase (0, 0) of y.
        ysub = y2[0:rows].astype(compute_dtype)
        res = jnp.dot(ysub, wd_ref[...], preferred_element_type=jnp.float32)
    else:
        # identity residual: the original (pre-bn) input, added exactly (f32).
        res = x2

    out = acc2 + res
    # Lane-dense store: (cout, rows) puts the long axis on the 128-lane dim.
    o_ref[...] = jnp.transpose(out, (1, 0)).astype(o_ref.dtype)


# ----------------------------------------------------------------------------
# Wrapper
# ----------------------------------------------------------------------------
def _to_tap_weight(w_torch):
    """PyTorch (Cout, Cin, KH, KW) -> (KH*KW, Cin, Cout), tap-major (dy, dx)."""
    cout, cin, kh, kw = w_torch.shape
    return jnp.transpose(w_torch, (2, 3, 1, 0)).reshape(kh * kw, cin, cout)


def _full_spec(shape):
    nd = len(shape)
    return pl.BlockSpec(shape, lambda *_: (0,) * nd)


def basic_block_v2(x_nchw, params, stride, downsample,
                   compute_dtype=jnp.bfloat16):
    """Forward pass of BasicBlockV2 (training-mode BN) as one Pallas kernel."""
    n, cin, h, w = x_nchw.shape
    cout = params["w1"].shape[0]
    s = int(stride)
    if s > 1:
        assert h % s == 0 and w % s == 0, "phase split needs H, W % stride == 0"
    if not downsample:
        assert s == 1 and cin == cout, (
            "identity residual requires stride == 1 and cin == cout")

    hq, wq = h // s, w // s                  # == conv output Ho, Wo
    rows = n * hq * wq
    hp = (h + 2 + s - 1) // s                # padded per-phase extents
    wp = (w + 2 + s - 1) // s

    # NCHW -> NHWC -> stride-phase split -> 2-D (row order: phase, n, h, w).
    # Plain XLA glue on the input only; size-preserving (no 9x im2col).
    x = jnp.transpose(x_nchw, (0, 2, 3, 1))
    x = x.reshape(n, hq, s, wq, s, cin)
    x = jnp.transpose(x, (2, 4, 0, 1, 3, 5)).reshape(s * s * rows, cin)

    w1 = _to_tap_weight(params["w1"]).astype(compute_dtype)    # (9, cin, cout)
    w2 = _to_tap_weight(params["w2"]).astype(compute_dtype)    # (9, cout, cout)
    args = [
        x,
        params["gamma1"].reshape(1, cin), params["beta1"].reshape(1, cin),
        w1,
        params["gamma2"].reshape(1, cout), params["beta2"].reshape(1, cout),
        w2,
    ]
    if downsample:
        wd = _to_tap_weight(params["wd"]).reshape(cin, cout).astype(
            compute_dtype)
        args.append(wd)

    kernel = functools.partial(
        _fused_block_kernel, stride=s, downsample=downsample,
        n=n, h=h, w=w, cin=cin, cout=cout, compute_dtype=compute_dtype)

    o2d = pl.pallas_call(
        kernel,
        grid=(1,),
        in_specs=[_full_spec(a.shape) for a in args],
        out_specs=_full_spec((cout, rows)),
        out_shape=jax.ShapeDtypeStruct((cout, rows), jnp.float32),
        scratch_shapes=[
            pltpu.VMEM((s * s * n, hp, wp, cin), jnp.float32),   # padded bn1(x)
            pltpu.VMEM((n, hq + 2, wq + 2, cout), jnp.float32),  # padded conv1
        ],
        compiler_params=pltpu.CompilerParams(
            dimension_semantics=("arbitrary",)),
    )(*args)

    # (Cout, N*Ho*Wo) -> NCHW.
    return jnp.transpose(o2d.reshape(cout, n, hq, wq), (1, 0, 2, 3))


# ----------------------------------------------------------------------------
# Deterministic parameter init (synthetic, matches module __init__ shapes)
# ----------------------------------------------------------------------------
def init_params(key, cin, cout, downsample):
    ks = jax.random.split(key, 7)
    p = {
        "gamma1": 1.0 + 0.1 * jax.random.normal(ks[0], (cin,), jnp.float32),
        "beta1": 0.1 * jax.random.normal(ks[1], (cin,), jnp.float32),
        "w1": 0.1 * jax.random.normal(ks[2], (cout, cin, 3, 3), jnp.float32),
        "gamma2": 1.0 + 0.1 * jax.random.normal(ks[3], (cout,), jnp.float32),
        "beta2": 0.1 * jax.random.normal(ks[4], (cout,), jnp.float32),
        "w2": 0.1 * jax.random.normal(ks[5], (cout, cout, 3, 3), jnp.float32),
    }
    if downsample:
        p["wd"] = 0.1 * jax.random.normal(ks[6], (cout, cin, 1, 1), jnp.float32)
    return p


# ----------------------------------------------------------------------------
# Pure-JAX reference (training-mode BN + lax conv) for correctness check
# ----------------------------------------------------------------------------
def reference(x_nchw, params, stride, downsample):
    x = jnp.transpose(x_nchw, (0, 2, 3, 1))

    def bn(v, g, b):
        m = jnp.mean(v, axis=(0, 1, 2), keepdims=True)
        var = jnp.mean((v - m) ** 2, axis=(0, 1, 2), keepdims=True)
        return (v - m) / jnp.sqrt(var + _EPS) * g + b

    def conv(v, w_torch, s, pad):
        wk = jnp.transpose(w_torch, (2, 3, 1, 0))
        return jax.lax.conv_general_dilated(
            v, wk, (s, s), [(pad, pad), (pad, pad)],
            dimension_numbers=("NHWC", "HWIO", "NHWC"))

    y = jnp.maximum(bn(x, params["gamma1"], params["beta1"]), 0.0)
    residual = conv(y, params["wd"], stride, 0) if downsample else x
    z = jnp.maximum(bn(conv(y, params["w1"], stride, 1),
                       params["gamma2"], params["beta2"]), 0.0)
    out = conv(z, params["w2"], 1, 1) + residual
    return jnp.transpose(out, (0, 3, 1, 2))


if __name__ == "__main__":
    import numpy as np

    key = jax.random.PRNGKey(0)
    kx, kp1, kp2 = jax.random.split(key, 3)

    x = jax.random.normal(kx, (2, 4, 16, 16), jnp.float32)

    # Config A: stride=2, downsample=True, channels 4 -> 8.
    pA = init_params(kp1, 4, 8, True)
    refA = reference(x, pA, 2, True)
    # Config B: stride=1, downsample=False, channels 4 -> 4 (identity).
    pB = init_params(kp2, 4, 4, False)
    refB = reference(x, pB, 1, False)

    # f32-MXU path: tight tolerance against the reference.
    outA32 = jax.block_until_ready(
        basic_block_v2(x, pA, 2, True, compute_dtype=jnp.float32))
    np.testing.assert_allclose(np.asarray(outA32), np.asarray(refA),
                               rtol=2e-4, atol=2e-4)
    outB32 = jax.block_until_ready(
        basic_block_v2(x, pB, 1, False, compute_dtype=jnp.float32))
    np.testing.assert_allclose(np.asarray(outB32), np.asarray(refB),
                               rtol=2e-4, atol=2e-4)

    # bf16-MXU / f32-accumulate path (default, per perf review): bf16 rounding
    # of the conv operands -> looser tolerance.
    outA16 = jax.block_until_ready(basic_block_v2(x, pA, 2, True))
    np.testing.assert_allclose(np.asarray(outA16), np.asarray(refA),
                               rtol=5e-2, atol=5e-2)
    outB16 = jax.block_until_ready(basic_block_v2(x, pB, 1, False))
    np.testing.assert_allclose(np.asarray(outB16), np.asarray(refB),
                               rtol=5e-2, atol=5e-2)

    print("KERNEL_OK")
</pallas_src>

<mosaic_0001>
module attributes {stable_mosaic.version = 11 : i64} {
  func.func @_fused_block_kernel(%arg0: i32, %arg1: memref<512x4xf32, #tpu.memory_space<vmem>>, %arg2: memref<1x4xf32, #tpu.memory_space<vmem>>, %arg3: memref<1x4xf32, #tpu.memory_space<vmem>>, %arg4: memref<9x4x8xf32, #tpu.memory_space<vmem>>, %arg5: memref<1x8xf32, #tpu.memory_space<vmem>>, %arg6: memref<1x8xf32, #tpu.memory_space<vmem>>, %arg7: memref<9x8x8xf32, #tpu.memory_space<vmem>>, %arg8: memref<4x8xf32, #tpu.memory_space<vmem>>, %arg9: memref<8x128xf32, #tpu.memory_space<vmem>>, %arg10: memref<8x9x9x4xf32, #tpu.memory_space<vmem>>, %arg11: memref<2x10x10x8xf32, #tpu.memory_space<vmem>>) attributes {dimension_semantics = [#tpu.dimension_semantics<arbitrary>], iteration_bounds = array<i64: 1>, scalar_prefetch = 0 : i64, scratch_operands = 2 : i64, tpu.core_type = #tpu.core_type<tc>, window_params = [{pipeline_mode = #tpu.pipeline_mode<synchronous>, transform_indices = @transform_0, window_bounds = array<i64: 512, 4>}, {pipeline_mode = #tpu.pipeline_mode<synchronous>, transform_indices = @transform_1, window_bounds = array<i64: 1, 4>}, {pipeline_mode = #tpu.pipeline_mode<synchronous>, transform_indices = @transform_2, window_bounds = array<i64: 1, 4>}, {pipeline_mode = #tpu.pipeline_mode<synchronous>, transform_indices = @transform_3, window_bounds = array<i64: 9, 4, 8>}, {pipeline_mode = #tpu.pipeline_mode<synchronous>, transform_indices = @transform_4, window_bounds = array<i64: 1, 8>}, {pipeline_mode = #tpu.pipeline_mode<synchronous>, transform_indices = @transform_5, window_bounds = array<i64: 1, 8>}, {pipeline_mode = #tpu.pipeline_mode<synchronous>, transform_indices = @transform_6, window_bounds = array<i64: 9, 8, 8>}, {pipeline_mode = #tpu.pipeline_mode<synchronous>, transform_indices = @transform_7, window_bounds = array<i64: 4, 8>}, {pipeline_mode = #tpu.pipeline_mode<synchronous>, transform_indices = @transform_8, window_bounds = array<i64: 8, 128>}]} {
    %c0 = arith.constant 0 : index
    %c0_0 = arith.constant 0 : index
    %0 = vector.load %arg1[%c0, %c0_0] : memref<512x4xf32, #tpu.memory_space<vmem>>, vector<512x4xf32>
    %cst = arith.constant dense<0.000000e+00> : vector<4xf32>
    %1 = vector.multi_reduction <add>, %0, %cst [0] : vector<512x4xf32> to vector<4xf32>
    %2 = vector.shape_cast %1 : vector<4xf32> to vector<1x4xf32>
    %cst_1 = arith.constant 0.001953125 : f32
    %3 = vector.broadcast %cst_1 : f32 to vector<1x4xf32>
    %4 = arith.mulf %2, %3 : vector<1x4xf32>
    %5 = vector.broadcast %4 : vector<1x4xf32> to vector<512x4xf32>
    %6 = arith.subf %0, %5 : vector<512x4xf32>
    %7 = arith.mulf %6, %6 : vector<512x4xf32>
    %cst_2 = arith.constant dense<0.000000e+00> : vector<4xf32>
    %8 = vector.multi_reduction <add>, %7, %cst_2 [0] : vector<512x4xf32> to vector<4xf32>
    %9 = vector.shape_cast %8 : vector<4xf32> to vector<1x4xf32>
    %cst_3 = arith.constant 0.001953125 : f32
    %10 = vector.broadcast %cst_3 : f32 to vector<1x4xf32>
    %11 = arith.mulf %9, %10 : vector<1x4xf32>
    %cst_4 = arith.constant 9.99999974E-6 : f32
    %12 = vector.broadcast %cst_4 : f32 to vector<1x4xf32>
    %13 = arith.addf %11, %12 : vector<1x4xf32>
    %14 = math.rsqrt %13 : vector<1x4xf32>
    %15 = vector.broadcast %14 : vector<1x4xf32> to vector<512x4xf32>
    %16 = arith.mulf %6, %15 : vector<512x4xf32>
    %c0_5 = arith.constant 0 : index
    %c0_6 = arith.constant 0 : index
    %17 = vector.load %arg2[%c0_5, %c0_6] : memref<1x4xf32, #tpu.memory_space<vmem>>, vector<1x4xf32>
    %18 = vector.broadcast %17 : vector<1x4xf32> to vector<512x4xf32>
    %19 = arith.mulf %16, %18 : vector<512x4xf32>
    %c0_7 = arith.constant 0 : index
    %c0_8 = arith.constant 0 : index
    %20 = vector.load %arg3[%c0_7, %c0_8] : memref<1x4xf32, #tpu.memory_space<vmem>>, vector<1x4xf32>
    %21 = vector.broadcast %20 : vector<1x4xf32> to vector<512x4xf32>
    %22 = arith.addf %19, %21 : vector<512x4xf32>
    %cst_9 = arith.constant 0.000000e+00 : f32
    %23 = vector.broadcast %cst_9 : f32 to vector<512x4xf32>
    %24 = arith.maximumf %22, %23 : vector<512x4xf32>
    %25 = vector.shape_cast %24 : vector<512x4xf32> to vector<8x8x8x4xf32>
    %cst_10 = arith.constant 0.000000e+00 : f32
    %26 = vector.broadcast %cst_10 : f32 to vector<8x9x9x4xf32>
    %c0_11 = arith.constant 0 : index
    %c0_12 = arith.constant 0 : index
    %c0_13 = arith.constant 0 : index
    %c0_14 = arith.constant 0 : index
    %27 = vector.load %arg10[%c0_11, %c0_12, %c0_13, %c0_14] : memref<8x9x9x4xf32, #tpu.memory_space<vmem>>, vector<8x9x9x4xf32>
    tpu.vector_store %arg10[%c0_11, %c0_12, %c0_13, %c0_14], %26 {strides = array<i32>} : memref<8x9x9x4xf32, #tpu.memory_space<vmem>>, vector<8x9x9x4xf32>,
    %28 = vector.extract_strided_slice %25 {offsets = [0, 0, 0, 0], sizes = [2, 8, 8, 4], strides = [1, 1, 1, 1]} : vector<8x8x8x4xf32> to vector<2x8x8x4xf32>
    %c6 = arith.constant 6 : index
    %c0_15 = arith.constant 0 : index
    %c0_16 = arith.constant 0 : index
    %c0_17 = arith.constant 0 : index
    %29 = vector.load %arg10[%c6, %c0_15, %c0_16, %c0_17] : memref<8x9x9x4xf32, #tpu.memory_space<vmem>>, vector<2x8x8x4xf32>
    tpu.vector_store %arg10[%c6, %c0_15, %c0_16, %c0_17], %28 {strides = array<i32>} : memref<8x9x9x4xf32, #tpu.memory_space<vmem>>, vector<2x8x8x4xf32>,
    %30 = vector.extract_strided_slice %25 {offsets = [2, 0, 0, 0], sizes = [2, 8, 8, 4], strides = [1, 1, 1, 1]} : vector<8x8x8x4xf32> to vector<2x8x8x4xf32>
    %c4 = arith.constant 4 : index
    %c0_18 = arith.constant 0 : index
    %c1 = arith.constant 1 : index
    %c0_19 = arith.constant 0 : index
    %31 = vector.load %arg10[%c4, %c0_18, %c1, %c0_19] : memref<8x9x9x4xf32, #tpu.memory_space<vmem>>, vector<2x8x8x4xf32>
    tpu.vector_store %arg10[%c4, %c0_18, %c1, %c0_19], %30 {strides = array<i32>} : memref<8x9x9x4xf32, #tpu.memory_space<vmem>>, vector<2x8x8x4xf32>,
    %32 = vector.extract_strided_slice %25 {offsets = [4, 0, 0, 0], sizes = [2, 8, 8, 4], strides = [1, 1, 1, 1]} : vector<8x8x8x4xf32> to vector<2x8x8x4xf32>
    %c2 = arith.constant 2 : index
    %c1_20 = arith.constant 1 : index
    %c0_21 = arith.constant 0 : index
    %c0_22 = arith.constant 0 : index
    %33 = vector.load %arg10[%c2, %c1_20, %c0_21, %c0_22] : memref<8x9x9x4xf32, #tpu.memory_space<vmem>>, vector<2x8x8x4xf32>
    tpu.vector_store %arg10[%c2, %c1_20, %c0_21, %c0_22], %32 {strides = array<i32>} : memref<8x9x9x4xf32, #tpu.memory_space<vmem>>, vector<2x8x8x4xf32>,
    %34 = vector.extract_strided_slice %25 {offsets = [6, 0, 0, 0], sizes = [2, 8, 8, 4], strides = [1, 1, 1, 1]} : vector<8x8x8x4xf32> to vector<2x8x8x4xf32>
    %c0_23 = arith.constant 0 : index
    %c1_24 = arith.constant 1 : index
    %c1_25 = arith.constant 1 : index
    %c0_26 = arith.constant 0 : index
    %35 = vector.load %arg10[%c0_23, %c1_24, %c1_25, %c0_26] : memref<8x9x9x4xf32, #tpu.memory_space<vmem>>, vector<2x8x8x4xf32>
    tpu.vector_store %arg10[%c0_23, %c1_24, %c1_25, %c0_26], %34 {strides = array<i32>} : memref<8x9x9x4xf32, #tpu.memory_space<vmem>>, vector<2x8x8x4xf32>,
    %cst_27 = arith.constant 0.000000e+00 : f32
    %36 = vector.broadcast %cst_27 : f32 to vector<128x8xf32>
    %c0_28 = arith.constant 0 : index
    %c0_29 = arith.constant 0 : index
    %c0_30 = arith.constant 0 : index
    %c0_31 = arith.constant 0 : index
    %37 = vector.load %arg10[%c0_28, %c0_29, %c0_30, %c0_31] : memref<8x9x9x4xf32, #tpu.memory_space<vmem>>, vector<2x8x8x4xf32>
    %38 = vector.shape_cast %37 : vector<2x8x8x4xf32> to vector<128x4xf32>
    %c0_32 = arith.constant 0 : index
    %c0_33 = arith.constant 0 : index
    %c0_34 = arith.constant 0 : index
    %39 = vector.load %arg4[%c0_32, %c0_33, %c0_34] : memref<9x4x8xf32, #tpu.memory_space<vmem>>, vector<1x4x8xf32>
    %40 = vector.shape_cast %39 : vector<1x4x8xf32> to vector<4x8xf32>
    %cst_35 = arith.constant dense<0.000000e+00> : vector<128x8xf32>
    %41 = tpu.matmul %38, %40, %cst_35 {dimension_numbers = #tpu.dot_dimension_numbers<[1], [0], [0], [1], [0, 0, 1, 1], [], []>} : vector<128x4xf32>, vector<4x8xf32>, vector<128x8xf32> -> vector<128x8xf32>
    %42 = arith.addf %36, %41 : vector<128x8xf32>
    %c2_36 = arith.constant 2 : index
    %c0_37 = arith.constant 0 : index
    %c0_38 = arith.constant 0 : index
    %c0_39 = arith.constant 0 : index
    %43 = vector.load %arg10[%c2_36, %c0_37, %c0_38, %c0_39] : memref<8x9x9x4xf32, #tpu.memory_space<vmem>>, vector<2x8x8x4xf32>
    %44 = vector.shape_cast %43 : vector<2x8x8x4xf32> to vector<128x4xf32>
    %c1_40 = arith.constant 1 : index
    %c0_41 = arith.constant 0 : index
    %c0_42 = arith.constant 0 : index
    %45 = vector.load %arg4[%c1_40, %c0_41, %c0_42] : memref<9x4x8xf32, #tpu.memory_space<vmem>>, vector<1x4x8xf32>
    %46 = vector.shape_cast %45 : vector<1x4x8xf32> to vector<4x8xf32>
    %cst_43 = arith.constant dense<0.000000e+00> : vector<128x8xf32>
    %47 = tpu.matmul %44, %46, %cst_43 {dimension_numbers = #tpu.dot_dimension_numbers<[1], [0], [0], [1], [0, 0, 1, 1], [], []>} : vector<128x4xf32>, vector<4x8xf32>, vector<128x8xf32> -> vector<128x8xf32>
    %48 = arith.addf %42, %47 : vector<128x8xf32>
    %c0_44 = arith.constant 0 : index
    %c0_45 = arith.constant 0 : index
    %c1_46 = arith.constant 1 : index
    %c0_47 = arith.constant 0 : index
    %49 = vector.load %arg10[%c0_44, %c0_45, %c1_46, %c0_47] : memref<8x9x9x4xf32, #tpu.memory_space<vmem>>, vector<2x8x8x4xf32>
    %50 = vector.shape_cast %49 : vector<2x8x8x4xf32> to vector<128x4xf32>
    %c2_48 = arith.constant 2 : index
    %c0_49 = arith.constant 0 : index
    %c0_50 = arith.constant 0 : index
    %51 = vector.load %arg4[%c2_48, %c0_49, %c0_50] : memref<9x4x8xf32, #tpu.memory_space<vmem>>, vector<1x4x8xf32>
    %52 = vector.shape_cast %51 : vector<1x4x8xf32> to vector<4x8xf32>
    %cst_51 = arith.constant dense<0.000000e+00> : vector<128x8xf32>
    %53 = tpu.matmul %50, %52, %cst_51 {dimension_numbers = #tpu.dot_dimension_numbers<[1], [0], [0], [1], [0, 0, 1, 1], [], []>} : vector<128x4xf32>, vector<4x8xf32>, vector<128x8xf32> -> vector<128x8xf32>
    %54 = arith.addf %48, %53 : vector<128x8xf32>
    %c4_52 = arith.constant 4 : index
    %c0_53 = arith.constant 0 : index
    %c0_54 = arith.constant 0 : index
    %c0_55 = arith.constant 0 : index
    %55 = vector.load %arg10[%c4_52, %c0_53, %c0_54, %c0_55] : memref<8x9x9x4xf32, #tpu.memory_space<vmem>>, vector<2x8x8x4xf32>
    %56 = vector.shape_cast %55 : vector<2x8x8x4xf32> to vector<128x4xf32>
    %c3 = arith.constant 3 : index
    %c0_56 = arith.constant 0 : index
    %c0_57 = arith.constant 0 : index
    %57 = vector.load %arg4[%c3, %c0_56, %c0_57] : memref<9x4x8xf32, #tpu.memory_space<vmem>>, vector<1x4x8xf32>
    %58 = vector.shape_cast %57 : vector<1x4x8xf32> to vector<4x8xf32>
    %cst_58 = arith.constant dense<0.000000e+00> : vector<128x8xf32>
    %59 = tpu.matmul %56, %58, %cst_58 {dimension_numbers = #tpu.dot_dimension_numbers<[1], [0], [0], [1], [0, 0, 1, 1], [], []>} : vector<128x4xf32>, vector<4x8xf32>, vector<128x8xf32> -> vector<128x8xf32>
    %60 = arith.addf %54, %59 : vector<128x8xf32>
    %c6_59 = arith.constant 6 : index
    %c0_60 = arith.constant 0 : index
    %c0_61 = arith.constant 0 : index
    %c0_62 = arith.constant 0 : index
    %61 = vector.load %arg10[%c6_59, %c0_60, %c0_61, %c0_62] : memref<8x9x9x4xf32, #tpu.memory_space<vmem>>, vector<2x8x8x4xf32>
    %62 = vector.shape_cast %61 : vector<2x8x8x4xf32> to vector<128x4xf32>
    %c4_63 = arith.constant 4 : index
    %c0_64 = arith.constant 0 : index
    %c0_65 = arith.constant 0 : index
    %63 = vector.load %arg4[%c4_63, %c0_64, %c0_65] : memref<9x4x8xf32, #tpu.memory_space<vmem>>, vector<1x4x8xf32>
    %64 = vector.shape_cast %63 : vector<1x4x8xf32> to vector<4x8xf32>
    %cst_66 = arith.constant dense<0.000000e+00> : vector<128x8xf32>
    %65 = tpu.matmul %62, %64, %cst_66 {dimension_numbers = #tpu.dot_dimension_numbers<[1], [0], [0], [1], [0, 0, 1, 1], [], []>} : vector<128x4xf32>, vector<4x8xf32>, vector<128x8xf32> -> vector<128x8xf32>
    %66 = arith.addf %60, %65 : vector<128x8xf32>
    %c4_67 = arith.constant 4 : index
    %c0_68 = arith.constant 0 : index
    %c1_69 = arith.constant 1 : index
    %c0_70 = arith.constant 0 : index
    %67 = vector.load %arg10[%c4_67, %c0_68, %c1_69, %c0_70] : memref<8x9x9x4xf32, #tpu.memory_space<vmem>>, vector<2x8x8x4xf32>
    %68 = vector.shape_cast %67 : vector<2x8x8x4xf32> to vector<128x4xf32>
    %c5 = arith.constant 5 : index
    %c0_71 = arith.constant 0 : index
    %c0_72 = arith.constant 0 : index
    %69 = vector.load %arg4[%c5, %c0_71, %c0_72] : memref<9x4x8xf32, #tpu.memory_space<vmem>>, vector<1x4x8xf32>
    %70 = vector.shape_cast %69 : vector<1x4x8xf32> to vector<4x8xf32>
    %cst_73 = arith.constant dense<0.000000e+00> : vector<128x8xf32>
    %71 = tpu.matmul %68, %70, %cst_73 {dimension_numbers = #tpu.dot_dimension_numbers<[1], [0], [0], [1], [0, 0, 1, 1], [], []>} : vector<128x4xf32>, vector<4x8xf32>, vector<128x8xf32> -> vector<128x8xf32>
    %72 = arith.addf %66, %71 : vector<128x8xf32>
    %c0_74 = arith.constant 0 : index
    %c1_75 = arith.constant 1 : index
    %c0_76 = arith.constant 0 : index
    %c0_77 = arith.constant 0 : index
    %73 = vector.load %arg10[%c0_74, %c1_75, %c0_76, %c0_77] : memref<8x9x9x4xf32, #tpu.memory_space<vmem>>, vector<2x8x8x4xf32>
    %74 = vector.shape_cast %73 : vector<2x8x8x4xf32> to vector<128x4xf32>
    %c6_78 = arith.constant 6 : index
    %c0_79 = arith.constant 0 : index
    %c0_80 = arith.constant 0 : index
    %75 = vector.load %arg4[%c6_78, %c0_79, %c0_80] : memref<9x4x8xf32, #tpu.memory_space<vmem>>, vector<1x4x8xf32>
    %76 = vector.shape_cast %75 : vector<1x4x8xf32> to vector<4x8xf32>
    %cst_81 = arith.constant dense<0.000000e+00> : vector<128x8xf32>
    %77 = tpu.matmul %74, %76, %cst_81 {dimension_numbers = #tpu.dot_dimension_numbers<[1], [0], [0], [1], [0, 0, 1, 1], [], []>} : vector<128x4xf32>, vector<4x8xf32>, vector<128x8xf32> -> vector<128x8xf32>
    %78 = arith.addf %72, %77 : vector<128x8xf32>
    %c2_82 = arith.constant 2 : index
    %c1_83 = arith.constant 1 : index
    %c0_84 = arith.constant 0 : index
    %c0_85 = arith.constant 0 : index
    %79 = vector.load %arg10[%c2_82, %c1_83, %c0_84, %c0_85] : memref<8x9x9x4xf32, #tpu.memory_space<vmem>>, vector<2x8x8x4xf32>
    %80 = vector.shape_cast %79 : vector<2x8x8x4xf32> to vector<128x4xf32>
    %c7 = arith.constant 7 : index
    %c0_86 = arith.constant 0 : index
    %c0_87 = arith.constant 0 : index
    %81 = vector.load %arg4[%c7, %c0_86, %c0_87] : memref<9x4x8xf32, #tpu.memory_space<vmem>>, vector<1x4x8xf32>
    %82 = vector.shape_cast %81 : vector<1x4x8xf32> to vector<4x8xf32>
    %cst_88 = arith.constant dense<0.000000e+00> : vector<128x8xf32>
    %83 = tpu.matmul %80, %82, %cst_88 {dimension_numbers = #tpu.dot_dimension_numbers<[1], [0], [0], [1], [0, 0, 1, 1], [], []>} : vector<128x4xf32>, vector<4x8xf32>, vector<128x8xf32> -> vector<128x8xf32>
    %84 = arith.addf %78, %83 : vector<128x8xf32>
    %c0_89 = arith.constant 0 : index
    %c1_90 = arith.constant 1 : index
    %c1_91 = arith.constant 1 : index
    %c0_92 = arith.constant 0 : index
    %85 = vector.load %arg10[%c0_89, %c1_90, %c1_91, %c0_92] : memref<8x9x9x4xf32, #tpu.memory_space<vmem>>, vector<2x8x8x4xf32>
    %86 = vector.shape_cast %85 : vector<2x8x8x4xf32> to vector<128x4xf32>
    %c8 = arith.constant 8 : index
    %c0_93 = arith.constant 0 : index
    %c0_94 = arith.constant 0 : index
    %87 = vector.load %arg4[%c8, %c0_93, %c0_94] : memref<9x4x8xf32, #tpu.memory_space<vmem>>, vector<1x4x8xf32>
    %88 = vector.shape_cast %87 : vector<1x4x8xf32> to vector<4x8xf32>
    %cst_95 = arith.constant dense<0.000000e+00> : vector<128x8xf32>
    %89 = tpu.matmul %86, %88, %cst_95 {dimension_numbers = #tpu.dot_dimension_numbers<[1], [0], [0], [1], [0, 0, 1, 1], [], []>} : vector<128x4xf32>, vector<4x8xf32>, vector<128x8xf32> -> vector<128x8xf32>
    %90 = arith.addf %84, %89 : vector<128x8xf32>
    %cst_96 = arith.constant dense<0.000000e+00> : vector<8xf32>
    %91 = vector.multi_reduction <add>, %90, %cst_96 [0] : vector<128x8xf32> to vector<8xf32>
    %92 = vector.shape_cast %91 : vector<8xf32> to vector<1x8xf32>
    %cst_97 = arith.constant 7.812500e-03 : f32
    %93 = vector.broadcast %cst_97 : f32 to vector<1x8xf32>
    %94 = arith.mulf %92, %93 : vector<1x8xf32>
    %95 = vector.broadcast %94 : vector<1x8xf32> to vector<128x8xf32>
    %96 = arith.subf %90, %95 : vector<128x8xf32>
    %97 = arith.mulf %96, %96 : vector<128x8xf32>
    %cst_98 = arith.constant dense<0.000000e+00> : vector<8xf32>
    %98 = vector.multi_reduction <add>, %97, %cst_98 [0] : vector<128x8xf32> to vector<8xf32>
    %99 = vector.shape_cast %98 : vector<8xf32> to vector<1x8xf32>
    %cst_99 = arith.constant 7.812500e-03 : f32
    %100 = vector.broadcast %cst_99 : f32 to vector<1x8xf32>
    %101 = arith.mulf %99, %100 : vector<1x8xf32>
    %cst_100 = arith.constant 9.99999974E-6 : f32
    %102 = vector.broadcast %cst_100 : f32 to vector<1x8xf32>
    %103 = arith.addf %101, %102 : vector<1x8xf32>
    %104 = math.rsqrt %103 : vector<1x8xf32>
    %105 = vector.broadcast %104 : vector<1x8xf32> to vector<128x8xf32>
    %106 = arith.mulf %96, %105 : vector<128x8xf32>
    %c0_101 = arith.constant 0 : index
    %c0_102 = arith.constant 0 : index
    %107 = vector.load %arg5[%c0_101, %c0_102] : memref<1x8xf32, #tpu.memory_space<vmem>>, vector<1x8xf32>
    %108 = vector.broadcast %107 : vector<1x8xf32> to vector<128x8xf32>
    %109 = arith.mulf %106, %108 : vector<128x8xf32>
    %c0_103 = arith.constant 0 : index
    %c0_104 = arith.constant 0 : index
    %110 = vector.load %arg6[%c0_103, %c0_104] : memref<1x8xf32, #tpu.memory_space<vmem>>, vector<1x8xf32>
    %111 = vector.broadcast %110 : vector<1x8xf32> to vector<128x8xf32>
    %112 = arith.addf %109, %111 : vector<128x8xf32>
    %cst_105 = arith.constant 0.000000e+00 : f32
    %113 = vector.broadcast %cst_105 : f32 to vector<128x8xf32>
    %114 = arith.maximumf %112, %113 : vector<128x8xf32>
    %cst_106 = arith.constant 0.000000e+00 : f32
    %115 = vector.broadcast %cst_106 : f32 to vector<2x10x10x8xf32>
    %c0_107 = arith.constant 0 : index
    %c0_108 = arith.constant 0 : index
    %c0_109 = arith.constant 0 : index
    %c0_110 = arith.constant 0 : index
    %116 = vector.load %arg11[%c0_107, %c0_108, %c0_109, %c0_110] : memref<2x10x10x8xf32, #tpu.memory_space<vmem>>, vector<2x10x10x8xf32>
    tpu.vector_store %arg11[%c0_107, %c0_108, %c0_109, %c0_110], %115 {strides = array<i32>} : memref<2x10x10x8xf32, #tpu.memory_space<vmem>>, vector<2x10x10x8xf32>,
    %117 = vector.shape_cast %114 : vector<128x8xf32> to vector<2x8x8x8xf32>
    %c0_111 = arith.constant 0 : index
    %c1_112 = arith.constant 1 : index
    %c1_113 = arith.constant 1 : index
    %c0_114 = arith.constant 0 : index
    %118 = vector.load %arg11[%c0_111, %c1_112, %c1_113, %c0_114] : memref<2x10x10x8xf32, #tpu.memory_space<vmem>>, vector<2x8x8x8xf32>
    tpu.vector_store %arg11[%c0_111, %c1_112, %c1_113, %c0_114], %117 {strides = array<i32>} : memref<2x10x10x8xf32, #tpu.memory_space<vmem>>, vector<2x8x8x8xf32>,
    %cst_115 = arith.constant 0.000000e+00 : f32
    %119 = vector.broadcast %cst_115 : f32 to vector<128x8xf32>
    %c0_116 = arith.constant 0 : index
    %c0_117 = arith.constant 0 : index
    %c0_118 = arith.constant 0 : index
    %c0_119 = arith.constant 0 : index
    %120 = vector.load %arg11[%c0_116, %c0_117, %c0_118, %c0_119] : memref<2x10x10x8xf32, #tpu.memory_space<vmem>>, vector<2x8x8x8xf32>
    %121 = vector.shape_cast %120 : vector<2x8x8x8xf32> to vector<128x8xf32>
    %c0_120 = arith.constant 0 : index
    %c0_121 = arith.constant 0 : index
    %c0_122 = arith.constant 0 : index
    %122 = vector.load %arg7[%c0_120, %c0_121, %c0_122] : memref<9x8x8xf32, #tpu.memory_space<vmem>>, vector<1x8x8xf32>
    %123 = vector.shape_cast %122 : vector<1x8x8xf32> to vector<8x8xf32>
    %cst_123 = arith.constant dense<0.000000e+00> : vector<128x8xf32>
    %124 = tpu.matmul %121, %123, %cst_123 {dimension_numbers = #tpu.dot_dimension_numbers<[1], [0], [0], [1], [0, 0, 1, 1], [], []>} : vector<128x8xf32>, vector<8x8xf32>, vector<128x8xf32> -> vector<128x8xf32>
    %125 = arith.addf %119, %124 : vector<128x8xf32>
    %c0_124 = arith.constant 0 : index
    %c0_125 = arith.constant 0 : index
    %c1_126 = arith.constant 1 : index
    %c0_127 = arith.constant 0 : index
    %126 = vector.load %arg11[%c0_124, %c0_125, %c1_126, %c0_127] : memref<2x10x10x8xf32, #tpu.memory_space<vmem>>, vector<2x8x8x8xf32>
    %127 = vector.shape_cast %126 : vector<2x8x8x8xf32> to vector<128x8xf32>
    %c1_128 = arith.constant 1 : index
    %c0_129 = arith.constant 0 : index
    %c0_130 = arith.constant 0 : index
    %128 = vector.load %arg7[%c1_128, %c0_129, %c0_130] : memref<9x8x8xf32, #tpu.memory_space<vmem>>, vector<1x8x8xf32>
    %129 = vector.shape_cast %128 : vector<1x8x8xf32> to vector<8x8xf32>
    %cst_131 = arith.constant dense<0.000000e+00> : vector<128x8xf32>
    %130 = tpu.matmul %127, %129, %cst_131 {dimension_numbers = #tpu.dot_dimension_numbers<[1], [0], [0], [1], [0, 0, 1, 1], [], []>} : vector<128x8xf32>, vector<8x8xf32>, vector<128x8xf32> -> vector<128x8xf32>
    %131 = arith.addf %125, %130 : vector<128x8xf32>
    %c0_132 = arith.constant 0 : index
    %c0_133 = arith.constant 0 : index
    %c2_134 = arith.constant 2 : index
    %c0_135 = arith.constant 0 : index
    %132 = vector.load %arg11[%c0_132, %c0_133, %c2_134, %c0_135] : memref<2x10x10x8xf32, #tpu.memory_space<vmem>>, vector<2x8x8x8xf32>
    %133 = vector.shape_cast %132 : vector<2x8x8x8xf32> to vector<128x8xf32>
    %c2_136 = arith.constant 2 : index
    %c0_137 = arith.constant 0 : index
    %c0_138 = arith.constant 0 : index
    %134 = vector.load %arg7[%c2_136, %c0_137, %c0_138] : memref<9x8x8xf32, #tpu.memory_space<vmem>>, vector<1x8x8xf32>
    %135 = vector.shape_cast %134 : vector<1x8x8xf32> to vector<8x8xf32>
    %cst_139 = arith.constant dense<0.000000e+00> : vector<128x8xf32>
    %136 = tpu.matmul %133, %135, %cst_139 {dimension_numbers = #tpu.dot_dimension_numbers<[1], [0], [0], [1], [0, 0, 1, 1], [], []>} : vector<128x8xf32>, vector<8x8xf32>, vector<128x8xf32> -> vector<128x8xf32>
    %137 = arith.addf %131, %136 : vector<128x8xf32>
    %c0_140 = arith.constant 0 : index
    %c1_141 = arith.constant 1 : index
    %c0_142 = arith.constant 0 : index
    %c0_143 = arith.constant 0 : index
    %138 = vector.load %arg11[%c0_140, %c1_141, %c0_142, %c0_143] : memref<2x10x10x8xf32, #tpu.memory_space<vmem>>, vector<2x8x8x8xf32>
    %139 = vector.shape_cast %138 : vector<2x8x8x8xf32> to vector<128x8xf32>
    %c3_144 = arith.constant 3 : index
    %c0_145 = arith.constant 0 : index
    %c0_146 = arith.constant 0 : index
    %140 = vector.load %arg7[%c3_144, %c0_145, %c0_146] : memref<9x8x8xf32, #tpu.memory_space<vmem>>, vector<1x8x8xf32>
    %141 = vector.shape_cast %140 : vector<1x8x8xf32> to vector<8x8xf32>
    %cst_147 = arith.constant dense<0.000000e+00> : vector<128x8xf32>
    %142 = tpu.matmul %139, %141, %cst_147 {dimension_numbers = #tpu.dot_dimension_numbers<[1], [0], [0], [1], [0, 0, 1, 1], [], []>} : vector<128x8xf32>, vector<8x8xf32>, vector<128x8xf32> -> vector<128x8xf32>
    %143 = arith.addf %137, %142 : vector<128x8xf32>
    %c0_148 = arith.constant 0 : index
    %c1_149 = arith.constant 1 : index
    %c1_150 = arith.constant 1 : index
    %c0_151 = arith.constant 0 : index
    %144 = vector.load %arg11[%c0_148, %c1_149, %c1_150, %c0_151] : memref<2x10x10x8xf32, #tpu.memory_space<vmem>>, vector<2x8x8x8xf32>
    %145 = vector.shape_cast %144 : vector<2x8x8x8xf32> to vector<128x8xf32>
    %c4_152 = arith.constant 4 : index
    %c0_153 = arith.constant 0 : index
    %c0_154 = arith.constant 0 : index
    %146 = vector.load %arg7[%c4_152, %c0_153, %c0_154] : memref<9x8x8xf32, #tpu.memory_space<vmem>>, vector<1x8x8xf32>
    %147 = vector.shape_cast %146 : vector<1x8x8xf32> to vector<8x8xf32>
    %cst_155 = arith.constant dense<0.000000e+00> : vector<128x8xf32>
    %148 = tpu.matmul %145, %147, %cst_155 {dimension_numbers = #tpu.dot_dimension_numbers<[1], [0], [0], [1], [0, 0, 1, 1], [], []>} : vector<128x8xf32>, vector<8x8xf32>, vector<128x8xf32> -> vector<128x8xf32>
    %149 = arith.addf %143, %148 : vector<128x8xf32>
    %c0_156 = arith.constant 0 : index
    %c1_157 = arith.constant 1 : index
    %c2_158 = arith.constant 2 : index
    %c0_159 = arith.constant 0 : index
    %150 = vector.load %arg11[%c0_156, %c1_157, %c2_158, %c0_159] : memref<2x10x10x8xf32, #tpu.memory_space<vmem>>, vector<2x8x8x8xf32>
    %151 = vector.shape_cast %150 : vector<2x8x8x8xf32> to vector<128x8xf32>
    %c5_160 = arith.constant 5 : index
    %c0_161 = arith.constant 0 : index
    %c0_162 = arith.constant 0 : index
    %152 = vector.load %arg7[%c5_160, %c0_161, %c0_162] : memref<9x8x8xf32, #tpu.memory_space<vmem>>, vector<1x8x8xf32>
    %153 = vector.shape_cast %152 : vector<1x8x8xf32> to vector<8x8xf32>
    %cst_163 = arith.constant dense<0.000000e+00> : vector<128x8xf32>
    %154 = tpu.matmul %151, %153, %cst_163 {dimension_numbers = #tpu.dot_dimension_numbers<[1], [0], [0], [1], [0, 0, 1, 1], [], []>} : vector<128x8xf32>, vector<8x8xf32>, vector<128x8xf32> -> vector<128x8xf32>
    %155 = arith.addf %149, %154 : vector<128x8xf32>
    %c0_164 = arith.constant 0 : index
    %c2_165 = arith.constant 2 : index
    %c0_166 = arith.constant 0 : index
    %c0_167 = arith.constant 0 : index
    %156 = vector.load %arg11[%c0_164, %c2_165, %c0_166, %c0_167] : memref<2x10x10x8xf32, #tpu.memory_space<vmem>>, vector<2x8x8x8xf32>
    %157 = vector.shape_cast %156 : vector<2x8x8x8xf32> to vector<128x8xf32>
    %c6_168 = arith.constant 6 : index
    %c0_169 = arith.constant 0 : index
    %c0_170 = arith.constant 0 : index
    %158 = vector.load %arg7[%c6_168, %c0_169, %c0_170] : memref<9x8x8xf32, #tpu.memory_space<vmem>>, vector<1x8x8xf32>
    %159 = vector.shape_cast %158 : vector<1x8x8xf32> to vector<8x8xf32>
    %cst_171 = arith.constant dense<0.000000e+00> : vector<128x8xf32>
    %160 = tpu.matmul %157, %159, %cst_171 {dimension_numbers = #tpu.dot_dimension_numbers<[1], [0], [0], [1], [0, 0, 1, 1], [], []>} : vector<128x8xf32>, vector<8x8xf32>, vector<128x8xf32> -> vector<128x8xf32>
    %161 = arith.addf %155, %160 : vector<128x8xf32>
    %c0_172 = arith.constant 0 : index
    %c2_173 = arith.constant 2 : index
    %c1_174 = arith.constant 1 : index
    %c0_175 = arith.constant 0 : index
    %162 = vector.load %arg11[%c0_172, %c2_173, %c1_174, %c0_175] : memref<2x10x10x8xf32, #tpu.memory_space<vmem>>, vector<2x8x8x8xf32>
    %163 = vector.shape_cast %162 : vector<2x8x8x8xf32> to vector<128x8xf32>
    %c7_176 = arith.constant 7 : index
    %c0_177 = arith.constant 0 : index
    %c0_178 = arith.constant 0 : index
    %164 = vector.load %arg7[%c7_176, %c0_177, %c0_178] : memref<9x8x8xf32, #tpu.memory_space<vmem>>, vector<1x8x8xf32>
    %165 = vector.shape_cast %164 : vector<1x8x8xf32> to vector<8x8xf32>
    %cst_179 = arith.constant dense<0.000000e+00> : vector<128x8xf32>
    %166 = tpu.matmul %163, %165, %cst_179 {dimension_numbers = #tpu.dot_dimension_numbers<[1], [0], [0], [1], [0, 0, 1, 1], [], []>} : vector<128x8xf32>, vector<8x8xf32>, vector<128x8xf32> -> vector<128x8xf32>
    %167 = arith.addf %161, %166 : vector<128x8xf32>
    %c0_180 = arith.constant 0 : index
    %c2_181 = arith.constant 2 : index
    %c2_182 = arith.constant 2 : index
    %c0_183 = arith.constant 0 : index
    %168 = vector.load %arg11[%c0_180, %c2_181, %c2_182, %c0_183] : memref<2x10x10x8xf32, #tpu.memory_space<vmem>>, vector<2x8x8x8xf32>
    %169 = vector.shape_cast %168 : vector<2x8x8x8xf32> to vector<128x8xf32>
    %c8_184 = arith.constant 8 : index
    %c0_185 = arith.constant 0 : index
    %c0_186 = arith.constant 0 : index
    %170 = vector.load %arg7[%c8_184, %c0_185, %c0_186] : memref<9x8x8xf32, #tpu.memory_space<vmem>>, vector<1x8x8xf32>
    %171 = vector.shape_cast %170 : vector<1x8x8xf32> to vector<8x8xf32>
    %cst_187 = arith.constant dense<0.000000e+00> : vector<128x8xf32>
    %172 = tpu.matmul %169, %171, %cst_187 {dimension_numbers = #tpu.dot_dimension_numbers<[1], [0], [0], [1], [0, 0, 1, 1], [], []>} : vector<128x8xf32>, vector<8x8xf32>, vector<128x8xf32> -> vector<128x8xf32>
    %173 = arith.addf %167, %172 : vector<128x8xf32>
    %174 = vector.extract_strided_slice %24 {offsets = [0, 0], sizes = [128, 4], strides = [1, 1]} : vector<512x4xf32> to vector<128x4xf32>
    %c0_188 = arith.constant 0 : index
    %c0_189 = arith.constant 0 : index
    %175 = vector.load %arg8[%c0_188, %c0_189] : memref<4x8xf32, #tpu.memory_space<vmem>>, vector<4x8xf32>
    %cst_190 = arith.constant dense<0.000000e+00> : vector<128x8xf32>
    %176 = tpu.matmul %174, %175, %cst_190 {dimension_numbers = #tpu.dot_dimension_numbers<[1], [0], [0], [1], [0, 0, 1, 1], [], []>} : vector<128x4xf32>, vector<4x8xf32>, vector<128x8xf32> -> vector<128x8xf32>
    %177 = arith.addf %173, %176 : vector<128x8xf32>
    %178 = tpu.transpose %177, [1, 0] : vector<128x8xf32> -> vector<8x128xf32>
    %c0_191 = arith.constant 0 : index
    %c0_192 = arith.constant 0 : index
    %179 = vector.load %arg9[%c0_191, %c0_192] : memref<8x128xf32, #tpu.memory_space<vmem>>, vector<8x128xf32>
    tpu.vector_store %arg9[%c0_191, %c0_192], %178 {strides = array<i32>} : memref<8x128xf32, #tpu.memory_space<vmem>>, vector<8x128xf32>,
    return
  }
  func.func @transform_0(%arg0: i32) -> (i32, i32) {
    %c0_i32 = arith.constant 0 : i32
    %c0_i32_0 = arith.constant 0 : i32
    %c0_i32_1 = arith.constant 0 : i32
    return %c0_i32, %c0_i32_0 : i32, i32
  }
  func.func @transform_1(%arg0: i32) -> (i32, i32) {
    %c0_i32 = arith.constant 0 : i32
    %c0_i32_0 = arith.constant 0 : i32
    %c0_i32_1 = arith.constant 0 : i32
    return %c0_i32, %c0_i32_0 : i32, i32
  }
  func.func @transform_2(%arg0: i32) -> (i32, i32) {
    %c0_i32 = arith.constant 0 : i32
    %c0_i32_0 = arith.constant 0 : i32
    %c0_i32_1 = arith.constant 0 : i32
    return %c0_i32, %c0_i32_0 : i32, i32
  }
  func.func @transform_3(%arg0: i32) -> (i32, i32, i32) {
    %c0_i32 = arith.constant 0 : i32
    %c0_i32_0 = arith.constant 0 : i32
    %c0_i32_1 = arith.constant 0 : i32
    %c0_i32_2 = arith.constant 0 : i32
    return %c0_i32, %c0_i32_0, %c0_i32_1 : i32, i32, i32
  }
  func.func @transform_4(%arg0: i32) -> (i32, i32) {
    %c0_i32 = arith.constant 0 : i32
    %c0_i32_0 = arith.constant 0 : i32
    %c0_i32_1 = arith.constant 0 : i32
    return %c0_i32, %c0_i32_0 : i32, i32
  }
  func.func @transform_5(%arg0: i32) -> (i32, i32) {
    %c0_i32 = arith.constant 0 : i32
    %c0_i32_0 = arith.constant 0 : i32
    %c0_i32_1 = arith.constant 0 : i32
    return %c0_i32, %c0_i32_0 : i32, i32
  }
  func.func @transform_6(%arg0: i32) -> (i32, i32, i32) {
    %c0_i32 = arith.constant 0 : i32
    %c0_i32_0 = arith.constant 0 : i32
    %c0_i32_1 = arith.constant 0 : i32
    %c0_i32_2 = arith.constant 0 : i32
    return %c0_i32, %c0_i32_0, %c0_i32_1 : i32, i32, i32
  }
  func.func @transform_7(%arg0: i32) -> (i32, i32) {
    %c0_i32 = arith.constant 0 : i32
    %c0_i32_0 = arith.constant 0 : i32
    %c0_i32_1 = arith.constant 0 : i32
    return %c0_i32, %c0_i32_0 : i32, i32
  }
  func.func @transform_8(%arg0: i32) -> (i32, i32) {
    %c0_i32 = arith.constant 0 : i32
    %c0_i32_0 = arith.constant 0 : i32
    %c0_i32_1 = arith.constant 0 : i32
    return %c0_i32, %c0_i32_0 : i32, i32
  }
}

</mosaic_0001>

<bundles_post_ra>
// kernel: tpu_custom_call.1
= control target key start
LH: loop header
LB: loop body
LE: loop exit
PB: predicated region body
PF: predicated region fallthrough
CT: control target
= control target key end

     0   :  { %vm1060_vm0 = vcmask 1043456   ;;  %vm94_vm1 = vcmask 31744   ;;  %v9557_v2 = vmov 0.0   ;;  %s9548_s0 = inlined_call_operand.vmem [shape: f32[512,4], index: 0, kind: input, shape index: {}]   ;;  %s9549_s1 = inlined_call_operand.vmem [shape: f32[1,4], index: 1, kind: input, shape index: {}]   ;;  %s9550_s2 = inlined_call_operand.vmem [shape: f32[1,4], index: 2, kind: input, shape index: {}]   ;;  %s9551_s3 = inlined_call_operand.vmem [shape: f32[9,4,8], index: 3, kind: input, shape index: {}]   ;;  %s9552_s4 = inlined_call_operand.vmem [shape: f32[1,8], index: 4, kind: input, shape index: {}]   ;;  %s9553_s5 = inlined_call_operand.vmem [shape: f32[1,8], index: 5, kind: input, shape index: {}]   ;;  %s9554_s6 = inlined_call_operand.vmem [shape: f32[9,8,8], index: 6, kind: input, shape index: {}]   ;;  %s9555_s7 = inlined_call_operand.vmem [shape: f32[4,8], index: 7, kind: input, shape index: {}]   ;;  %s9556_s8 = inlined_call_operand.hbm [shape: f32[8,128], index: 8, kind: output, shape index: {}]  }
   0x1   :  { %v7039_v0 = vld [vmem:[%s9551_s3 + $0x4] sm:$0xf]  ;;  %800 = vst.msk [vmem:[#allocation2 + $0x120] sm:$0xff] %vm94_vm1, %v9557_v2  ;;  %763 = vst.msk [vmem:[#allocation2] sm:$0xff] %vm94_vm1, %v9557_v2  ;;  %v992_v3 = vld [vmem:[%s9551_s3] sm:$0xf] }
   0x2   :  { %v7044_v1 = vld [vmem:[%s9548_s0] sm:$0xff]  ;;  %6190 = vmatprep.subr.msk.mxu0 %vm1060_vm0, %v7039_v0  ;;  %766 = vst.msk [vmem:[#allocation2 + $0x10] sm:$0xff] %vm94_vm1, %v9557_v2  ;;  %768 = vst.msk [vmem:[#allocation2 + $0x20] sm:$0xff] %vm94_vm1, %v9557_v2  ;;  %v7190_v4 = vld [vmem:[%s9548_s0 + $0x8] sm:$0xff] }
   0x3   :  { %770 = vst.msk [vmem:[#allocation2 + $0x30] sm:$0xff] %vm94_vm1, %v9557_v2  ;;  %772 = vst.msk [vmem:[#allocation2 + $0x40] sm:$0xff] %vm94_vm1, %v9557_v2  ;;  %v7195_v5 = vld [vmem:[%s9548_s0 + $0x10] sm:$0xff]  ;;  %v95_v6 = vsel %vm94_vm1, %v7044_v1, 0.0  ;;  %6191 = vmatpush3.msk.msra.mxu0 %vm1060_vm0, %v7039_v0  ;;  %v7204_v7 = vld [vmem:[%s9548_s0 + $0x18] sm:$0xff]  ;;  %v96_v8 = vsel %vm94_vm1, %v7190_v4, 0.0 }
   0x4   :  { %774 = vst.msk [vmem:[#allocation2 + $0x50] sm:$0xff] %vm94_vm1, %v9557_v2  ;;  %776 = vst.msk [vmem:[#allocation2 + $0x60] sm:$0xff] %vm94_vm1, %v9557_v2  ;;  %v98_v9 = vsel %vm94_vm1, %v7195_v5, 0.0  ;;  %6216 = vmatprep.subr.msk.mxu0 %vm1060_vm0, %v992_v3  ;;  %v7214_v10 = vld [vmem:[%s9548_s0 + $0x20] sm:$0xff]  ;;  %v97_v11 = vadd.f32 %v96_v8, %v95_v6  ;;  %v100_v12 = vsel %vm94_vm1, %v7204_v7, 0.0  ;;  %v7221_v13 = vld [vmem:[%s9548_s0 + $0x28] sm:$0xff] }
   0x5   :  { %778 = vst.msk [vmem:[#allocation2 + $0x70] sm:$0xff] %vm94_vm1, %v9557_v2  ;;  %780 = vst.msk [vmem:[#allocation2 + $0x80] sm:$0xff] %vm94_vm1, %v9557_v2  ;;  %v102_v15 = vsel %vm94_vm1, %v7214_v10, 0.0  ;;  %v7228_v16 = vld [vmem:[%s9548_s0 + $0x30] sm:$0xff]  ;;  %v104_v19 = vsel %vm94_vm1, %v7221_v13, 0.0  ;;  %v7236_v20 = vld [vmem:[%s9548_s0 + $0x38] sm:$0xff] }
   0x6   :  { %782 = vst.msk [vmem:[#allocation2 + $0x90] sm:$0xff] %vm94_vm1, %v9557_v2  ;;  %784 = vst.msk [vmem:[#allocation2 + $0xa0] sm:$0xff] %vm94_vm1, %v9557_v2  ;;  %v99_v14 = vadd.f32 %v98_v9, %v97_v11  ;;  %v106_v22 = vsel %vm94_vm1, %v7228_v16, 0.0  ;;  %v7243_v23 = vld [vmem:[%s9548_s0 + $0x40] sm:$0xff]  ;;  %v108_v25 = vsel %vm94_vm1, %v7236_v20, 0.0  ;;  %v7250_v26 = vld [vmem:[%s9548_s0 + $0x48] sm:$0xff] }
   0x7   :  { %786 = vst.msk [vmem:[#allocation2 + $0xb0] sm:$0xff] %vm94_vm1, %v9557_v2  ;;  %788 = vst.msk [vmem:[#allocation2 + $0xc0] sm:$0xff] %vm94_vm1, %v9557_v2  ;;  %v110_v28 = vsel %vm94_vm1, %v7243_v23, 0.0  ;;  %v7257_v29 = vld [vmem:[%s9548_s0 + $0x50] sm:$0xff]  ;;  %v112_v31 = vsel %vm94_vm1, %v7250_v26, 0.0  ;;  %v7264_v32 = vld [vmem:[%s9548_s0 + $0x58] sm:$0xff] }
   0x8   :  { %790 = vst.msk [vmem:[#allocation2 + $0xd0] sm:$0xff] %vm94_vm1, %v9557_v2  ;;  %792 = vst.msk [vmem:[#allocation2 + $0xe0] sm:$0xff] %vm94_vm1, %v9557_v2  ;;  %v101_v17 = vadd.f32 %v100_v12, %v99_v14  ;;  %v994_v18 = vld [vmem:[#allocation2 + $0x120] sm:$0xff]  ;;  %v114_v34 = vsel %vm94_vm1, %v7257_v29, 0.0  ;;  %v116_v37 = vsel %vm94_vm1, %v7264_v32, 0.0  ;;  %v7278_v38 = vld [vmem:[%s9548_s0 + $0x68] sm:$0xff] }
   0x9   :  { %794 = vst.msk [vmem:[#allocation2 + $0xf0] sm:$0xff] %vm94_vm1, %v9557_v2  ;;  %796 = vst.msk [vmem:[#allocation2 + $0x100] sm:$0xff] %vm94_vm1, %v9557_v2  ;;  %6192 = vmatprep.mubr.msk.f32.mxu0 %vm94_vm1, %v994_v18  ;;  %v7271_v35 = vld [vmem:[%s9548_s0 + $0x60] sm:$0xff]  ;;  %v7285_v41 = vld [vmem:[%s9548_s0 + $0x70] sm:$0xff] }
   0xa   :  { %798 = vst.msk [vmem:[#allocation2 + $0x110] sm:$0xff] %vm94_vm1, %v9557_v2  ;;  %802 = vst.msk [vmem:[#allocation2 + $0x130] sm:$0xff] %vm94_vm1, %v9557_v2  ;;  %v103_v21 = vadd.f32 %v102_v15, %v101_v17  ;;  %v118_v40 = vsel %vm94_vm1, %v7271_v35, 0.0 }
   0xb   :  { %804 = vst.msk [vmem:[#allocation2 + $0x140] sm:$0xff] %vm94_vm1, %v9557_v2  ;;  %806 = vst.msk [vmem:[#allocation2 + $0x150] sm:$0xff] %vm94_vm1, %v9557_v2 }
   0xc   :  { %808 = vst.msk [vmem:[#allocation2 + $0x160] sm:$0xff] %vm94_vm1, %v9557_v2  ;;  %810 = vst.msk [vmem:[#allocation2 + $0x170] sm:$0xff] %vm94_vm1, %v9557_v2  ;;  %v105_v24 = vadd.f32 %v104_v19, %v103_v21 }
   0xd   :  { %812 = vst.msk [vmem:[#allocation2 + $0x180] sm:$0xff] %vm94_vm1, %v9557_v2  ;;  %814 = vst.msk [vmem:[#allocation2 + $0x190] sm:$0xff] %vm94_vm1, %v9557_v2 }
   0xe   :  { %816 = vst.msk [vmem:[#allocation2 + $0x1a0] sm:$0xff] %vm94_vm1, %v9557_v2  ;;  %818 = vst.msk [vmem:[#allocation2 + $0x1b0] sm:$0xff] %vm94_vm1, %v9557_v2  ;;  %v107_v27 = vadd.f32 %v106_v22, %v105_v24 }
   0xf   :  { %820 = vst.msk [vmem:[#allocation2 + $0x1c0] sm:$0xff] %vm94_vm1, %v9557_v2  ;;  %822 = vst.msk [vmem:[#allocation2 + $0x1d0] sm:$0xff] %vm94_vm1, %v9557_v2 }
  0x10   :  { %824 = vst.msk [vmem:[#allocation2 + $0x1e0] sm:$0xff] %vm94_vm1, %v9557_v2  ;;  %826 = vst.msk [vmem:[#allocation2 + $0x1f0] sm:$0xff] %vm94_vm1, %v9557_v2  ;;  %v109_v30 = vadd.f32 %v108_v25, %v107_v27 }
  0x11   :  { %828 = vst.msk [vmem:[#allocation2 + $0x200] sm:$0xff] %vm94_vm1, %v9557_v2  ;;  %830 = vst.msk [vmem:[#allocation2 + $0x210] sm:$0xff] %vm94_vm1, %v9557_v2 }
  0x12   :  { %832 = vst.msk [vmem:[#allocation2 + $0x220] sm:$0xff] %vm94_vm1, %v9557_v2  ;;  %834 = vst.msk [vmem:[#allocation2 + $0x230] sm:$0xff] %vm94_vm1, %v9557_v2  ;;  %v111_v33 = vadd.f32 %v110_v28, %v109_v30 }
  0x13   :  { %836 = vst.msk [vmem:[#allocation2 + $0x240] sm:$0xff] %vm94_vm1, %v9557_v2  ;;  %838 = vst.msk [vmem:[#allocation2 + $0x250] sm:$0xff] %vm94_vm1, %v9557_v2 }
  0x14   :  { %840 = vst.msk [vmem:[#allocation2 + $0x260] sm:$0xff] %vm94_vm1, %v9557_v2  ;;  %842 = vst.msk [vmem:[#allocation2 + $0x270] sm:$0xff] %vm94_vm1, %v9557_v2  ;;  %v113_v36 = vadd.f32 %v112_v31, %v111_v33 }
  0x15   :  { %844 = vst.msk [vmem:[#allocation2 + $0x280] sm:$0xff] %vm94_vm1, %v9557_v2  ;;  %846 = vst.msk [vmem:[#allocation2 + $0x290] sm:$0xff] %vm94_vm1, %v9557_v2 }
  0x16   :  { %848 = vst.msk [vmem:[#allocation2 + $0x2a0] sm:$0xff] %vm94_vm1, %v9557_v2  ;;  %850 = vst.msk [vmem:[#allocation2 + $0x2b0] sm:$0xff] %vm94_vm1, %v9557_v2  ;;  %v115_v39 = vadd.f32 %v114_v34, %v113_v36 }
  0x17   :  { %854 = vst.msk [vmem:[#allocation2 + $0x2d0] sm:$0xff] %vm94_vm1, %v9557_v2  ;;  %856 = vst.msk [vmem:[#allocation2 + $0x2e0] sm:$0xff] %vm94_vm1, %v9557_v2 }
  0x18   :  { %858 = vst.msk [vmem:[#allocation2 + $0x2f0] sm:$0xff] %vm94_vm1, %v9557_v2  ;;  %860 = vst.msk [vmem:[#allocation2 + $0x300] sm:$0xff] %vm94_vm1, %v9557_v2  ;;  %v117_v42 = vadd.f32 %v116_v37, %v115_v39 }
  0x19   :  { %862 = vst.msk [vmem:[#allocation2 + $0x310] sm:$0xff] %vm94_vm1, %v9557_v2  ;;  %864 = vst.msk [vmem:[#allocation2 + $0x320] sm:$0xff] %vm94_vm1, %v9557_v2 }
  0x1a   :  { %866 = vst.msk [vmem:[#allocation2 + $0x330] sm:$0xff] %vm94_vm1, %v9557_v2  ;;  %868 = vst.msk [vmem:[#allocation2 + $0x340] sm:$0xff] %vm94_vm1, %v9557_v2 }
  0x1b   :  { %872 = vst.msk [vmem:[#allocation2 + $0x360] sm:$0xff] %vm94_vm1, %v9557_v2  ;;  %874 = vst.msk [vmem:[#allocation2 + $0x370] sm:$0xff] %vm94_vm1, %v9557_v2 }
  0x1c   :  { %876 = vst.msk [vmem:[#allocation2 + $0x380] sm:$0xff] %vm94_vm1, %v9557_v2  ;;  %878 = vst.msk [vmem:[#allocation2 + $0x390] sm:$0xff] %vm94_vm1, %v9557_v2 }
  0x1d   :  { %880 = vst.msk [vmem:[#allocation2 + $0x3a0] sm:$0xff] %vm94_vm1, %v9557_v2  ;;  %882 = vst.msk [vmem:[#allocation2 + $0x3b0] sm:$0xff] %vm94_vm1, %v9557_v2 }
  0x1e   :  { %884 = vst.msk [vmem:[#allocation2 + $0x3c0] sm:$0xff] %vm94_vm1, %v9557_v2  ;;  %886 = vst.msk [vmem:[#allocation2 + $0x3d0] sm:$0xff] %vm94_vm1, %v9557_v2 }
  0x1f   :  { %890 = vst.msk [vmem:[#allocation2 + $0x3f0] sm:$0xff] %vm94_vm1, %v9557_v2  ;;  %892 = vst.msk [vmem:[#allocation2 + $0x400] sm:$0xff] %vm94_vm1, %v9557_v2 }
  0x20   :  { %894 = vst.msk [vmem:[#allocation2 + $0x410] sm:$0xff] %vm94_vm1, %v9557_v2  ;;  %896 = vst.msk [vmem:[#allocation2 + $0x420] sm:$0xff] %vm94_vm1, %v9557_v2 }
  0x21   :  { %898 = vst.msk [vmem:[#allocation2 + $0x430] sm:$0xff] %vm94_vm1, %v9557_v2  ;;  %900 = vst.msk [vmem:[#allocation2 + $0x440] sm:$0xff] %vm94_vm1, %v9557_v2 }
  0x22   :  { %902 = vst.msk [vmem:[#allocation2 + $0x450] sm:$0xff] %vm94_vm1, %v9557_v2  ;;  %904 = vst.msk [vmem:[#allocation2 + $0x460] sm:$0xff] %vm94_vm1, %v9557_v2 }
  0x23   :  { %13 = vsyncpa [#allocation5], 0  ;;  %v120_v43 = vsel %vm94_vm1, %v7278_v38, 0.0  ;;  %v7292_v44 = vld [vmem:[%s9548_s0 + $0x78] sm:$0xff]  ;;  %v119_v45 = vadd.f32 %v118_v40, %v117_v42  ;;  %v122_v46 = vsel %vm94_vm1, %v7285_v41, 0.0  ;;  %v7299_v47 = vld [vmem:[%s9548_s0 + $0x80] sm:$0xff] }
  0x24   :  { %v124_v49 = vsel %vm94_vm1, %v7292_v44, 0.0  ;;  %v7306_v50 = vld [vmem:[%s9548_s0 + $0x88] sm:$0xff]  ;;  %v126_v52 = vsel %vm94_vm1, %v7299_v47, 0.0  ;;  %v7313_v53 = vld [vmem:[%s9548_s0 + $0x90] sm:$0xff]  ;;  %v7320_v56 = vld [vmem:[%s9548_s0 + $0x98] sm:$0xff]  ;;  %vm764_vm2 = vcmask 24576  }
  0x25   :  { %v121_v48 = vadd.f32 %v120_v43, %v119_v45  ;;  %v128_v55 = vsel %vm94_vm1, %v7306_v50, 0.0  ;;  %v130_v58 = vsel %vm94_vm1, %v7313_v53, 0.0  ;;  %v7327_v59 = vld [vmem:[%s9548_s0 + $0xa0] sm:$0xff]  ;;  %v132_v61 = vsel %vm94_vm1, %v7320_v56, 0.0  ;;  %v7334_v62 = vld [vmem:[%s9548_s0 + $0xa8] sm:$0xff]  ;;  %v7341_v3 = vld [vmem:[%s9548_s0 + $0xb0] sm:$0xff] }
  0x26   :  { %v134_v0 = vsel %vm94_vm1, %v7327_v59, 0.0  ;;  %v136_v8 = vsel %vm94_vm1, %v7334_v62, 0.0  ;;  %v7348_v9 = vld [vmem:[%s9548_s0 + $0xb8] sm:$0xff]  ;;  %v138_v12 = vsel %vm94_vm1, %v7341_v3, 0.0  ;;  %v7355_v14 = vld [vmem:[%s9548_s0 + $0xc0] sm:$0xff]  ;;  %v7362_v18 = vld [vmem:[%s9548_s0 + $0xc8] sm:$0xff] }
  0x27   :  { %v123_v51 = vadd.f32 %v122_v46, %v121_v48  ;;  %v140_v17 = vsel %vm94_vm1, %v7348_v9, 0.0  ;;  %v142_v21 = vsel %vm94_vm1, %v7355_v14, 0.0  ;;  %v7369_v22 = vld [vmem:[%s9548_s0 + $0xd0] sm:$0xff]  ;;  %v144_v25 = vsel %vm94_vm1, %v7362_v18, 0.0  ;;  %v7376_v27 = vld [vmem:[%s9548_s0 + $0xd8] sm:$0xff]  ;;  %v7383_v31 = vld [vmem:[%s9548_s0 + $0xe0] sm:$0xff] }
  0x28   :  { %v146_v30 = vsel %vm94_vm1, %v7369_v22, 0.0  ;;  %v148_v34 = vsel %vm94_vm1, %v7376_v27, 0.0  ;;  %v7390_v36 = vld [vmem:[%s9548_s0 + $0xe8] sm:$0xff]  ;;  %v150_v39 = vsel %vm94_vm1, %v7383_v31, 0.0  ;;  %v7397_v40 = vld [vmem:[%s9548_s0 + $0xf0] sm:$0xff]  ;;  %v7404_v45 = vld [vmem:[%s9548_s0 + $0xf8] sm:$0xff] }
  0x29   :  { %v125_v54 = vadd.f32 %v124_v49, %v123_v51  ;;  %v152_v43 = vsel %vm94_vm1, %v7390_v36, 0.0  ;;  %v154_v48 = vsel %vm94_vm1, %v7397_v40, 0.0  ;;  %v7411_v49 = vld [vmem:[%s9548_s0 + $0x100] sm:$0xff]  ;;  %vm3015_vm3 = vcmask 64512  }
  0x2a   :  { %vm3205_vm4 = vcmask 58368  }
  0x2b   :  { %v127_v57 = vadd.f32 %v126_v52, %v125_v54  ;;  %v156_v52 = vsel %vm94_vm1, %v7404_v45, 0.0  ;;  %v7418_v54 = vld [vmem:[%s9548_s0 + $0x108] sm:$0xff] }
  0x2d   :  { %v129_v60 = vadd.f32 %v128_v55, %v127_v57  ;;  %v158_v57 = vsel %vm94_vm1, %v7411_v49, 0.0 }
  0x2f   :  { %v131_v63 = vadd.f32 %v130_v58, %v129_v60  ;;  %v7425_v58 = vld [vmem:[%s9548_s0 + $0x110] sm:$0xff] }
  0x31   :  { %v133_v6 = vadd.f32 %v132_v61, %v131_v63  ;;  %v160_v61 = vsel %vm94_vm1, %v7418_v54, 0.0  ;;  %v7432_v63 = vld [vmem:[%s9548_s0 + $0x118] sm:$0xff] }
  0x33   :  { %v135_v11 = vadd.f32 %v134_v0, %v133_v6  ;;  %v162_v6 = vsel %vm94_vm1, %v7425_v58, 0.0 }
  0x35   :  { %v137_v15 = vadd.f32 %v136_v8, %v135_v11  ;;  %v7439_v8 = vld [vmem:[%s9548_s0 + $0x120] sm:$0xff] }
  0x37   :  { %v139_v19 = vadd.f32 %v138_v12, %v137_v15  ;;  %v164_v12 = vsel %vm94_vm1, %v7432_v63, 0.0  ;;  %v7446_v15 = vld [vmem:[%s9548_s0 + $0x128] sm:$0xff] }
  0x39   :  { %v141_v24 = vadd.f32 %v140_v17, %v139_v19  ;;  %v166_v19 = vsel %vm94_vm1, %v7439_v8, 0.0 }
  0x3b   :  { %v143_v28 = vadd.f32 %v142_v21, %v141_v24  ;;  %v7453_v21 = vld [vmem:[%s9548_s0 + $0x130] sm:$0xff] }
  0x3d   :  { %v145_v33 = vadd.f32 %v144_v25, %v143_v28  ;;  %v168_v25 = vsel %vm94_vm1, %v7446_v15, 0.0  ;;  %v7460_v28 = vld [vmem:[%s9548_s0 + $0x138] sm:$0xff] }
  0x3f   :  { %v147_v37 = vadd.f32 %v146_v30, %v145_v33  ;;  %v170_v33 = vsel %vm94_vm1, %v7453_v21, 0.0 }
  0x41   :  { %v149_v42 = vadd.f32 %v148_v34, %v147_v37  ;;  %v7467_v34 = vld [vmem:[%s9548_s0 + $0x140] sm:$0xff] }
  0x43   :  { %v151_v46 = vadd.f32 %v150_v39, %v149_v42  ;;  %v172_v39 = vsel %vm94_vm1, %v7460_v28, 0.0  ;;  %v7474_v42 = vld [vmem:[%s9548_s0 + $0x148] sm:$0xff] }
  0x45   :  { %v153_v51 = vadd.f32 %v152_v43, %v151_v46  ;;  %v174_v46 = vsel %vm94_vm1, %v7467_v34, 0.0 }
  0x47   :  { %v155_v55 = vadd.f32 %v154_v48, %v153_v51  ;;  %v7481_v48 = vld [vmem:[%s9548_s0 + $0x150] sm:$0xff] }
  0x49   :  { %v157_v60 = vadd.f32 %v156_v52, %v155_v55  ;;  %v176_v52 = vsel %vm94_vm1, %v7474_v42, 0.0  ;;  %v7488_v55 = vld [vmem:[%s9548_s0 + $0x158] sm:$0xff] }
  0x4b   :  { %v159_v0 = vadd.f32 %v158_v57, %v157_v60  ;;  %v178_v60 = vsel %vm94_vm1, %v7481_v48, 0.0 }
  0x4d   :  { %v161_v11 = vadd.f32 %v160_v61, %v159_v0  ;;  %v7495_v61 = vld [vmem:[%s9548_s0 + $0x160] sm:$0xff] }
  0x4f   :  { %v163_v17 = vadd.f32 %v162_v6, %v161_v11  ;;  %v180_v6 = vsel %vm94_vm1, %v7488_v55, 0.0  ;;  %v7502_v11 = vld [vmem:[%s9548_s0 + $0x168] sm:$0xff] }
  0x51   :  { %v165_v24 = vadd.f32 %v164_v12, %v163_v17  ;;  %v182_v17 = vsel %vm94_vm1, %v7495_v61, 0.0 }
  0x53   :  { %v167_v30 = vadd.f32 %v166_v19, %v165_v24  ;;  %v7509_v19 = vld [vmem:[%s9548_s0 + $0x170] sm:$0xff] }
  0x55   :  { %v169_v37 = vadd.f32 %v168_v25, %v167_v30  ;;  %v184_v25 = vsel %vm94_vm1, %v7502_v11, 0.0  ;;  %v7516_v30 = vld [vmem:[%s9548_s0 + $0x178] sm:$0xff] }
  0x57   :  { %v171_v43 = vadd.f32 %v170_v33, %v169_v37  ;;  %v186_v37 = vsel %vm94_vm1, %v7509_v19, 0.0 }
  0x59   :  { %v173_v51 = vadd.f32 %v172_v39, %v171_v43  ;;  %v7523_v39 = vld [vmem:[%s9548_s0 + $0x180] sm:$0xff] }
  0x5b   :  { %v175_v57 = vadd.f32 %v174_v46, %v173_v51  ;;  %v188_v46 = vsel %vm94_vm1, %v7516_v30, 0.0  ;;  %v7530_v51 = vld [vmem:[%s9548_s0 + $0x188] sm:$0xff] }
  0x5c   :  { %9607 = vst [vmem:[#allocation7_spill] sm:$0xff] %v7530_v51 }
  0x5d   :  { %v177_v0 = vadd.f32 %v176_v52, %v175_v57  ;;  %v190_v57 = vsel %vm94_vm1, %v7523_v39, 0.0 }
  0x5f   :  { %v179_v12 = vadd.f32 %v178_v60, %v177_v0  ;;  %v7537_v60 = vld [vmem:[%s9548_s0 + $0x190] sm:$0xff] }
  0x60   :  { %9608 = vst [vmem:[#allocation8_spill] sm:$0xff] %v7537_v60 }
  0x61   :  { %v181_v24 = vadd.f32 %v180_v6, %v179_v12  ;;  %v192_v6 = vsel %vm94_vm1, %v7530_v51, 0.0  ;;  %v7544_v12 = vld [vmem:[%s9548_s0 + $0x198] sm:$0xff] }
  0x62   :  { %9609 = vst [vmem:[#allocation9_spill] sm:$0xff] %v7544_v12 }
  0x63   :  { %v183_v33 = vadd.f32 %v182_v17, %v181_v24  ;;  %v194_v24 = vsel %vm94_vm1, %v7537_v60, 0.0 }
  0x65   :  { %v185_v43 = vadd.f32 %v184_v25, %v183_v33  ;;  %v7551_v25 = vld [vmem:[%s9548_s0 + $0x1a0] sm:$0xff] }
  0x66   :  { %9610 = vst [vmem:[#allocation10_spill] sm:$0xff] %v7551_v25 }
  0x67   :  { %v187_v52 = vadd.f32 %v186_v37, %v185_v43  ;;  %v196_v37 = vsel %vm94_vm1, %v7544_v12, 0.0  ;;  %v7558_v43 = vld [vmem:[%s9548_s0 + $0x1a8] sm:$0xff] }
  0x68   :  { %9611 = vst [vmem:[#allocation11_spill] sm:$0xff] %v7558_v43 }
  0x69   :  { %v189_v0 = vadd.f32 %v188_v46, %v187_v52  ;;  %v198_v52 = vsel %vm94_vm1, %v7551_v25, 0.0 }
  0x6b   :  { %v191_v17 = vadd.f32 %v190_v57, %v189_v0  ;;  %v7565_v57 = vld [vmem:[%s9548_s0 + $0x1b0] sm:$0xff] }
  0x6c   :  { %9612 = vst [vmem:[#allocation12_spill] sm:$0xff] %v7565_v57 }
  0x6d   :  { %v193_v33 = vadd.f32 %v192_v6, %v191_v17  ;;  %v200_v6 = vsel %vm94_vm1, %v7558_v43, 0.0  ;;  %v7572_v17 = vld [vmem:[%s9548_s0 + $0x1b8] sm:$0xff] }
  0x6e   :  { %9613 = vst [vmem:[#allocation13_spill] sm:$0xff] %v7572_v17 }
  0x6f   :  { %v195_v46 = vadd.f32 %v194_v24, %v193_v33  ;;  %v202_v24 = vsel %vm94_vm1, %v7565_v57, 0.0  ;;  %v7579_v33 = vld [vmem:[%s9548_s0 + $0x1c0] sm:$0xff] }
  0x70   :  { %9614 = vst [vmem:[#allocation14_spill] sm:$0xff] %v7579_v33 }
  0x71   :  { %v197_v0 = vadd.f32 %v196_v37, %v195_v46  ;;  %v204_v37 = vsel %vm94_vm1, %v7572_v17, 0.0  ;;  %v7586_v46 = vld [vmem:[%s9548_s0 + $0x1c8] sm:$0xff] }
  0x72   :  { %9615 = vst [vmem:[#allocation15_spill] sm:$0xff] %v7586_v46 }
  0x73   :  { %v199_v2 = vadd.f32 %v198_v52, %v197_v0  ;;  %v206_v52 = vsel %vm94_vm1, %v7579_v33, 0.0  ;;  %v7593_v0 = vld [vmem:[%s9548_s0 + $0x1d0] sm:$0xff] }
  0x74   :  { %9616 = vst [vmem:[#allocation16_spill] sm:$0xff] %v7593_v0 }
  0x75   :  { %v201_v25 = vadd.f32 %v200_v6, %v199_v2  ;;  %v208_v2 = vsel %vm94_vm1, %v7586_v46, 0.0  ;;  %v7600_v6 = vld [vmem:[%s9548_s0 + $0x1d8] sm:$0xff] }
  0x76   :  { %9617 = vst [vmem:[#allocation17_spill] sm:$0xff] %v7600_v6  ;;  %v212_v33 = vsel %vm94_vm1, %v7600_v6, 0.0 }
  0x77   :  { %v203_v43 = vadd.f32 %v202_v24, %v201_v25  ;;  %v210_v25 = vsel %vm94_vm1, %v7593_v0, 0.0 }
  0x79   :  { %v205_v57 = vadd.f32 %v204_v37, %v203_v43  ;;  %v7609_v43 = vld [vmem:[%s9548_s0 + $0x1e0] sm:$0xff] }
  0x7a   :  { %9618 = vst [vmem:[#allocation18_spill] sm:$0xff] %v7609_v43  ;;  %v214_v12 = vsel %vm94_vm1, %v7609_v43, 0.0 }
  0x7b   :  { %v207_v17 = vadd.f32 %v206_v52, %v205_v57  ;;  %v7616_v57 = vld [vmem:[%s9548_s0 + $0x1e8] sm:$0xff] }
  0x7c   :  { %9619 = vst [vmem:[#allocation19_spill] sm:$0xff] %v7616_v57 }
  0x7d   :  { %v209_v24 = vadd.f32 %v208_v2, %v207_v17  ;;  %v216_v17 = vsel %vm94_vm1, %v7616_v57, 0.0  ;;  %v7623_v2 = vld [vmem:[%s9548_s0 + $0x1f0] sm:$0xff] }
  0x7e   :  { %9620 = vst [vmem:[#allocation20_spill] sm:$0xff] %v7623_v2 }
  0x7f   :  { %v211_v37 = vadd.f32 %v210_v25, %v209_v24  ;;  %v7630_v25 = vld [vmem:[%s9548_s0 + $0x1f8] sm:$0xff] }
  0x81   :  { %v213_v46 = vadd.f32 %v212_v33, %v211_v37  ;;  %v218_v33 = vsel %vm94_vm1, %v7623_v2, 0.0 }
  0x83   :  { %v215_v52 = vadd.f32 %v214_v12, %v213_v46  ;;  %v220_v12 = vsel %vm94_vm1, %v7630_v25, 0.0 }
  0x85   :  { %v217_v6 = vadd.f32 %v216_v17, %v215_v52 }
  0x87   :  { %v219_v24 = vadd.f32 %v218_v33, %v217_v6 }
  0x89   :  { %v221_v46 = vadd.f32 %v220_v12, %v219_v24 }
  0x8b   :  { %v222_v37 = vrot.slane %v221_v46, 4 }
  0x8d   :  { %v223_v57 = vadd.f32 %v222_v37, %v221_v46 }
  0x8f   :  { %v224_v43 = vrot.slane %v223_v57, 2 }
  0x91   :  { %v225_v0 = vadd.f32 %v224_v43, %v223_v57 }
  0x93   :  { %v226_v60 = vrot.slane %v225_v0, 1 }
  0x95   :  { %v227_v51 = vadd.f32 %v226_v60, %v225_v0 }
  0x97   :  { %v7634_v52 = vmul.f32 0.001953125, %v227_v51 }
  0x99   :  { %v7638_v17 = vsub.f32 %v7044_v1, %v7634_v52  ;;  %v7642_v2 = vsub.f32 %v7190_v4, %v7634_v52  ;;  %v7646_v6 = vsub.f32 %v7195_v5, %v7634_v52  ;;  %v7650_v33 = vsub.f32 %v7204_v7, %v7634_v52 }
  0x9a   :  { %v7654_v51 = vsub.f32 %v7214_v10, %v7634_v52  ;;  %v7664_v5 = vsub.f32 %v7221_v13, %v7634_v52  ;;  %v7670_v10 = vsub.f32 %v7228_v16, %v7634_v52  ;;  %v7679_v13 = vsub.f32 %v7236_v20, %v7634_v52 }
  0x9b   :  { %9621 = vst [vmem:[#allocation21_spill] sm:$0xff] %v7638_v17  ;;  %9622 = vst [vmem:[#allocation22_spill] sm:$0xff] %v7642_v2  ;;  %v293_v1 = vmul.f32 %v7638_v17, %v7638_v17  ;;  %v294_v60 = vmul.f32 %v7642_v2, %v7642_v2  ;;  %v295_v4 = vmul.f32 %v7646_v6, %v7646_v6 }
  0x9c   :  { %9623 = vst [vmem:[#allocation23_spill] sm:$0xff] %v7646_v6  ;;  %9624 = vst [vmem:[#allocation24_spill] sm:$0xff] %v7650_v33  ;;  %v296_v7 = vmul.f32 %v7650_v33, %v7650_v33  ;;  %v297_v0 = vmul.f32 %v7654_v51, %v7654_v51  ;;  %v298_v46 = vmul.f32 %v7664_v5, %v7664_v5 }
  0x9d   :  { %9625 = vst [vmem:[#allocation25_spill] sm:$0xff] %v7654_v51  ;;  %9626 = vst [vmem:[#allocation26_spill] sm:$0xff] %v7664_v5  ;;  %v357_v43 = vsel %vm94_vm1, %v293_v1, 0.0  ;;  %v358_v57 = vsel %vm94_vm1, %v294_v60, 0.0  ;;  %v360_v24 = vsel %vm94_vm1, %v295_v4, 0.0  ;;  %v7686_v51 = vsub.f32 %v7243_v23, %v7634_v52 }
  0x9e   :  { %9627 = vst [vmem:[#allocation27_spill] sm:$0xff] %v7670_v10  ;;  %v359_v12 = vadd.f32 %v358_v57, %v357_v43  ;;  %9628 = vst [vmem:[#allocation28_spill] sm:$0xff] %v7679_v13  ;;  %v362_v16 = vsel %vm94_vm1, %v296_v7, 0.0  ;;  %v299_v1 = vmul.f32 %v7670_v10, %v7670_v10  ;;  %v364_v60 = vsel %vm94_vm1, %v297_v0, 0.0 }
  0x9f   :  { %9629 = vst [vmem:[#allocation29_spill] sm:$0xff] %v7686_v51  ;;  %v7693_v20 = vsub.f32 %v7250_v26, %v7634_v52  ;;  %v300_v43 = vmul.f32 %v7679_v13, %v7679_v13  ;;  %v366_v7 = vsel %vm94_vm1, %v298_v46, 0.0  ;;  %v7700_v23 = vsub.f32 %v7257_v29, %v7634_v52 }
  0xa0   :  { %v361_v37 = vadd.f32 %v360_v24, %v359_v12  ;;  %v301_v24 = vmul.f32 %v7686_v51, %v7686_v51  ;;  %v368_v0 = vsel %vm94_vm1, %v299_v1, 0.0  ;;  %v7707_v26 = vsub.f32 %v7264_v32, %v7634_v52 }
  0xa1   :  { %9630 = vst [vmem:[#allocation30_spill] sm:$0xff] %v7693_v20  ;;  %9631 = vst [vmem:[#allocation31_spill] sm:$0xff] %v7700_v23  ;;  %v370_v46 = vsel %vm94_vm1, %v300_v43, 0.0  ;;  %v7714_v29 = vsub.f32 %v7271_v35, %v7634_v52  ;;  %v7721_v32 = vsub.f32 %v7278_v38, %v7634_v52  ;;  %v7728_v35 = vsub.f32 %v7285_v41, %v7634_v52 }
  0xa2   :  { %v363_v4 = vadd.f32 %v362_v16, %v361_v37  ;;  %9632 = vst [vmem:[#allocation32_spill] sm:$0xff] %v7707_v26  ;;  %v302_v16 = vmul.f32 %v7693_v20, %v7693_v20  ;;  %v372_v1 = vsel %vm94_vm1, %v301_v24, 0.0  ;;  %v7735_v38 = vsub.f32 %v7292_v44, %v7634_v52 }
  0xa3   :  { %9633 = vst [vmem:[#allocation33_spill] sm:$0xff] %v7714_v29  ;;  %9634 = vst [vmem:[#allocation34_spill] sm:$0xff] %v7721_v32  ;;  %v7742_v41 = vsub.f32 %v7299_v47, %v7634_v52  ;;  %v7749_v44 = vsub.f32 %v7306_v50, %v7634_v52  ;;  %v7756_v47 = vsub.f32 %v7313_v53, %v7634_v52 }
  0xa4   :  { %v365_v57 = vadd.f32 %v364_v60, %v363_v4  ;;  %v303_v60 = vmul.f32 %v7700_v23, %v7700_v23  ;;  %v374_v43 = vsel %vm94_vm1, %v302_v16, 0.0  ;;  %9635 = vst [vmem:[#allocation35_spill] sm:$0xff] %v7728_v35  ;;  %9636 = vst [vmem:[#allocation36_spill] sm:$0xff] %v7735_v38  ;;  %v7763_v50 = vsub.f32 %v7320_v56, %v7634_v52 }
  0xa5   :  { %v7770_v53 = vsub.f32 %v7327_v59, %v7634_v52  ;;  %v7777_v56 = vsub.f32 %v7334_v62, %v7634_v52  ;;  %v7784_v59 = vsub.f32 %v7341_v3, %v7634_v52  ;;  %v7791_v62 = vsub.f32 %v7348_v9, %v7634_v52 }
  0xa6   :  { %v367_v12 = vadd.f32 %v366_v7, %v365_v57  ;;  %v304_v7 = vmul.f32 %v7707_v26, %v7707_v26  ;;  %v376_v24 = vsel %vm94_vm1, %v303_v60, 0.0  ;;  %v7798_v3 = vsub.f32 %v7355_v14, %v7634_v52 }
  0xa7   :  { %v7805_v9 = vsub.f32 %v7362_v18, %v7634_v52  ;;  %v7812_v14 = vsub.f32 %v7369_v22, %v7634_v52  ;;  %v7819_v18 = vsub.f32 %v7376_v27, %v7634_v52  ;;  %v7826_v22 = vsub.f32 %v7383_v31, %v7634_v52 }
  0xa8   :  { %v369_v37 = vadd.f32 %v368_v0, %v367_v12  ;;  %v305_v0 = vmul.f32 %v7714_v29, %v7714_v29  ;;  %v378_v16 = vsel %vm94_vm1, %v304_v7, 0.0  ;;  %v7833_v27 = vsub.f32 %v7390_v36, %v7634_v52 }
  0xa9   :  { %v7840_v31 = vsub.f32 %v7397_v40, %v7634_v52  ;;  %v7847_v36 = vsub.f32 %v7404_v45, %v7634_v52  ;;  %v7854_v40 = vsub.f32 %v7411_v49, %v7634_v52  ;;  %v7861_v45 = vsub.f32 %v7418_v54, %v7634_v52 }
  0xaa   :  { %v371_v4 = vadd.f32 %v370_v46, %v369_v37  ;;  %v306_v46 = vmul.f32 %v7721_v32, %v7721_v32  ;;  %v380_v60 = vsel %vm94_vm1, %v305_v0, 0.0  ;;  %v7868_v49 = vsub.f32 %v7425_v58, %v7634_v52 }
  0xab   :  { %9637 = vst [vmem:[#allocation37_spill] sm:$0xff] %v7847_v36  ;;  %v7875_v54 = vsub.f32 %v7432_v63, %v7634_v52  ;;  %v7882_v58 = vsub.f32 %v7439_v8, %v7634_v52  ;;  %v7889_v63 = vsub.f32 %v7446_v15, %v7634_v52  ;;  %v7896_v8 = vsub.f32 %v7453_v21, %v7634_v52 }
  0xac   :  { %v373_v57 = vadd.f32 %v372_v1, %v371_v4  ;;  %v307_v1 = vmul.f32 %v7728_v35, %v7728_v35  ;;  %v382_v7 = vsel %vm94_vm1, %v306_v46, 0.0  ;;  %v7971_v15 = vsub.f32 %v7460_v28, %v7634_v52 }
  0xad   :  { %v330_v21 = vmul.f32 %v7889_v63, %v7889_v63  ;;  %v7985_v28 = vsub.f32 %v7474_v42, %v7634_v52  ;;  %v7999_v42 = vsub.f32 %v7488_v55, %v7634_v52  ;;  %v8013_v55 = vsub.f32 %v7502_v11, %v7634_v52 }
  0xae   :  { %v375_v12 = vadd.f32 %v374_v43, %v373_v57  ;;  %v308_v43 = vmul.f32 %v7735_v38, %v7735_v38  ;;  %v384_v0 = vsel %vm94_vm1, %v307_v1, 0.0  ;;  %9639 = vst [vmem:[#allocation38_spill] sm:$0xff] %v7971_v15  ;;  %v8027_v11 = vsub.f32 %v7516_v30, %v7634_v52 }
  0xb0   :  { %v377_v37 = vadd.f32 %v376_v24, %v375_v12  ;;  %v309_v24 = vmul.f32 %v7742_v41, %v7742_v41  ;;  %v386_v46 = vsel %vm94_vm1, %v308_v43, 0.0  ;;  %9640 = vst [vmem:[#allocation39_spill] sm:$0xff] %v8027_v11 }
  0xb2   :  { %v379_v4 = vadd.f32 %v378_v16, %v377_v37  ;;  %v310_v16 = vmul.f32 %v7749_v44, %v7749_v44  ;;  %v388_v1 = vsel %vm94_vm1, %v309_v24, 0.0 }
  0xb4   :  { %v381_v57 = vadd.f32 %v380_v60, %v379_v4  ;;  %v311_v60 = vmul.f32 %v7756_v47, %v7756_v47  ;;  %v390_v43 = vsel %vm94_vm1, %v310_v16, 0.0 }
  0xb6   :  { %v383_v12 = vadd.f32 %v382_v7, %v381_v57  ;;  %v312_v7 = vmul.f32 %v7763_v50, %v7763_v50  ;;  %v392_v24 = vsel %vm94_vm1, %v311_v60, 0.0 }
  0xb8   :  { %v385_v37 = vadd.f32 %v384_v0, %v383_v12  ;;  %v313_v0 = vmul.f32 %v7770_v53, %v7770_v53  ;;  %v394_v16 = vsel %vm94_vm1, %v312_v7, 0.0 }
  0xba   :  { %v387_v4 = vadd.f32 %v386_v46, %v385_v37  ;;  %v314_v46 = vmul.f32 %v7777_v56, %v7777_v56  ;;  %v396_v60 = vsel %vm94_vm1, %v313_v0, 0.0 }
  0xbc   :  { %v389_v57 = vadd.f32 %v388_v1, %v387_v4  ;;  %v315_v1 = vmul.f32 %v7784_v59, %v7784_v59  ;;  %v398_v7 = vsel %vm94_vm1, %v314_v46, 0.0 }
  0xbe   :  { %v391_v12 = vadd.f32 %v390_v43, %v389_v57  ;;  %v316_v43 = vmul.f32 %v7791_v62, %v7791_v62  ;;  %v400_v0 = vsel %vm94_vm1, %v315_v1, 0.0 }
  0xc0   :  { %v393_v37 = vadd.f32 %v392_v24, %v391_v12  ;;  %v317_v24 = vmul.f32 %v7798_v3, %v7798_v3  ;;  %v402_v46 = vsel %vm94_vm1, %v316_v43, 0.0 }
  0xc2   :  { %v395_v4 = vadd.f32 %v394_v16, %v393_v37  ;;  %v318_v16 = vmul.f32 %v7805_v9, %v7805_v9  ;;  %v404_v1 = vsel %vm94_vm1, %v317_v24, 0.0 }
  0xc4   :  { %v397_v57 = vadd.f32 %v396_v60, %v395_v4  ;;  %v319_v60 = vmul.f32 %v7812_v14, %v7812_v14  ;;  %v406_v43 = vsel %vm94_vm1, %v318_v16, 0.0 }
  0xc6   :  { %v399_v12 = vadd.f32 %v398_v7, %v397_v57  ;;  %v320_v7 = vmul.f32 %v7819_v18, %v7819_v18  ;;  %v408_v24 = vsel %vm94_vm1, %v319_v60, 0.0 }
  0xc8   :  { %v401_v37 = vadd.f32 %v400_v0, %v399_v12  ;;  %v321_v0 = vmul.f32 %v7826_v22, %v7826_v22  ;;  %v410_v16 = vsel %vm94_vm1, %v320_v7, 0.0 }
  0xca   :  { %v403_v4 = vadd.f32 %v402_v46, %v401_v37  ;;  %v322_v46 = vmul.f32 %v7833_v27, %v7833_v27  ;;  %v412_v60 = vsel %vm94_vm1, %v321_v0, 0.0 }
  0xcc   :  { %v405_v57 = vadd.f32 %v404_v1, %v403_v4  ;;  %v323_v1 = vmul.f32 %v7840_v31, %v7840_v31  ;;  %v414_v7 = vsel %vm94_vm1, %v322_v46, 0.0 }
  0xce   :  { %v407_v12 = vadd.f32 %v406_v43, %v405_v57  ;;  %v324_v43 = vmul.f32 %v7847_v36, %v7847_v36  ;;  %v416_v0 = vsel %vm94_vm1, %v323_v1, 0.0 }
  0xd0   :  { %v409_v37 = vadd.f32 %v408_v24, %v407_v12  ;;  %v325_v24 = vmul.f32 %v7854_v40, %v7854_v40  ;;  %v418_v46 = vsel %vm94_vm1, %v324_v43, 0.0 }
  0xd2   :  { %v411_v4 = vadd.f32 %v410_v16, %v409_v37  ;;  %v326_v16 = vmul.f32 %v7861_v45, %v7861_v45  ;;  %v420_v1 = vsel %vm94_vm1, %v325_v24, 0.0 }
  0xd4   :  { %v413_v57 = vadd.f32 %v412_v60, %v411_v4  ;;  %v327_v60 = vmul.f32 %v7868_v49, %v7868_v49  ;;  %v422_v43 = vsel %vm94_vm1, %v326_v16, 0.0 }
  0xd6   :  { %v415_v12 = vadd.f32 %v414_v7, %v413_v57  ;;  %v328_v7 = vmul.f32 %v7875_v54, %v7875_v54  ;;  %v424_v24 = vsel %vm94_vm1, %v327_v60, 0.0  ;;  %v7978_v60 = vsub.f32 %v7467_v34, %v7634_v52 }
  0xd7   :  { %v7992_v34 = vsub.f32 %v7481_v48, %v7634_v52  ;;  %v8006_v48 = vsub.f32 %v7495_v61, %v7634_v52  ;;  %v8020_v61 = vsub.f32 %v7509_v19, %v7634_v52  ;;  %v8034_v19 = vsub.f32 %v7523_v39, %v7634_v52 }
  0xd8   :  { %v417_v37 = vadd.f32 %v416_v0, %v415_v12  ;;  %v329_v0 = vmul.f32 %v7882_v58, %v7882_v58  ;;  %v426_v16 = vsel %vm94_vm1, %v328_v7, 0.0  ;;  %v430_v7 = vsel %vm94_vm1, %v330_v21, 0.0 }
  0xda   :  { %v419_v4 = vadd.f32 %v418_v46, %v417_v37  ;;  %v9638_v46 = vmov 0.0  }
  0xdb   :  { %767 = vst.msk [vmem:[#allocation2 + $0x18] sm:$0x1] %vm764_vm2, %v9638_v46  ;;  %765 = vst.msk [vmem:[#allocation2 + $0x8] sm:$0x1] %vm764_vm2, %v9638_v46 }
  0xdc   :  { %v421_v57 = vadd.f32 %v420_v1, %v419_v4  ;;  %769 = vst.msk [vmem:[#allocation2 + $0x28] sm:$0x1] %vm764_vm2, %v9638_v46  ;;  %771 = vst.msk [vmem:[#allocation2 + $0x38] sm:$0x1] %vm764_vm2, %v9638_v46  ;;  %v331_v1 = vmul.f32 %v7896_v8, %v7896_v8  ;;  %v428_v4 = vsel %vm94_vm1, %v329_v0, 0.0 }
  0xdd   :  { %773 = vst.msk [vmem:[#allocation2 + $0x48] sm:$0x1] %vm764_vm2, %v9638_v46  ;;  %775 = vst.msk [vmem:[#allocation2 + $0x58] sm:$0x1] %vm764_vm2, %v9638_v46 }
  0xde   :  { %v423_v12 = vadd.f32 %v422_v43, %v421_v57  ;;  %777 = vst.msk [vmem:[#allocation2 + $0x68] sm:$0x1] %vm764_vm2, %v9638_v46  ;;  %779 = vst.msk [vmem:[#allocation2 + $0x78] sm:$0x1] %vm764_vm2, %v9638_v46  ;;  %v332_v57 = vmul.f32 %v7971_v15, %v7971_v15  ;;  %v432_v0 = vsel %vm94_vm1, %v331_v1, 0.0  ;;  %v341_v15 = vmul.f32 %v8034_v19, %v8034_v19 }
  0xdf   :  { %781 = vst.msk [vmem:[#allocation2 + $0x88] sm:$0x1] %vm764_vm2, %v9638_v46  ;;  %783 = vst.msk [vmem:[#allocation2 + $0x98] sm:$0x1] %vm764_vm2, %v9638_v46 }
  0xe0   :  { %785 = vst.msk [vmem:[#allocation2 + $0xa8] sm:$0x1] %vm764_vm2, %v9638_v46  ;;  %787 = vst.msk [vmem:[#allocation2 + $0xb8] sm:$0x1] %vm764_vm2, %v9638_v46  ;;  %v425_v37 = vadd.f32 %v424_v24, %v423_v12  ;;  %v333_v12 = vmul.f32 %v7978_v60, %v7978_v60  ;;  %v434_v21 = vsel %vm94_vm1, %v332_v57, 0.0 }
  0xe1   :  { %789 = vst.msk [vmem:[#allocation2 + $0xc8] sm:$0x1] %vm764_vm2, %v9638_v46  ;;  %791 = vst.msk [vmem:[#allocation2 + $0xd8] sm:$0x1] %vm764_vm2, %v9638_v46 }
  0xe2   :  { %793 = vst.msk [vmem:[#allocation2 + $0xe8] sm:$0x1] %vm764_vm2, %v9638_v46  ;;  %795 = vst.msk [vmem:[#allocation2 + $0xf8] sm:$0x1] %vm764_vm2, %v9638_v46  ;;  %v427_v43 = vadd.f32 %v426_v16, %v425_v37  ;;  %v334_v37 = vmul.f32 %v7985_v28, %v7985_v28  ;;  %v436_v1 = vsel %vm94_vm1, %v333_v12, 0.0 }
  0xe3   :  { %797 = vst.msk [vmem:[#allocation2 + $0x108] sm:$0x1] %vm764_vm2, %v9638_v46  ;;  %799 = vst.msk [vmem:[#allocation2 + $0x118] sm:$0x1] %vm764_vm2, %v9638_v46 }
  0xe4   :  { %837 = vst.msk [vmem:[#allocation2 + $0x248] sm:$0x1] %vm764_vm2, %v9638_v46  ;;  %839 = vst.msk [vmem:[#allocation2 + $0x258] sm:$0x1] %vm764_vm2, %v9638_v46  ;;  %v429_v24 = vadd.f32 %v428_v4, %v427_v43  ;;  %v335_v43 = vmul.f32 %v7992_v34, %v7992_v34  ;;  %v438_v57 = vsel %vm94_vm1, %v334_v37, 0.0 }
  0xe5   :  { %841 = vst.msk [vmem:[#allocation2 + $0x268] sm:$0x1] %vm764_vm2, %v9638_v46  ;;  %843 = vst.msk [vmem:[#allocation2 + $0x278] sm:$0x1] %vm764_vm2, %v9638_v46 }
  0xe6   :  { %845 = vst.msk [vmem:[#allocation2 + $0x288] sm:$0x1] %vm764_vm2, %v9638_v46  ;;  %847 = vst.msk [vmem:[#allocation2 + $0x298] sm:$0x1] %vm764_vm2, %v9638_v46  ;;  %v431_v16 = vadd.f32 %v430_v7, %v429_v24  ;;  %v336_v24 = vmul.f32 %v7999_v42, %v7999_v42  ;;  %v440_v12 = vsel %vm94_vm1, %v335_v43, 0.0 }
  0xe7   :  { %849 = vst.msk [vmem:[#allocation2 + $0x2a8] sm:$0x1] %vm764_vm2, %v9638_v46  ;;  %851 = vst.msk [vmem:[#allocation2 + $0x2b8] sm:$0x1] %vm764_vm2, %v9638_v46 }
  0xe8   :  { %855 = vst.msk [vmem:[#allocation2 + $0x2d8] sm:$0x1] %vm764_vm2, %v9638_v46  ;;  %857 = vst.msk [vmem:[#allocation2 + $0x2e8] sm:$0x1] %vm764_vm2, %v9638_v46  ;;  %v433_v4 = vadd.f32 %v432_v0, %v431_v16  ;;  %v337_v16 = vmul.f32 %v8006_v48, %v8006_v48  ;;  %v442_v37 = vsel %vm94_vm1, %v336_v24, 0.0 }
  0xe9   :  { %859 = vst.msk [vmem:[#allocation2 + $0x2f8] sm:$0x1] %vm764_vm2, %v9638_v46  ;;  %861 = vst.msk [vmem:[#allocation2 + $0x308] sm:$0x1] %vm764_vm2, %v9638_v46 }
  0xea   :  { %863 = vst.msk [vmem:[#allocation2 + $0x318] sm:$0x1] %vm764_vm2, %v9638_v46  ;;  %865 = vst.msk [vmem:[#allocation2 + $0x328] sm:$0x1] %vm764_vm2, %v9638_v46  ;;  %v435_v7 = vadd.f32 %v434_v21, %v433_v4  ;;  %v338_v4 = vmul.f32 %v8013_v55, %v8013_v55  ;;  %v444_v43 = vsel %vm94_vm1, %v337_v16, 0.0 }
  0xeb   :  { %867 = vst.msk [vmem:[#allocation2 + $0x338] sm:$0x1] %vm764_vm2, %v9638_v46  ;;  %869 = vst.msk [vmem:[#allocation2 + $0x348] sm:$0x1] %vm764_vm2, %v9638_v46  ;;  %v340_v46 = vmul.f32 %v8027_v11, %v8027_v11 }
  0xec   :  { %v437_v0 = vadd.f32 %v436_v1, %v435_v7  ;;  %v339_v7 = vmul.f32 %v8020_v61, %v8020_v61  ;;  %v446_v24 = vsel %vm94_vm1, %v338_v4, 0.0 }
  0xed   :  { %v450_v4 = vsel %vm94_vm1, %v340_v46, 0.0 }
  0xee   :  { %v439_v21 = vadd.f32 %v438_v57, %v437_v0  ;;  %v9641_v0 = vld [vmem:[#allocation7_spill] sm:$0xff]  ;;  %v448_v16 = vsel %vm94_vm1, %v339_v7, 0.0  ;;  %v452_v7 = vsel %vm94_vm1, %v341_v15, 0.0 }
  0xef   :  { %v8041_v30 = vsub.f32 %v9641_v0, %v7634_v52 }
  0xf0   :  { %v441_v1 = vadd.f32 %v440_v12, %v439_v21  ;;  %v9642_v21 = vld [vmem:[#allocation8_spill] sm:$0xff] }
  0xf1   :  { %v8048_v39 = vsub.f32 %v9642_v21, %v7634_v52  ;;  %v342_v11 = vmul.f32 %v8041_v30, %v8041_v30 }
  0xf2   :  { %v443_v57 = vadd.f32 %v442_v37, %v441_v1  ;;  %v9643_v1 = vld [vmem:[#allocation9_spill] sm:$0xff] }
  0xf3   :  { %v8055_v0 = vsub.f32 %v9643_v1, %v7634_v52  ;;  %v343_v38 = vmul.f32 %v8048_v39, %v8048_v39  ;;  %v454_v46 = vsel %vm94_vm1, %v342_v11, 0.0 }
  0xf4   :  { %v445_v12 = vadd.f32 %v444_v43, %v443_v57  ;;  %v9644_v57 = vld [vmem:[#allocation10_spill] sm:$0xff] }
  0xf5   :  { %v8062_v21 = vsub.f32 %v9644_v57, %v7634_v52  ;;  %v344_v35 = vmul.f32 %v8055_v0, %v8055_v0  ;;  %v456_v15 = vsel %vm94_vm1, %v343_v38, 0.0 }
  0xf6   :  { %v447_v37 = vadd.f32 %v446_v24, %v445_v12  ;;  %v9645_v12 = vld [vmem:[#allocation11_spill] sm:$0xff] }
  0xf7   :  { %v8069_v1 = vsub.f32 %v9645_v12, %v7634_v52  ;;  %v345_v32 = vmul.f32 %v8062_v21, %v8062_v21  ;;  %v458_v11 = vsel %vm94_vm1, %v344_v35, 0.0 }
  0xf8   :  { %v449_v43 = vadd.f32 %v448_v16, %v447_v37  ;;  %v9646_v37 = vld [vmem:[#allocation12_spill] sm:$0xff] }
  0xf9   :  { %v8076_v57 = vsub.f32 %v9646_v37, %v7634_v52  ;;  %v346_v29 = vmul.f32 %v8069_v1, %v8069_v1  ;;  %v460_v38 = vsel %vm94_vm1, %v345_v32, 0.0 }
  0xfa   :  { %v451_v24 = vadd.f32 %v450_v4, %v449_v43  ;;  %v9647_v43 = vld [vmem:[#allocation13_spill] sm:$0xff] }
  0xfb   :  { %v8083_v12 = vsub.f32 %v9647_v43, %v7634_v52  ;;  %v347_v26 = vmul.f32 %v8076_v57, %v8076_v57  ;;  %v462_v35 = vsel %vm94_vm1, %v346_v29, 0.0 }
  0xfc   :  { %v453_v16 = vadd.f32 %v452_v7, %v451_v24  ;;  %v9649_v24 = vld [vmem:[#allocation14_spill] sm:$0xff] }
  0xfd   :  { %9648 = vst [vmem:[#allocation7_spill] sm:$0xff] %v8083_v12  ;;  %v8090_v37 = vsub.f32 %v9649_v24, %v7634_v52  ;;  %v348_v23 = vmul.f32 %v8083_v12, %v8083_v12  ;;  %v464_v32 = vsel %vm94_vm1, %v347_v26, 0.0 }
  0xfe   :  { %v455_v4 = vadd.f32 %v454_v46, %v453_v16  ;;  %v9650_v16 = vld [vmem:[#allocation15_spill] sm:$0xff] }
  0xff   :  { %v8097_v43 = vsub.f32 %v9650_v16, %v7634_v52  ;;  %v349_v20 = vmul.f32 %v8090_v37, %v8090_v37  ;;  %v466_v29 = vsel %vm94_vm1, %v348_v23, 0.0 }
 0x100   :  { %v457_v7 = vadd.f32 %v456_v15, %v455_v4  ;;  %v9651_v4 = vld [vmem:[#allocation16_spill] sm:$0xff] }
 0x101   :  { %v8104_v24 = vsub.f32 %v9651_v4, %v7634_v52  ;;  %v350_v12 = vmul.f32 %v8097_v43, %v8097_v43  ;;  %v468_v26 = vsel %vm94_vm1, %v349_v20, 0.0 }
 0x102   :  { %v459_v46 = vadd.f32 %v458_v11, %v457_v7  ;;  %v9652_v7 = vld [vmem:[#allocation17_spill] sm:$0xff] }
 0x103   :  { %v8111_v16 = vsub.f32 %v9652_v7, %v7634_v52  ;;  %v351_v51 = vmul.f32 %v8104_v24, %v8104_v24  ;;  %v470_v23 = vsel %vm94_vm1, %v350_v12, 0.0 }
 0x104   :  { %v461_v15 = vadd.f32 %v460_v38, %v459_v46  ;;  %v9653_v46 = vld [vmem:[#allocation18_spill] sm:$0xff] }
 0x105   :  { %v8118_v4 = vsub.f32 %v9653_v46, %v7634_v52  ;;  %v352_v13 = vmul.f32 %v8111_v16, %v8111_v16  ;;  %v472_v20 = vsel %vm94_vm1, %v351_v51, 0.0 }
 0x106   :  { %v463_v11 = vadd.f32 %v462_v35, %v461_v15  ;;  %v9654_v15 = vld [vmem:[#allocation19_spill] sm:$0xff] }
 0x107   :  { %v8125_v7 = vsub.f32 %v9654_v15, %v7634_v52  ;;  %v353_v10 = vmul.f32 %v8118_v4, %v8118_v4  ;;  %v474_v12 = vsel %vm94_vm1, %v352_v13, 0.0 }
 0x108   :  { %v465_v38 = vadd.f32 %v464_v32, %v463_v11  ;;  %v9655_v11 = vld [vmem:[#allocation20_spill] sm:$0xff] }
 0x109   :  { %v8132_v46 = vsub.f32 %v9655_v11, %v7634_v52  ;;  %v354_v15 = vmul.f32 %v8125_v7, %v8125_v7  ;;  %v476_v11 = vsel %vm94_vm1, %v353_v10, 0.0 }
 0x10a   :  { %v467_v35 = vadd.f32 %v466_v29, %v465_v38  ;;  %v8139_v38 = vsub.f32 %v7630_v25, %v7634_v52 }
 0x10c   :  { %v469_v32 = vadd.f32 %v468_v26, %v467_v35  ;;  %9656 = vst [vmem:[#allocation8_spill] sm:$0xff] %v8139_v38  ;;  %v355_v35 = vmul.f32 %v8132_v46, %v8132_v46  ;;  %v356_v51 = vmul.f32 %v8139_v38, %v8139_v38 }
 0x10e   :  { %v471_v29 = vadd.f32 %v470_v23, %v469_v32  ;;  %v478_v23 = vsel %vm94_vm1, %v354_v15, 0.0  ;;  %v480_v25 = vsel %vm94_vm1, %v355_v35, 0.0  ;;  %v482_v33 = vsel %vm94_vm1, %v356_v51, 0.0 }
 0x110   :  { %v473_v26 = vadd.f32 %v472_v20, %v471_v29 }
 0x112   :  { %v475_v5 = vadd.f32 %v474_v12, %v473_v26 }
 0x114   :  { %v477_v32 = vadd.f32 %v476_v11, %v475_v5  ;;  %v8157_v5 = vld [vmem:[%s9549_s1] ss:$0 sm:$0xff] }
 0x116   :  { %v479_v52 = vadd.f32 %v478_v23, %v477_v32 }
 0x118   :  { %v481_v6 = vadd.f32 %v480_v25, %v479_v52 }
 0x11a   :  { %v483_v13 = vadd.f32 %v482_v33, %v481_v6  ;;  %v8170_v33 = vld [vmem:[%s9550_s2] ss:$0 sm:$0xff] }
 0x11c   :  { %v484_v20 = vrot.slane %v483_v13, 4 }
 0x11e   :  { %v485_v29 = vadd.f32 %v484_v20, %v483_v13 }
 0x120   :  { %v486_v2 = vrot.slane %v485_v29, 2 }
 0x122   :  { %v487_v17 = vadd.f32 %v486_v2, %v485_v29 }
 0x124   :  { %v488_v36 = vrot.slane %v487_v17, 1 }
 0x126   :  { %v489_v10 = vadd.f32 %v488_v36, %v487_v17 }
 0x128   :  { %v490_v12 = vmul.f32 0.001953125, %v489_v10 }
 0x12a   :  { %v491_v26 = vadd.f32 1e-05, %v490_v12 }
 0x12c   :  { %6960 = vrsqrt.f32 %v491_v26 }
 0x136   :  { %v8152_v38 = vpop.eup %6960 }
 0x137   :  { %v525_v15 = vmul.f32 %v8152_v38, %v7854_v40  ;;  %v526_v6 = vmul.f32 %v8152_v38, %v7861_v45  ;;  %v527_v2 = vmul.f32 %v8152_v38, %v7868_v49  ;;  %v528_v17 = vmul.f32 %v8152_v38, %v7875_v54 }
 0x138   :  { %v529_v36 = vmul.f32 %v8152_v38, %v7882_v58  ;;  %v530_v40 = vmul.f32 %v8152_v38, %v7889_v63  ;;  %v531_v45 = vmul.f32 %v8152_v38, %v7896_v8  ;;  %v533_v49 = vmul.f32 %v8152_v38, %v7978_v60 }
 0x139   :  { %v596_v35 = vmul.f32 %v8157_v5, %v525_v15  ;;  %v597_v54 = vmul.f32 %v8157_v5, %v526_v6  ;;  %v598_v11 = vmul.f32 %v8157_v5, %v527_v2  ;;  %v599_v51 = vmul.f32 %v8157_v5, %v528_v17 }
 0x13a   :  { %v600_v23 = vmul.f32 %v8157_v5, %v529_v36  ;;  %v601_v58 = vmul.f32 %v8157_v5, %v530_v40  ;;  %v602_v63 = vmul.f32 %v8157_v5, %v531_v45  ;;  %v604_v32 = vmul.f32 %v8157_v5, %v533_v49 }
 0x13b   :  { %v667_v8 = vadd.f32 %v8170_v33, %v596_v35  ;;  %v668_v60 = vadd.f32 %v8170_v33, %v597_v54  ;;  %v669_v25 = vadd.f32 %v8170_v33, %v598_v11  ;;  %v670_v52 = vadd.f32 %v8170_v33, %v599_v51 }
 0x13c   :  { %v671_v13 = vadd.f32 %v8170_v33, %v600_v23  ;;  %v672_v20 = vadd.f32 %v8170_v33, %v601_v58  ;;  %v673_v29 = vadd.f32 %v8170_v33, %v602_v63  ;;  %v675_v10 = vadd.f32 %v8170_v33, %v604_v32 }
 0x13d   :  { %v731_v12 = vmax.f32 %v667_v8, 0.0  ;;  %v732_v26 = vmax.f32 %v668_v60, 0.0  ;;  %v733_v15 = vmax.f32 %v669_v25, 0.0  ;;  %v734_v6 = vmax.f32 %v670_v52, 0.0 }
 0x13e   :  { %v735_v2 = vmax.f32 %v671_v13, 0.0  ;;  %v736_v17 = vmax.f32 %v672_v20, 0.0  ;;  %v737_v36 = vmax.f32 %v673_v29, 0.0  ;;  %v739_v40 = vmax.f32 %v675_v10, 0.0 }
 0x13f   :  { %943 = vst.msk [vmem:[#allocation2 + $0x130] sm:$0xff] %vm94_vm1, %v731_v12  ;;  %944 = vst.msk [vmem:[#allocation2 + $0x140] sm:$0xff] %vm94_vm1, %v732_v26  ;;  %v534_v45 = vmul.f32 %v8152_v38, %v7985_v28  ;;  %v535_v49 = vmul.f32 %v8152_v38, %v7992_v34  ;;  %v536_v35 = vmul.f32 %v8152_v38, %v7999_v42 }
 0x140   :  { %945 = vst.msk [vmem:[#allocation2 + $0x150] sm:$0xff] %vm94_vm1, %v733_v15  ;;  %946 = vst.msk [vmem:[#allocation2 + $0x160] sm:$0xff] %vm94_vm1, %v734_v6  ;;  %v537_v54 = vmul.f32 %v8152_v38, %v8006_v48  ;;  %v538_v28 = vmul.f32 %v8152_v38, %v8013_v55  ;;  %v539_v34 = vmul.f32 %v8152_v38, %v8020_v61  ;;  %v8239_v15 = vld [vmem:[%s9551_s3 + $0x8] sm:$0xf] }
 0x141   :  { %947 = vst.msk [vmem:[#allocation2 + $0x170] sm:$0xff] %vm94_vm1, %v735_v2  ;;  %948 = vst.msk [vmem:[#allocation2 + $0x180] sm:$0xff] %vm94_vm1, %v736_v17  ;;  %v541_v42 = vmul.f32 %v8152_v38, %v8034_v19  ;;  %v542_v48 = vmul.f32 %v8152_v38, %v8041_v30  ;;  %v605_v11 = vmul.f32 %v8157_v5, %v534_v45 }
 0x142   :  { %949 = vst.msk [vmem:[#allocation2 + $0x190] sm:$0xff] %vm94_vm1, %v737_v36  ;;  %951 = vst.msk [vmem:[#allocation2 + $0x1c0] sm:$0xff] %vm94_vm1, %v739_v40  ;;  %v606_v51 = vmul.f32 %v8157_v5, %v535_v49  ;;  %v607_v23 = vmul.f32 %v8157_v5, %v536_v35  ;;  %v608_v58 = vmul.f32 %v8157_v5, %v537_v54 }
 0x143   :  { %v609_v63 = vmul.f32 %v8157_v5, %v538_v28  ;;  %v610_v55 = vmul.f32 %v8157_v5, %v539_v34  ;;  %v612_v61 = vmul.f32 %v8157_v5, %v541_v42  ;;  %v613_v32 = vmul.f32 %v8157_v5, %v542_v48  ;;  %v6964_v28 = vld [vmem:[%s9551_s3] sm:$0xf] }
 0x144   :  { %v676_v19 = vadd.f32 %v8170_v33, %v605_v11  ;;  %v677_v30 = vadd.f32 %v8170_v33, %v606_v51  ;;  %v678_v8 = vadd.f32 %v8170_v33, %v607_v23  ;;  %v679_v60 = vadd.f32 %v8170_v33, %v608_v58 }
 0x145   :  { %v680_v25 = vadd.f32 %v8170_v33, %v609_v63  ;;  %v681_v52 = vadd.f32 %v8170_v33, %v610_v55  ;;  %v683_v13 = vadd.f32 %v8170_v33, %v612_v61  ;;  %v684_v20 = vadd.f32 %v8170_v33, %v613_v32 }
 0x146   :  { %v740_v29 = vmax.f32 %v676_v19, 0.0  ;;  %v741_v10 = vmax.f32 %v677_v30, 0.0  ;;  %v742_v12 = vmax.f32 %v678_v8, 0.0  ;;  %v743_v26 = vmax.f32 %v679_v60, 0.0  ;;  %v995_v6 = vld [vmem:[#allocation2 + $0x130] sm:$0xff]  ;;  %v996_v2 = vld [vmem:[#allocation2 + $0x140] sm:$0xff] }
 0x147   :  { %v744_v17 = vmax.f32 %v680_v25, 0.0  ;;  %v745_v36 = vmax.f32 %v681_v52, 0.0  ;;  %v747_v40 = vmax.f32 %v683_v13, 0.0  ;;  %v543_v45 = vmul.f32 %v8152_v38, %v8048_v39  ;;  %6193 = vmatmul.mubr.msk.f32.vlgmr.msra.gmra.mrb[0].mxu0 %vm94_vm1, %v995_v6  ;;  %v997_v34 = vld [vmem:[#allocation2 + $0x150] sm:$0xff]  ;;  %v998_v42 = vld [vmem:[#allocation2 + $0x160] sm:$0xff] }
 0x148   :  { %952 = vst.msk [vmem:[#allocation2 + $0x1d0] sm:$0xff] %vm94_vm1, %v740_v29  ;;  %953 = vst.msk [vmem:[#allocation2 + $0x1e0] sm:$0xff] %vm94_vm1, %v741_v10  ;;  %v748_v49 = vmax.f32 %v684_v20, 0.0  ;;  %v544_v35 = vmul.f32 %v8152_v38, %v8055_v0  ;;  %v545_v54 = vmul.f32 %v8152_v38, %v8062_v21  ;;  %v546_v39 = vmul.f32 %v8152_v38, %v8069_v1  ;;  %v1000_v25 = vld [vmem:[#allocation2 + $0x180] sm:$0xff] }
 0x149   :  { %954 = vst.msk [vmem:[#allocation2 + $0x1f0] sm:$0xff] %vm94_vm1, %v742_v12  ;;  %955 = vst.msk [vmem:[#allocation2 + $0x200] sm:$0xff] %vm94_vm1, %v743_v26  ;;  %6217 = vmatpush3.msk.msra.mxu0 %vm1060_vm0, %v6964_v28  ;;  %6195 = vmatprep.mubr.msk.f32.mxu0 %vm94_vm1, %v996_v2  ;;  %v614_v0 = vmul.f32 %v8157_v5, %v543_v45  ;;  %v547_v21 = vmul.f32 %v8152_v38, %v8076_v57 }
 0x14a   :  { %956 = vst.msk [vmem:[#allocation2 + $0x210] sm:$0xff] %vm94_vm1, %v744_v17  ;;  %957 = vst.msk [vmem:[#allocation2 + $0x220] sm:$0xff] %vm94_vm1, %v745_v36  ;;  %v549_v1 = vmul.f32 %v8152_v38, %v8090_v37  ;;  %6242 = vmatprep.subr.msk.mxu0 %vm1060_vm0, %v8239_v15  ;;  %v615_v48 = vmul.f32 %v8157_v5, %v544_v35  ;;  %v616_v11 = vmul.f32 %v8157_v5, %v545_v54 }
 0x14b   :  { %960 = vst.msk [vmem:[#allocation2 + $0x11] sm:$0xff] %vm94_vm1, %v747_v40  ;;  %961 = vst.msk [vmem:[#allocation2 + $0x21] sm:$0xff] %vm94_vm1, %v748_v49  ;;  %v617_v51 = vmul.f32 %v8157_v5, %v546_v39  ;;  %v550_v23 = vmul.f32 %v8152_v38, %v8097_v43  ;;  %v685_v57 = vadd.f32 %v8170_v33, %v614_v0  ;;  %6196 = vmatmul.mubr.msk.f32.gmra.mrb[2].mxu0 %vm94_vm1, %v997_v34  ;;  %v999_v43 = vld [vmem:[#allocation2 + $0x170] sm:$0xff] }
 0x14c   :  { %v618_v58 = vmul.f32 %v8157_v5, %v547_v21  ;;  %v620_v37 = vmul.f32 %v8157_v5, %v549_v1  ;;  %v551_v63 = vmul.f32 %v8152_v38, %v8104_v24  ;;  %v686_v55 = vadd.f32 %v8170_v33, %v615_v48  ;;  %6198 = vmatprep.mubr.msk.f32.mxu0 %vm94_vm1, %v998_v42  ;;  %v1003_v48 = vld [vmem:[#allocation2 + $0x1c0] sm:$0xff] }
 0x14d   :  { %v687_v61 = vadd.f32 %v8170_v33, %v616_v11  ;;  %v688_v32 = vadd.f32 %v8170_v33, %v617_v51  ;;  %v621_v19 = vmul.f32 %v8157_v5, %v550_v23  ;;  %v749_v30 = vmax.f32 %v685_v57, 0.0 }
 0x14e   :  { %v689_v8 = vadd.f32 %v8170_v33, %v618_v58  ;;  %v691_v60 = vadd.f32 %v8170_v33, %v620_v37  ;;  %v622_v24 = vmul.f32 %v8157_v5, %v551_v63  ;;  %v750_v52 = vmax.f32 %v686_v55, 0.0 }
 0x14f   :  { %v751_v13 = vmax.f32 %v687_v61, 0.0  ;;  %v752_v20 = vmax.f32 %v688_v32, 0.0  ;;  %v692_v29 = vadd.f32 %v8170_v33, %v621_v19  ;;  %962 = vst.msk [vmem:[#allocation2 + $0x31] sm:$0xff] %vm94_vm1, %v749_v30  ;;  %v552_v6 = vmul.f32 %v8152_v38, %v8111_v16  ;;  %6199 = vmatmul.mubr.msk.f32.gmra.mrb[4].mxu0 %vm94_vm1, %v999_v43  ;;  %v1001_v16 = vld [vmem:[#allocation2 + $0x190] sm:$0xff] }
 0x150   :  { %v753_v10 = vmax.f32 %v689_v8, 0.0  ;;  %v755_v12 = vmax.f32 %v691_v60, 0.0  ;;  %v693_v26 = vadd.f32 %v8170_v33, %v622_v24  ;;  %963 = vst.msk [vmem:[#allocation2 + $0x41] sm:$0xff] %vm94_vm1, %v750_v52  ;;  %v553_v17 = vmul.f32 %v8152_v38, %v8118_v4  ;;  %6201 = vmatprep.mubr.msk.f32.mxu0 %vm94_vm1, %v1000_v25  ;;  %v1004_v57 = vld [vmem:[#allocation2 + $0x1d0] sm:$0xff] }
 0x151   :  { %964 = vst.msk [vmem:[#allocation2 + $0x51] sm:$0xff] %vm94_vm1, %v751_v13  ;;  %965 = vst.msk [vmem:[#allocation2 + $0x61] sm:$0xff] %vm94_vm1, %v752_v20  ;;  %v756_v2 = vmax.f32 %v692_v29, 0.0  ;;  %v554_v36 = vmul.f32 %v8152_v38, %v8125_v7  ;;  %v555_v40 = vmul.f32 %v8152_v38, %v8132_v46  ;;  %v623_v49 = vmul.f32 %v8157_v5, %v552_v6  ;;  %v1002_v7 = vld [vmem:[#allocation2 + $0x1b0] sm:$0xff] }
 0x152   :  { %966 = vst.msk [vmem:[#allocation2 + $0x71] sm:$0xff] %vm94_vm1, %v753_v10  ;;  %968 = vst.msk [vmem:[#allocation2 + $0xa1] sm:$0xff] %vm94_vm1, %v755_v12  ;;  %v757_v45 = vmax.f32 %v693_v26, 0.0  ;;  %v509_v35 = vmul.f32 %v8152_v38, %v7742_v41  ;;  %v510_v4 = vmul.f32 %v8152_v38, %v7749_v44  ;;  %v624_v46 = vmul.f32 %v8157_v5, %v553_v17 }
 0x153   :  { %969 = vst.msk [vmem:[#allocation2 + $0xb1] sm:$0xff] %vm94_vm1, %v756_v2  ;;  %v625_v54 = vmul.f32 %v8157_v5, %v554_v36  ;;  %v626_v39 = vmul.f32 %v8157_v5, %v555_v40  ;;  %v511_v28 = vmul.f32 %v8152_v38, %v7756_v47  ;;  %v694_v34 = vadd.f32 %v8170_v33, %v623_v49  ;;  %v1007_v36 = vld [vmem:[#allocation2 + $0x200] sm:$0xff]  ;;  %v1008_v49 = vld [vmem:[#allocation2 + $0x210] sm:$0xff] }
 0x154   :  { %970 = vst.msk [vmem:[#allocation2 + $0xc1] sm:$0xff] %vm94_vm1, %v757_v45  ;;  %v580_v41 = vmul.f32 %v8157_v5, %v509_v35  ;;  %v581_v44 = vmul.f32 %v8157_v5, %v510_v4  ;;  %v512_v0 = vmul.f32 %v8152_v38, %v7763_v50  ;;  %6202 = vmatmul.mubr.msk.f32.gmra.mrb[6].mxu0 %vm94_vm1, %v1001_v16 }
 0x155   :  { %v695_v21 = vadd.f32 %v8170_v33, %v624_v46  ;;  %v696_v1 = vadd.f32 %v8170_v33, %v625_v54  ;;  %v697_v42 = vadd.f32 %v8170_v33, %v626_v39  ;;  %v582_v47 = vmul.f32 %v8157_v5, %v511_v28  ;;  %6204 = vmatprep.mubr.msk.f32.mxu0 %vm94_vm1, %v1002_v7 }
 0x156   :  { %v758_v11 = vmax.f32 %v694_v34, 0.0  ;;  %v651_v51 = vadd.f32 %v8170_v33, %v580_v41  ;;  %v652_v23 = vadd.f32 %v8170_v33, %v581_v44  ;;  %v583_v50 = vmul.f32 %v8157_v5, %v512_v0 }
 0x157   :  { %v759_v58 = vmax.f32 %v695_v21, 0.0  ;;  %v760_v37 = vmax.f32 %v696_v1, 0.0  ;;  %v761_v63 = vmax.f32 %v697_v42, 0.0  ;;  %v653_v55 = vadd.f32 %v8170_v33, %v582_v47  ;;  %v9657_v21 = vld [vmem:[#allocation37_spill] sm:$0xff] }
 0x158   :  { %971 = vst.msk [vmem:[#allocation2 + $0xd1] sm:$0xff] %vm94_vm1, %v758_v11  ;;  %v715_v61 = vmax.f32 %v651_v51, 0.0  ;;  %v716_v32 = vmax.f32 %v652_v23, 0.0  ;;  %v654_v19 = vadd.f32 %v8170_v33, %v583_v50  ;;  %v513_v43 = vmul.f32 %v8152_v38, %v7770_v53  ;;  %6205 = vmatmul.mubr.msk.f32.gmra.mrb[8].mxu0 %vm94_vm1, %v1003_v48  ;;  %v1005_v53 = vld [vmem:[#allocation2 + $0x1e0] sm:$0xff]  ;;  %v9658_v48 = vld [vmem:[#allocation21_spill] sm:$0xff] }
 0x159   :  { %972 = vst.msk [vmem:[#allocation2 + $0xe1] sm:$0xff] %vm94_vm1, %v759_v58  ;;  %973 = vst.msk [vmem:[#allocation2 + $0xf1] sm:$0xff] %vm94_vm1, %v760_v37  ;;  %v717_v30 = vmax.f32 %v653_v55, 0.0  ;;  %v514_v8 = vmul.f32 %v8152_v38, %v7777_v56  ;;  %v515_v60 = vmul.f32 %v8152_v38, %v7784_v59  ;;  %v516_v24 = vmul.f32 %v8152_v38, %v7791_v62  ;;  %v1006_v59 = vld [vmem:[#allocation2 + $0x1f0] sm:$0xff]  ;;  %v9660_v58 = vld [vmem:[#allocation23_spill] sm:$0xff] }
 0x15a   :  { %974 = vst.msk [vmem:[#allocation2 + $0x101] sm:$0xff] %vm94_vm1, %v761_v63  ;;  %6207 = vmatprep.mubr.msk.f32.mxu0 %vm94_vm1, %v1004_v57  ;;  %926 = vst.msk [vmem:[#allocation2 + $0x241] sm:$0xff] %vm94_vm1, %v715_v61  ;;  %v718_v25 = vmax.f32 %v654_v19, 0.0  ;;  %v584_v52 = vmul.f32 %v8157_v5, %v513_v43  ;;  %v517_v13 = vmul.f32 %v8152_v38, %v7798_v3 }
 0x15b   :  { %927 = vst.msk [vmem:[#allocation2 + $0x251] sm:$0xff] %vm94_vm1, %v716_v32  ;;  %v518_v56 = vmul.f32 %v8152_v38, %v7805_v9  ;;  %928 = vst.msk [vmem:[#allocation2 + $0x261] sm:$0xff] %vm94_vm1, %v717_v30  ;;  %v585_v62 = vmul.f32 %v8157_v5, %v514_v8  ;;  %v586_v20 = vmul.f32 %v8157_v5, %v515_v60  ;;  %v9661_v32 = vld [vmem:[#allocation24_spill] sm:$0xff] }
 0x15c   :  { %v587_v29 = vmul.f32 %v8157_v5, %v516_v24  ;;  %v519_v10 = vmul.f32 %v8152_v38, %v7812_v14  ;;  %929 = vst.msk [vmem:[#allocation2 + $0x271] sm:$0xff] %vm94_vm1, %v718_v25  ;;  %v655_v12 = vadd.f32 %v8170_v33, %v584_v52  ;;  %v588_v3 = vmul.f32 %v8157_v5, %v517_v13  ;;  %v8418_v24 = vld [vmem:[#allocation2 + $0x10] sm:$0xff] }
 0x15d   :  { %v589_v9 = vmul.f32 %v8157_v5, %v518_v56  ;;  %v520_v26 = vmul.f32 %v8152_v38, %v7819_v18  ;;  %6208 = vmatmul.mubr.msk.f32.gmra.mrb[10].mxu0 %vm94_vm1, %v1005_v53  ;;  %v656_v6 = vadd.f32 %v8170_v33, %v585_v62  ;;  %v657_v2 = vadd.f32 %v8170_v33, %v586_v20  ;;  %v8427_v56 = vld [vmem:[#allocation2 + $0x20] sm:$0xff] }
 0x15e   :  { %v658_v17 = vadd.f32 %v8170_v33, %v587_v29  ;;  %v590_v14 = vmul.f32 %v8157_v5, %v519_v10  ;;  %6210 = vmatprep.mubr.msk.f32.mxu0 %vm94_vm1, %v1006_v59  ;;  %v719_v40 = vmax.f32 %v655_v12, 0.0  ;;  %v659_v16 = vadd.f32 %v8170_v33, %v588_v3  ;;  %v8435_v10 = vld [vmem:[%s9551_s3 + $0xc] sm:$0xf] }
 0x15f   :  { %v660_v45 = vadd.f32 %v8170_v33, %v589_v9  ;;  %v591_v18 = vmul.f32 %v8157_v5, %v520_v26  ;;  %v720_v35 = vmax.f32 %v656_v6, 0.0  ;;  %v721_v4 = vmax.f32 %v657_v2, 0.0  ;;  %v9662_v26 = vld [vmem:[#allocation25_spill] sm:$0xff] }
 0x160   :  { %v722_v7 = vmax.f32 %v658_v17, 0.0  ;;  %v661_v46 = vadd.f32 %v8170_v33, %v590_v14  ;;  %930 = vst.msk [vmem:[#allocation2 + $0x281] sm:$0xff] %vm94_vm1, %v719_v40  ;;  %v723_v54 = vmax.f32 %v659_v16, 0.0  ;;  %v521_v34 = vmul.f32 %v8152_v38, %v7826_v22  ;;  %v1009_v22 = vld [vmem:[#allocation2 + $0x220] sm:$0xff]  ;;  %v9665_v16 = vld [vmem:[#allocation28_spill] sm:$0xff] }
 0x161   :  { %v724_v39 = vmax.f32 %v660_v45, 0.0  ;;  %v662_v28 = vadd.f32 %v8170_v33, %v591_v18  ;;  %6211 = vmatmul.mubr.msk.f32.gmra.mrb[12].mxu0 %vm94_vm1, %v1007_v36  ;;  %931 = vst.msk [vmem:[#allocation2 + $0x291] sm:$0xff] %vm94_vm1, %v720_v35  ;;  %932 = vst.msk [vmem:[#allocation2 + $0x2a1] sm:$0xff] %vm94_vm1, %v721_v4  ;;  %v522_v44 = vmul.f32 %v8152_v38, %v7833_v27  ;;  %v9659_v27 = vld [vmem:[#allocation22_spill] sm:$0xff]  ;;  %v9664_v36 = vld [vmem:[#allocation27_spill] sm:$0xff] }
 0x162   :  { %933 = vst.msk [vmem:[#allocation2 + $0x2b1] sm:$0xff] %vm94_vm1, %v722_v7  ;;  %v725_v41 = vmax.f32 %v661_v46, 0.0  ;;  %v523_v0 = vmul.f32 %v8152_v38, %v7840_v31  ;;  %v524_v1 = vmul.f32 %v8152_v38, %v9657_v21  ;;  %6213 = vmatprep.mubr.msk.f32.mxu0 %vm94_vm1, %v1008_v49  ;;  %934 = vst.msk [vmem:[#allocation2 + $0x2d1] sm:$0xff] %vm94_vm1, %v723_v54  ;;  %v976_v31 = vld [vmem:[#allocation2] sm:$0xff]  ;;  %v8461_v18 = vld [vmem:[#allocation2 + $0x30] sm:$0xff] }
 0x163   :  { %935 = vst.msk [vmem:[#allocation2 + $0x2e1] sm:$0xff] %vm94_vm1, %v724_v39  ;;  %v726_v42 = vmax.f32 %v662_v28, 0.0  ;;  %v592_v47 = vmul.f32 %v8157_v5, %v521_v34  ;;  %v493_v11 = vmul.f32 %v8152_v38, %v9658_v48  ;;  %v494_v51 = vmul.f32 %v8152_v38, %v9659_v27  ;;  %v9663_v17 = vld [vmem:[#allocation26_spill] sm:$0xff]  ;;  %v9666_v4 = vld [vmem:[#allocation29_spill] sm:$0xff] }
 0x164   :  { %936 = vst.msk [vmem:[#allocation2 + $0x2f1] sm:$0xff] %vm94_vm1, %v725_v41  ;;  %v593_v23 = vmul.f32 %v8157_v5, %v522_v44  ;;  %v594_v50 = vmul.f32 %v8157_v5, %v523_v0  ;;  %v595_v57 = vmul.f32 %v8157_v5, %v524_v1  ;;  %v495_v37 = vmul.f32 %v8152_v38, %v9660_v58  ;;  %v9667_v7 = vld [vmem:[#allocation30_spill] sm:$0xff]  ;;  %v9668_v41 = vld [vmem:[#allocation31_spill] sm:$0xff] }
 0x165   :  { %937 = vst.msk [vmem:[#allocation2 + $0x301] sm:$0xff] %vm94_vm1, %v726_v42  ;;  %v663_v63 = vadd.f32 %v8170_v33, %v592_v47  ;;  %v564_v55 = vmul.f32 %v8157_v5, %v493_v11  ;;  %v565_v61 = vmul.f32 %v8157_v5, %v494_v51  ;;  %v496_v19 = vmul.f32 %v8152_v38, %v9661_v32  ;;  %v8475_v54 = vld [vmem:[#allocation2 + $0x40] sm:$0xff]  ;;  %v8511_v51 = vld [vmem:[#allocation2 + $0x50] sm:$0xff] }
 0x166   :  { %6214 = vmatmul.mubr.msk.f32.gmra.mrb[14].mxu0 %vm94_vm1, %v1009_v22  ;;  %v664_v43 = vadd.f32 %v8170_v33, %v593_v23  ;;  %v665_v30 = vadd.f32 %v8170_v33, %v594_v50  ;;  %v666_v8 = vadd.f32 %v8170_v33, %v595_v57  ;;  %v566_v60 = vmul.f32 %v8157_v5, %v495_v37  ;;  %v9669_v22 = vld [vmem:[#allocation32_spill] sm:$0xff]  ;;  %v8521_v58 = vld [vmem:[#allocation2 + $0x60] sm:$0xff] }
 0x167   :  { %6218 = vmatprep.mubr.msk.f32.mxu0 %vm94_vm1, %v976_v31  ;;  %v727_v53 = vmax.f32 %v663_v63, 0.0  ;;  %v8421_v25 = vadd.f32 %v8170_v33, %v564_v55  ;;  %v8424_v52 = vadd.f32 %v8170_v33, %v565_v61  ;;  %v567_v13 = vmul.f32 %v8157_v5, %v496_v19 }
 0x168   :  { %v728_v59 = vmax.f32 %v664_v43, 0.0  ;;  %v729_v62 = vmax.f32 %v665_v30, 0.0  ;;  %v730_v20 = vmax.f32 %v666_v8, 0.0  ;;  %v8430_v29 = vadd.f32 %v8170_v33, %v566_v60  ;;  %v9670_v30 = vld [vmem:[#allocation33_spill] sm:$0xff] }
 0x169   :  { %938 = vst.msk [vmem:[#allocation2 + $0x311] sm:$0xff] %vm94_vm1, %v727_v53  ;;  %v699_v12 = vmax.f32 %v8421_v25, 0.0  ;;  %v700_v3 = vmax.f32 %v8424_v52, 0.0  ;;  %v8441_v9 = vadd.f32 %v8170_v33, %v567_v13  ;;  %v497_v6 = vmul.f32 %v8152_v38, %v9662_v26  ;;  %v9671_v53 = vld [vmem:[#allocation34_spill] sm:$0xff] }
 0x16a   :  { %6219 = vmatmul.mubr.msk.f32.vlgmr.msra.gmra.mrb[0].mxu0 %vm94_vm1, %v8418_v24  ;;  %939 = vst.msk [vmem:[#allocation2 + $0x321] sm:$0xff] %vm94_vm1, %v728_v59  ;;  %940 = vst.msk [vmem:[#allocation2 + $0x331] sm:$0xff] %vm94_vm1, %v729_v62  ;;  %v701_v2 = vmax.f32 %v8430_v29, 0.0  ;;  %v498_v14 = vmul.f32 %v8152_v38, %v9663_v17  ;;  %v499_v40 = vmul.f32 %v8152_v38, %v9664_v36  ;;  %v9672_v59 = vld [vmem:[#allocation35_spill] sm:$0xff]  ;;  %v984_v36 = vld [vmem:[#allocation2 + $0x90] sm:$0xff] }
 0x16b   :  { %941 = vst.msk [vmem:[#allocation2 + $0x341] sm:$0xff] %vm94_vm1, %v730_v20  ;;  %v500_v45 = vmul.f32 %v8152_v38, %v9665_v16  ;;  %6243 = vmatpush3.msk.msra.mxu0 %vm1060_vm0, %v8239_v15  ;;  %6221 = vmatprep.mubr.msk.f32.mxu0 %vm94_vm1, %v8427_v56  ;;  %909 = vst.msk [vmem:[#allocation2 + $0x360] sm:$0xff] %vm94_vm1, %v699_v12  ;;  %v702_v49 = vmax.f32 %v8441_v9, 0.0  ;;  %v568_v35 = vmul.f32 %v8157_v5, %v497_v6  ;;  %v9673_v20 = vld [vmem:[#allocation36_spill] sm:$0xff] }
 0x16c   :  { %910 = vst.msk [vmem:[#allocation2 + $0x370] sm:$0xff] %vm94_vm1, %v700_v3  ;;  %v501_v15 = vmul.f32 %v8152_v38, %v9666_v4  ;;  %v502_v46 = vmul.f32 %v8152_v38, %v9667_v7  ;;  %6268 = vmatprep.subr.msk.mxu0 %vm1060_vm0, %v8435_v10  ;;  %911 = vst.msk [vmem:[#allocation2 + $0x380] sm:$0xff] %vm94_vm1, %v701_v2  ;;  %v569_v39 = vmul.f32 %v8157_v5, %v498_v14  ;;  %v8559_v6 = vld [vmem:[#allocation2 + $0x70] sm:$0xff] }
 0x16d   :  { %v570_v28 = vmul.f32 %v8157_v5, %v499_v40  ;;  %v571_v34 = vmul.f32 %v8157_v5, %v500_v45  ;;  %v503_v44 = vmul.f32 %v8152_v38, %v9668_v41  ;;  %912 = vst.msk [vmem:[#allocation2 + $0x390] sm:$0xff] %vm94_vm1, %v702_v49  ;;  %v8491_v0 = vadd.f32 %v8170_v33, %v568_v35 }
 0x16e   :  { %v572_v21 = vmul.f32 %v8157_v5, %v501_v15  ;;  %v573_v1 = vmul.f32 %v8157_v5, %v502_v46  ;;  %v504_v42 = vmul.f32 %v8152_v38, %v9669_v22  ;;  %6222 = vmatmul.mubr.msk.f32.gmra.mrb[2].mxu0 %vm94_vm1, %v8461_v18  ;;  %v8500_v47 = vadd.f32 %v8170_v33, %v569_v39  ;;  %v8593_v46 = vld [vmem:[#allocation2 + $0xa0] sm:$0xff] }
 0x16f   :  { %v8503_v48 = vadd.f32 %v8170_v33, %v570_v28  ;;  %v8506_v11 = vadd.f32 %v8170_v33, %v571_v34  ;;  %v574_v27 = vmul.f32 %v8157_v5, %v503_v44  ;;  %6224 = vmatprep.mubr.msk.f32.mxu0 %vm94_vm1, %v8475_v54  ;;  %v9606_v31 = vmax.f32 %v8491_v0, 0.0  ;;  %v8596_v28 = vld [vmem:[#allocation2 + $0xb0] sm:$0xff]  ;;  %v8625_v22 = vld [vmem:[#allocation2 + $0xe0] sm:$0xff] }
 0x170   :  { %v8515_v23 = vadd.f32 %v8170_v33, %v572_v21  ;;  %v8518_v50 = vadd.f32 %v8170_v33, %v573_v1  ;;  %v575_v57 = vmul.f32 %v8157_v5, %v504_v42  ;;  %v9605_v37 = vmax.f32 %v8500_v47, 0.0  ;;  %v8617_v21 = vld [vmem:[#allocation2 + $0xc0] sm:$0xff]  ;;  %v8619_v1 = vld [vmem:[#allocation2 + $0xd0] sm:$0xff] }
 0x171   :  { %v9604_v63 = vmax.f32 %v8503_v48, 0.0  ;;  %v9603_v55 = vmax.f32 %v8506_v11, 0.0  ;;  %v8527_v61 = vadd.f32 %v8170_v33, %v574_v27  ;;  %913 = vst.msk [vmem:[#allocation2 + $0x3a0] sm:$0xff] %vm94_vm1, %v9606_v31  ;;  %v505_v8 = vmul.f32 %v8152_v38, %v9670_v30  ;;  %v8627_v42 = vld [vmem:[#allocation2 + $0xf0] sm:$0xff]  ;;  %v8633_v27 = vld [vmem:[#allocation2 + $0x100] sm:$0xff]  ;;  %v9674_v30 = vld [vmem:[#allocation7_spill] sm:$0xff] }
 0x172   :  { %v9602_v32 = vmax.f32 %v8515_v23, 0.0  ;;  %v9601_v19 = vmax.f32 %v8518_v50, 0.0  ;;  %v8535_v43 = vadd.f32 %v8170_v33, %v575_v57  ;;  %6225 = vmatmul.mubr.msk.f32.gmra.mrb[4].mxu0 %vm94_vm1, %v8511_v51  ;;  %914 = vst.msk [vmem:[#allocation2 + $0x3b0] sm:$0xff] %vm94_vm1, %v9605_v37  ;;  %v506_v13 = vmul.f32 %v8152_v38, %v9671_v53  ;;  %v1405_v57 = vld [vmem:[#allocation2 + $0x1] sm:$0xff]  ;;  %v8640_v53 = vld [vmem:[#allocation2 + $0x11] sm:$0xff] }
 0x173   :  { %915 = vst.msk [vmem:[#allocation2 + $0x3c0] sm:$0xff] %vm94_vm1, %v9604_v63  ;;  %916 = vst.msk [vmem:[#allocation2 + $0x3d0] sm:$0xff] %vm94_vm1, %v9603_v55  ;;  %v9600_v60 = vmax.f32 %v8527_v61, 0.0  ;;  %v507_v62 = vmul.f32 %v8152_v38, %v9672_v59  ;;  %v508_v26 = vmul.f32 %v8152_v38, %v9673_v20  ;;  %6227 = vmatprep.mubr.msk.f32.mxu0 %vm94_vm1, %v8521_v58  ;;  %v1638_v55 = vld [vmem:[#allocation2 + $0x270] sm:$0xff]  ;;  %v1641_v63 = vld [vmem:[#allocation2 + $0x2a0] sm:$0xff]  ;;  %v9680_v25 = vmax.f32 %v8500_v47, 0.0 }
 0x174   :  { %917 = vst.msk [vmem:[#allocation2 + $0x3f0] sm:$0xff] %vm94_vm1, %v9602_v32  ;;  %918 = vst.msk [vmem:[#allocation2 + $0x400] sm:$0xff] %vm94_vm1, %v9601_v19  ;;  %v9599_v17 = vmax.f32 %v8535_v43, 0.0  ;;  %v576_v14 = vmul.f32 %v8157_v5, %v505_v8  ;;  %v577_v40 = vmul.f32 %v8157_v5, %v506_v13  ;;  %v548_v8 = vmul.f32 %v8152_v38, %v9674_v30  ;;  %v8642_v13 = vld [vmem:[#allocation2 + $0x21] sm:$0xff]  ;;  %v5624_v19 = vld [vmem:[%s9551_s3 + $0x14] sm:$0xf] }
 0x175   :  { %919 = vst.msk [vmem:[#allocation2 + $0x410] sm:$0xff] %vm94_vm1, %v9600_v60  ;;  %v578_v16 = vmul.f32 %v8157_v5, %v507_v62  ;;  %v579_v45 = vmul.f32 %v8157_v5, %v508_v26  ;;  %v5606_v62 = vld [vmem:[%s9551_s3 + $0x10] sm:$0xf]  ;;  %v5782_v31 = vld [vmem:[%s9554_s6 + $0x28] sm:$0xff]  ;;  %v9681_v52 = vmax.f32 %v8503_v48, 0.0  ;;  %v9682_v29 = vmax.f32 %v8506_v11, 0.0 }
 0x176   :  { %920 = vst.msk [vmem:[#allocation2 + $0x420] sm:$0xff] %vm94_vm1, %v9599_v17  ;;  %v8579_v35 = vadd.f32 %v8170_v33, %v576_v14  ;;  %6228 = vmatmul.mubr.msk.f32.gmra.mrb[6].mxu0 %vm94_vm1, %v8559_v6  ;;  %v8584_v4 = vadd.f32 %v8170_v33, %v577_v40  ;;  %v619_v59 = vmul.f32 %v8157_v5, %v548_v8  ;;  %v8655_v26 = vld [vmem:[#allocation2 + $0x31] sm:$0xff]  ;;  %v8657_v14 = vld [vmem:[#allocation2 + $0x41] sm:$0xff]  ;;  %v9685_v9 = vmax.f32 %v8527_v61, 0.0 }
 0x177   :  { %v8587_v15 = vadd.f32 %v8170_v33, %v578_v16  ;;  %v8590_v7 = vadd.f32 %v8170_v33, %v579_v45  ;;  %6230 = vmatprep.mubr.msk.f32.mxu0 %vm94_vm1, %v984_v36  ;;  %v8665_v40 = vld [vmem:[#allocation2 + $0x51] sm:$0xff]  ;;  %v8680_v8 = vld [vmem:[#allocation2 + $0xa1] sm:$0xff] }
 0x178   :  { %v9598_v39 = vmax.f32 %v8579_v35, 0.0  ;;  %v9597_v34 = vmax.f32 %v8584_v4, 0.0  ;;  %v690_v20 = vadd.f32 %v8170_v33, %v619_v59  ;;  %v8673_v16 = vld [vmem:[#allocation2 + $0x71] sm:$0xff]  ;;  %v1637_v17 = vld [vmem:[#allocation2 + $0x260] sm:$0xff] }
 0x179   :  { %v9596_v41 = vmax.f32 %v8587_v15, 0.0  ;;  %v9595_v44 = vmax.f32 %v8590_v7, 0.0  ;;  %v1413_v45 = vld [vmem:[#allocation2 + $0x91] sm:$0xff]  ;;  %v9689_v47 = vmax.f32 %v8587_v15, 0.0  ;;  %v9690_v48 = vmax.f32 %v8590_v7, 0.0 }
 0x17a   :  { %921 = vst.msk [vmem:[#allocation2 + $0x430] sm:$0xff] %vm94_vm1, %v9598_v39  ;;  %6231 = vmatmul.mubr.msk.f32.gmra.mrb[8].mxu0 %vm94_vm1, %v8593_v46  ;;  %922 = vst.msk [vmem:[#allocation2 + $0x440] sm:$0xff] %vm94_vm1, %v9597_v34  ;;  %v754_v36 = vmax.f32 %v690_v20, 0.0  ;;  %v8682_v59 = vld [vmem:[#allocation2 + $0xb1] sm:$0xff] }
 0x17b   :  { %923 = vst.msk [vmem:[#allocation2 + $0x450] sm:$0xff] %vm94_vm1, %v9596_v41  ;;  %924 = vst.msk [vmem:[#allocation2 + $0x460] sm:$0xff] %vm94_vm1, %v9595_v44  ;;  %6233 = vmatprep.mubr.msk.f32.mxu0 %vm94_vm1, %v8596_v28  ;;  %v8690_v44 = vld [vmem:[#allocation2 + $0xc1] sm:$0xff]  ;;  %v8692_v41 = vld [vmem:[#allocation2 + $0xd1] sm:$0xff] }
 0x17c   :  { %967 = vst.msk [vmem:[#allocation2 + $0x81] sm:$0xff] %vm94_vm1, %v754_v36  ;;  %v1636_v39 = vld [vmem:[#allocation2 + $0x250] sm:$0xff] }
 0x17e   :  { %6234 = vmatmul.mubr.msk.f32.gmra.mrb[10].mxu0 %vm94_vm1, %v8617_v21 }
 0x17f   :  { %6236 = vmatprep.mubr.msk.f32.mxu0 %vm94_vm1, %v8619_v1 }
 0x182   :  { %6237 = vmatmul.mubr.msk.f32.gmra.mrb[12].mxu0 %vm94_vm1, %v8625_v22 }
 0x183   :  { %6239 = vmatprep.mubr.msk.f32.mxu0 %vm94_vm1, %v8627_v42 }
 0x186   :  { %6240 = vmatmul.mubr.msk.f32.gmra.mrb[14].mxu0 %vm94_vm1, %v8633_v27 }
 0x187   :  { %6244 = vmatprep.mubr.msk.f32.mxu0 %vm94_vm1, %v1405_v57  ;;  %v9675_v57 = vld [vmem:[#allocation8_spill] sm:$0xff] }
 0x188   :  { %v556_v30 = vmul.f32 %v8152_v38, %v9675_v57 }
 0x18a   :  { %6245 = vmatmul.mubr.msk.f32.vlgmr.msra.gmra.mrb[0].mxu0 %vm94_vm1, %v8640_v53  ;;  %v627_v20 = vmul.f32 %v8157_v5, %v556_v30  ;;  %v8701_v30 = vld [vmem:[#allocation2 + $0xf1] sm:$0xff] }
 0x18b   :  { %6269 = vmatpush3.msk.msra.mxu0 %vm1060_vm0, %v8435_v10  ;;  %6247 = vmatprep.mubr.msk.f32.mxu0 %vm94_vm1, %v8642_v13  ;;  %v8667_v10 = vld [vmem:[#allocation2 + $0x61] sm:$0xff] }
 0x18c   :  { %6294 = vmatprep.subr.msk.mxu0 %vm1060_vm0, %v5606_v62  ;;  %v698_v36 = vadd.f32 %v8170_v33, %v627_v20  ;;  %v8707_v20 = vld [vmem:[#allocation2 + $0x101] sm:$0xff] }
 0x18e   :  { %6248 = vmatmul.mubr.msk.f32.gmra.mrb[2].mxu0 %vm94_vm1, %v8655_v26  ;;  %v762_v57 = vmax.f32 %v698_v36, 0.0  ;;  %v1635_v36 = vld [vmem:[#allocation2 + $0x240] sm:$0xff] }
 0x18f   :  { %6250 = vmatprep.mubr.msk.f32.mxu0 %vm94_vm1, %v8657_v14 }
 0x190   :  { %975 = vst.msk [vmem:[#allocation2 + $0x111] sm:$0xff] %vm94_vm1, %v762_v57  ;;  %v9676_v57 = vld [vmem:[#allocation38_spill] sm:$0xff] }
 0x191   :  { %v532_v34 = vmul.f32 %v8152_v38, %v9676_v57  ;;  %v1639_v57 = vld [vmem:[#allocation2 + $0x280] sm:$0xff] }
 0x192   :  { %6251 = vmatmul.mubr.msk.f32.gmra.mrb[4].mxu0 %vm94_vm1, %v8665_v40 }
 0x193   :  { %6253 = vmatprep.mubr.msk.f32.mxu0 %vm94_vm1, %v8667_v10  ;;  %v603_v60 = vmul.f32 %v8157_v5, %v532_v34  ;;  %v1640_v34 = vld [vmem:[#allocation2 + $0x290] sm:$0xff] }
 0x195   :  { %v674_v32 = vadd.f32 %v8170_v33, %v603_v60  ;;  %v1642_v60 = vld [vmem:[#allocation2 + $0x2b0] sm:$0xff] }
 0x196   :  { %6254 = vmatmul.mubr.msk.f32.gmra.mrb[6].mxu0 %vm94_vm1, %v8673_v16 }
 0x197   :  { %6256 = vmatprep.mubr.msk.f32.mxu0 %vm94_vm1, %v1413_v45  ;;  %v8699_v45 = vld [vmem:[#allocation2 + $0xe1] sm:$0xff] }
 0x19a   :  { %6257 = vmatmul.mubr.msk.f32.gmra.mrb[8].mxu0 %vm94_vm1, %v8680_v8 }
 0x19b   :  { %6259 = vmatprep.mubr.msk.f32.mxu0 %vm94_vm1, %v8682_v59 }
 0x19e   :  { %6260 = vmatmul.mubr.msk.f32.gmra.mrb[10].mxu0 %vm94_vm1, %v8690_v44 }
 0x19f   :  { %6262 = vmatprep.mubr.msk.f32.mxu0 %vm94_vm1, %v8692_v41 }
 0x1a2   :  { %6263 = vmatmul.mubr.msk.f32.gmra.mrb[12].mxu0 %vm94_vm1, %v8699_v45 }
 0x1a3   :  { %6265 = vmatprep.mubr.msk.f32.mxu0 %vm94_vm1, %v8701_v30 }
 0x1a6   :  { %6266 = vmatmul.mubr.msk.f32.gmra.mrb[14].mxu0 %vm94_vm1, %v8707_v20 }
 0x1a7   :  { %6270 = vmatprep.mubr.msk.f32.mxu0 %vm94_vm1, %v1635_v36  ;;  %v738_v36 = vmax.f32 %v674_v32, 0.0  ;;  %v1645_v32 = vld [vmem:[#allocation2 + $0x2f0] sm:$0xff] }
 0x1a9   :  { %950 = vst.msk [vmem:[#allocation2 + $0x1a0] sm:$0xff] %vm94_vm1, %v738_v36 }
 0x1aa   :  { %6271 = vmatmul.mubr.msk.f32.vlgmr.msra.gmra.mrb[0].mxu0 %vm94_vm1, %v1636_v39  ;;  %v1643_v39 = vld [vmem:[#allocation2 + $0x2d0] sm:$0xff] }
 0x1ab   :  { %6295 = vmatpush3.msk.msra.mxu0 %vm1060_vm0, %v5606_v62  ;;  %6273 = vmatprep.mubr.msk.f32.mxu0 %vm94_vm1, %v1637_v17  ;;  %v9677_v17 = vld [vmem:[#allocation39_spill] sm:$0xff] }
 0x1ac   :  { %6320 = vmatprep.subr.msk.mxu0 %vm1060_vm0, %v5624_v19  ;;  %v540_v62 = vmul.f32 %v8152_v38, %v9677_v17  ;;  %v1648_v38 = vld [vmem:[#allocation2 + $0x320] sm:$0xff] }
 0x1ad   :  { %v1867_v17 = vld [vmem:[#allocation2 + $0x380] sm:$0xff] }
 0x1ae   :  { %6274 = vmatmul.mubr.msk.f32.gmra.mrb[2].mxu0 %vm94_vm1, %v1638_v55  ;;  %v1644_v55 = vld [vmem:[#allocation2 + $0x2e0] sm:$0xff]  ;;  %v611_v36 = vmul.f32 %v8157_v5, %v540_v62  ;;  %v1868_v62 = vld [vmem:[#allocation2 + $0x390] sm:$0xff] }
 0x1af   :  { %6276 = vmatprep.mubr.msk.f32.mxu0 %vm94_vm1, %v1639_v57  ;;  %v1650_v5 = vld [vmem:[#allocation2 + $0x340] sm:$0xff] }
 0x1b0   :  { %v682_v57 = vadd.f32 %v8170_v33, %v611_v36  ;;  %v1866_v33 = vld [vmem:[#allocation2 + $0x370] sm:$0xff]  ;;  %v1871_v36 = vld [vmem:[#allocation2 + $0x3c0] sm:$0xff] }
 0x1b2   :  { %6277 = vmatmul.mubr.msk.f32.gmra.mrb[4].mxu0 %vm94_vm1, %v1640_v34  ;;  %v1647_v34 = vld [vmem:[#allocation2 + $0x310] sm:$0xff]  ;;  %v746_v37 = vmax.f32 %v682_v57, 0.0 }
 0x1b3   :  { %6279 = vmatprep.mubr.msk.f32.mxu0 %vm94_vm1, %v1641_v63  ;;  %v1646_v63 = vld [vmem:[#allocation2 + $0x300] sm:$0xff]  ;;  %v1872_v57 = vld [vmem:[#allocation2 + $0x3d0] sm:$0xff] }
 0x1b4   :  { %958 = vst.msk [vmem:[#allocation2 + $0x230] sm:$0xff] %vm94_vm1, %v746_v37  ;;  %v5642_v37 = vld [vmem:[%s9551_s3 + $0x18] sm:$0xf] }
 0x1b6   :  { %6280 = vmatmul.mubr.msk.f32.gmra.mrb[6].mxu0 %vm94_vm1, %v1642_v60  ;;  %v1649_v60 = vld [vmem:[#allocation2 + $0x330] sm:$0xff] }
 0x1b7   :  { %6282 = vmatprep.mubr.msk.f32.mxu0 %vm94_vm1, %v1643_v39  ;;  %v1865_v39 = vld [vmem:[#allocation2 + $0x360] sm:$0xff] }
 0x1ba   :  { %6283 = vmatmul.mubr.msk.f32.gmra.mrb[8].mxu0 %vm94_vm1, %v1644_v55  ;;  %v1869_v55 = vld [vmem:[#allocation2 + $0x3a0] sm:$0xff] }
 0x1bb   :  { %6285 = vmatprep.mubr.msk.f32.mxu0 %vm94_vm1, %v1645_v32  ;;  %v1870_v32 = vld [vmem:[#allocation2 + $0x3b0] sm:$0xff] }
 0x1be   :  { %6286 = vmatmul.mubr.msk.f32.gmra.mrb[10].mxu0 %vm94_vm1, %v1646_v63  ;;  %v1873_v63 = vld [vmem:[#allocation2 + $0x3f0] sm:$0xff] }
 0x1bf   :  { %6288 = vmatprep.mubr.msk.f32.mxu0 %vm94_vm1, %v1647_v34  ;;  %v1875_v34 = vld [vmem:[#allocation2 + $0x410] sm:$0xff] }
 0x1c2   :  { %6289 = vmatmul.mubr.msk.f32.gmra.mrb[12].mxu0 %vm94_vm1, %v1648_v38  ;;  %v1876_v38 = vld [vmem:[#allocation2 + $0x420] sm:$0xff] }
 0x1c3   :  { %6291 = vmatprep.mubr.msk.f32.mxu0 %vm94_vm1, %v1649_v60  ;;  %v1877_v60 = vld [vmem:[#allocation2 + $0x430] sm:$0xff] }
 0x1c6   :  { %6292 = vmatmul.mubr.msk.f32.gmra.mrb[14].mxu0 %vm94_vm1, %v1650_v5  ;;  %v1878_v5 = vld [vmem:[#allocation2 + $0x440] sm:$0xff] }
 0x1c7   :  { %6296 = vmatprep.mubr.msk.f32.mxu0 %vm94_vm1, %v1865_v39  ;;  %v1879_v39 = vld [vmem:[#allocation2 + $0x450] sm:$0xff] }
 0x1ca   :  { %6297 = vmatmul.mubr.msk.f32.vlgmr.msra.gmra.mrb[0].mxu0 %vm94_vm1, %v1866_v33  ;;  %v1880_v33 = vld [vmem:[#allocation2 + $0x460] sm:$0xff] }
 0x1cb   :  { %6321 = vmatpush3.msk.msra.mxu0 %vm1060_vm0, %v5624_v19  ;;  %6299 = vmatprep.mubr.msk.f32.mxu0 %vm94_vm1, %v1867_v17  ;;  %v1874_v19 = vld [vmem:[#allocation2 + $0x400] sm:$0xff] }
 0x1cc   :  { %6346 = vmatprep.subr.msk.mxu0 %vm1060_vm0, %v5642_v37  ;;  %v2095_v17 = vld [vmem:[#allocation2 + $0x241] sm:$0xff] }
 0x1ce   :  { %6300 = vmatmul.mubr.msk.f32.gmra.mrb[2].mxu0 %vm94_vm1, %v1868_v62  ;;  %v2096_v62 = vld [vmem:[#allocation2 + $0x251] sm:$0xff] }
 0x1cf   :  { %6302 = vmatprep.mubr.msk.f32.mxu0 %vm94_vm1, %v1869_v55  ;;  %v2097_v55 = vld [vmem:[#allocation2 + $0x261] sm:$0xff] }
 0x1d2   :  { %6303 = vmatmul.mubr.msk.f32.gmra.mrb[4].mxu0 %vm94_vm1, %v1870_v32  ;;  %v5660_v32 = vld [vmem:[%s9551_s3 + $0x1c] sm:$0xf] }
 0x1d3   :  { %6305 = vmatprep.mubr.msk.f32.mxu0 %vm94_vm1, %v1871_v36  ;;  %v2098_v36 = vld [vmem:[#allocation2 + $0x271] sm:$0xff] }
 0x1d6   :  { %6306 = vmatmul.mubr.msk.f32.gmra.mrb[6].mxu0 %vm94_vm1, %v1872_v57  ;;  %v2099_v57 = vld [vmem:[#allocation2 + $0x281] sm:$0xff] }
 0x1d7   :  { %6308 = vmatprep.mubr.msk.f32.mxu0 %vm94_vm1, %v1873_v63  ;;  %v2100_v63 = vld [vmem:[#allocation2 + $0x291] sm:$0xff] }
 0x1da   :  { %6309 = vmatmul.mubr.msk.f32.gmra.mrb[8].mxu0 %vm94_vm1, %v1874_v19  ;;  %v2101_v19 = vld [vmem:[#allocation2 + $0x2a1] sm:$0xff] }
 0x1db   :  { %6311 = vmatprep.mubr.msk.f32.mxu0 %vm94_vm1, %v1875_v34  ;;  %v2102_v34 = vld [vmem:[#allocation2 + $0x2b1] sm:$0xff] }
 0x1de   :  { %6312 = vmatmul.mubr.msk.f32.gmra.mrb[10].mxu0 %vm94_vm1, %v1876_v38  ;;  %v2103_v38 = vld [vmem:[#allocation2 + $0x2d1] sm:$0xff] }
 0x1df   :  { %6314 = vmatprep.mubr.msk.f32.mxu0 %vm94_vm1, %v1877_v60  ;;  %v2105_v60 = vld [vmem:[#allocation2 + $0x2f1] sm:$0xff] }
 0x1e2   :  { %6315 = vmatmul.mubr.msk.f32.gmra.mrb[12].mxu0 %vm94_vm1, %v1878_v5  ;;  %v2106_v5 = vld [vmem:[#allocation2 + $0x301] sm:$0xff] }
 0x1e3   :  { %6317 = vmatprep.mubr.msk.f32.mxu0 %vm94_vm1, %v1879_v39  ;;  %v2107_v39 = vld [vmem:[#allocation2 + $0x311] sm:$0xff] }
 0x1e6   :  { %6318 = vmatmul.mubr.msk.f32.gmra.mrb[14].mxu0 %vm94_vm1, %v1880_v33  ;;  %v2108_v33 = vld [vmem:[#allocation2 + $0x321] sm:$0xff] }
 0x1e7   :  { %6322 = vmatprep.mubr.msk.f32.mxu0 %vm94_vm1, %v2095_v17  ;;  %v2109_v17 = vld [vmem:[#allocation2 + $0x331] sm:$0xff] }
 0x1ea   :  { %6323 = vmatmul.mubr.msk.f32.vlgmr.msra.gmra.mrb[0].mxu0 %vm94_vm1, %v2096_v62  ;;  %v2110_v62 = vld [vmem:[#allocation2 + $0x341] sm:$0xff] }
 0x1eb   :  { %6347 = vmatpush3.msk.msra.mxu0 %vm1060_vm0, %v5642_v37  ;;  %6325 = vmatprep.mubr.msk.f32.mxu0 %vm94_vm1, %v2097_v55  ;;  %v2104_v37 = vld [vmem:[#allocation2 + $0x2e1] sm:$0xff] }
 0x1ec   :  { %6372 = vmatprep.subr.msk.mxu0 %vm1060_vm0, %v5660_v32  ;;  %v5678_v55 = vld [vmem:[%s9551_s3 + $0x20] sm:$0xf] }
 0x1ee   :  { %6326 = vmatmul.mubr.msk.f32.gmra.mrb[2].mxu0 %vm94_vm1, %v2098_v36  ;;  %v2568_v36 = vld [vmem:[#allocation2 + $0x210] sm:$0xff] }
 0x1ef   :  { %6328 = vmatprep.mubr.msk.f32.mxu0 %vm94_vm1, %v2099_v57  ;;  %v2569_v57 = vld [vmem:[#allocation2 + $0x220] sm:$0xff] }
 0x1f2   :  { %6329 = vmatmul.mubr.msk.f32.gmra.mrb[4].mxu0 %vm94_vm1, %v2100_v63  ;;  %v2570_v63 = vld [vmem:[#allocation2 + $0x230] sm:$0xff] }
 0x1f3   :  { %6331 = vmatprep.mubr.msk.f32.mxu0 %vm94_vm1, %v2101_v19  ;;  %v2792_v19 = vld [vmem:[#allocation2 + $0x81] sm:$0xff] }
 0x1f6   :  { %6332 = vmatmul.mubr.msk.f32.gmra.mrb[6].mxu0 %vm94_vm1, %v2102_v34 }
 0x1f7   :  { %6334 = vmatprep.mubr.msk.f32.mxu0 %vm94_vm1, %v2103_v38 }
 0x1fa   :  { %6335 = vmatmul.mubr.msk.f32.gmra.mrb[8].mxu0 %vm94_vm1, %v2104_v37 }
 0x1fb   :  { %6337 = vmatprep.mubr.msk.f32.mxu0 %vm94_vm1, %v2105_v60 }
 0x1fe   :  { %6338 = vmatmul.mubr.msk.f32.gmra.mrb[10].mxu0 %vm94_vm1, %v2106_v5 }
 0x1ff   :  { %6340 = vmatprep.mubr.msk.f32.mxu0 %vm94_vm1, %v2107_v39 }
 0x202   :  { %6341 = vmatmul.mubr.msk.f32.gmra.mrb[12].mxu0 %vm94_vm1, %v2108_v33 }
 0x203   :  { %6343 = vmatprep.mubr.msk.f32.mxu0 %vm94_vm1, %v2109_v17 }
 0x206   :  { %6344 = vmatmul.mubr.msk.f32.gmra.mrb[14].mxu0 %vm94_vm1, %v2110_v62 }
 0x207   :  { %6348 = vmatprep.mubr.msk.f32.mxu0 %vm94_vm1, %v8418_v24  ;;  %v2332_v24 = vld [vmem:[#allocation2 + $0x80] sm:$0xff] }
 0x20a   :  { %6349 = vmatmul.mubr.msk.f32.vlgmr.msra.gmra.mrb[0].mxu0 %vm94_vm1, %v8427_v56  ;;  %v2340_v56 = vld [vmem:[#allocation2 + $0x110] sm:$0xff] }
 0x20b   :  { %6373 = vmatpush3.msk.msra.mxu0 %vm1060_vm0, %v5660_v32  ;;  %6351 = vmatprep.mubr.msk.f32.mxu0 %vm94_vm1, %v8461_v18  ;;  %v2555_v18 = vld [vmem:[#allocation2 + $0x130] sm:$0xff]  ;;  %v2567_v32 = vld [vmem:[#allocation2 + $0x200] sm:$0xff] }
 0x20c   :  { %6398 = vmatprep.subr.msk.mxu0 %vm1060_vm0, %v5678_v55 }
 0x20e   :  { %6352 = vmatmul.mubr.msk.f32.gmra.mrb[2].mxu0 %vm94_vm1, %v8475_v54  ;;  %v2556_v54 = vld [vmem:[#allocation2 + $0x140] sm:$0xff] }
 0x20f   :  { %6354 = vmatprep.mubr.msk.f32.mxu0 %vm94_vm1, %v8511_v51  ;;  %v2557_v51 = vld [vmem:[#allocation2 + $0x150] sm:$0xff] }
 0x212   :  { %6355 = vmatmul.mubr.msk.f32.gmra.mrb[4].mxu0 %vm94_vm1, %v8521_v58  ;;  %v2558_v58 = vld [vmem:[#allocation2 + $0x160] sm:$0xff] }
 0x213   :  { %6357 = vmatprep.mubr.msk.f32.mxu0 %vm94_vm1, %v8559_v6  ;;  %v2559_v6 = vld [vmem:[#allocation2 + $0x170] sm:$0xff] }
 0x216   :  { %6358 = vmatmul.mubr.msk.f32.gmra.mrb[6].mxu0 %vm94_vm1, %v2332_v24 }
 0x217   :  { %6360 = vmatprep.mubr.msk.f32.mxu0 %vm94_vm1, %v8593_v46  ;;  %v2560_v46 = vld [vmem:[#allocation2 + $0x180] sm:$0xff] }
 0x21a   :  { %6361 = vmatmul.mubr.msk.f32.gmra.mrb[8].mxu0 %vm94_vm1, %v8596_v28  ;;  %v2561_v28 = vld [vmem:[#allocation2 + $0x190] sm:$0xff] }
 0x21b   :  { %6363 = vmatprep.mubr.msk.f32.mxu0 %vm94_vm1, %v8617_v21  ;;  %v2562_v21 = vld [vmem:[#allocation2 + $0x1a0] sm:$0xff] }
 0x21e   :  { %6364 = vmatmul.mubr.msk.f32.gmra.mrb[10].mxu0 %vm94_vm1, %v8619_v1  ;;  %v2563_v1 = vld [vmem:[#allocation2 + $0x1c0] sm:$0xff] }
 0x21f   :  { %6366 = vmatprep.mubr.msk.f32.mxu0 %vm94_vm1, %v8625_v22  ;;  %v2564_v22 = vld [vmem:[#allocation2 + $0x1d0] sm:$0xff] }
 0x222   :  { %6367 = vmatmul.mubr.msk.f32.gmra.mrb[12].mxu0 %vm94_vm1, %v8627_v42  ;;  %v2565_v42 = vld [vmem:[#allocation2 + $0x1e0] sm:$0xff] }
 0x223   :  { %6369 = vmatprep.mubr.msk.f32.mxu0 %vm94_vm1, %v8633_v27  ;;  %v2566_v27 = vld [vmem:[#allocation2 + $0x1f0] sm:$0xff] }
 0x226   :  { %6370 = vmatmul.mubr.msk.f32.gmra.mrb[14].mxu0 %vm94_vm1, %v2340_v56 }
 0x227   :  { %6374 = vmatprep.mubr.msk.f32.mxu0 %vm94_vm1, %v2555_v18 }
 0x22a   :  { %6375 = vmatmul.mubr.msk.f32.vlgmr.msra.gmra.mrb[0].mxu0 %vm94_vm1, %v2556_v54 }
 0x22b   :  { %6399 = vmatpush3.msk.msra.mxu0 %vm1060_vm0, %v5678_v55  ;;  %6377 = vmatprep.mubr.msk.f32.mxu0 %vm94_vm1, %v2557_v51 }
 0x22e   :  { %6378 = vmatmul.mubr.msk.f32.gmra.mrb[2].mxu0 %vm94_vm1, %v2558_v58 }
 0x22f   :  { %6380 = vmatprep.mubr.msk.f32.mxu0 %vm94_vm1, %v2559_v6 }
 0x232   :  { %6381 = vmatmul.mubr.msk.f32.gmra.mrb[4].mxu0 %vm94_vm1, %v2560_v46 }
 0x233   :  { %6383 = vmatprep.mubr.msk.f32.mxu0 %vm94_vm1, %v2561_v28 }
 0x236   :  { %6384 = vmatmul.mubr.msk.f32.gmra.mrb[6].mxu0 %vm94_vm1, %v2562_v21 }
 0x237   :  { %6386 = vmatprep.mubr.msk.f32.mxu0 %vm94_vm1, %v2563_v1 }
 0x23a   :  { %6387 = vmatmul.mubr.msk.f32.gmra.mrb[8].mxu0 %vm94_vm1, %v2564_v22 }
 0x23b   :  { %6389 = vmatprep.mubr.msk.f32.mxu0 %vm94_vm1, %v2565_v42 }
 0x23e   :  { %6390 = vmatmul.mubr.msk.f32.gmra.mrb[10].mxu0 %vm94_vm1, %v2566_v27 }
 0x23f   :  { %6392 = vmatprep.mubr.msk.f32.mxu0 %vm94_vm1, %v2567_v32 }
 0x242   :  { %6393 = vmatmul.mubr.msk.f32.gmra.mrb[12].mxu0 %vm94_vm1, %v2568_v36 }
 0x243   :  { %6395 = vmatprep.mubr.msk.f32.mxu0 %vm94_vm1, %v2569_v57 }
 0x246   :  { %6396 = vmatmul.mubr.msk.f32.gmra.mrb[14].mxu0 %vm94_vm1, %v2570_v63 }
 0x247   :  { %6400 = vmatprep.mubr.msk.f32.mxu0 %vm94_vm1, %v8640_v53  ;;  %v2800_v53 = vld [vmem:[#allocation2 + $0x111] sm:$0xff] }
 0x24a   :  { %6401 = vmatmul.mubr.msk.f32.vlgmr.msra.gmra.mrb[0].mxu0 %vm94_vm1, %v8642_v13  ;;  %v9678_v13 = vmov 0.0  }
 0x24b   :  { %6403 = vmatprep.mubr.msk.f32.mxu0 %vm94_vm1, %v8655_v26  ;;  %3204 = vst.msk [vmem:[#allocation3] sm:$0xff] %vm3015_vm3, %v9678_v13  ;;  %3207 = vst.msk [vmem:[#allocation3 + $0x10] sm:$0xff] %vm3015_vm3, %v9678_v13 }
 0x24c   :  { %3209 = vst.msk [vmem:[#allocation3 + $0x20] sm:$0xff] %vm3015_vm3, %v9678_v13  ;;  %3211 = vst.msk [vmem:[#allocation3 + $0x30] sm:$0xff] %vm3015_vm3, %v9678_v13 }
 0x24d   :  { %3213 = vst.msk [vmem:[#allocation3 + $0x40] sm:$0xff] %vm3015_vm3, %v9678_v13  ;;  %3215 = vst.msk [vmem:[#allocation3 + $0x50] sm:$0xff] %vm3015_vm3, %v9678_v13 }
 0x24e   :  { %6404 = vmatmul.mubr.msk.f32.gmra.mrb[2].mxu0 %vm94_vm1, %v8657_v14  ;;  %3217 = vst.msk [vmem:[#allocation3 + $0x60] sm:$0xff] %vm3015_vm3, %v9678_v13  ;;  %3219 = vst.msk [vmem:[#allocation3 + $0x70] sm:$0xff] %vm3015_vm3, %v9678_v13 }
 0x24f   :  { %6406 = vmatprep.mubr.msk.f32.mxu0 %vm94_vm1, %v8665_v40  ;;  %3221 = vst.msk [vmem:[#allocation3 + $0x80] sm:$0xff] %vm3015_vm3, %v9678_v13  ;;  %3223 = vst.msk [vmem:[#allocation3 + $0x90] sm:$0xff] %vm3015_vm3, %v9678_v13 }
 0x250   :  { %3225 = vst.msk [vmem:[#allocation3 + $0xa0] sm:$0xff] %vm3015_vm3, %v9678_v13  ;;  %3227 = vst.msk [vmem:[#allocation3 + $0xb0] sm:$0xff] %vm3015_vm3, %v9678_v13 }
 0x251   :  { %3229 = vst.msk [vmem:[#allocation3 + $0xc0] sm:$0xff] %vm3015_vm3, %v9678_v13  ;;  %3231 = vst.msk [vmem:[#allocation3 + $0xd0] sm:$0xff] %vm3015_vm3, %v9678_v13 }
 0x252   :  { %6407 = vmatmul.mubr.msk.f32.gmra.mrb[4].mxu0 %vm94_vm1, %v8667_v10  ;;  %3233 = vst.msk [vmem:[#allocation3 + $0xe0] sm:$0xff] %vm3015_vm3, %v9678_v13  ;;  %3235 = vst.msk [vmem:[#allocation3 + $0xf0] sm:$0xff] %vm3015_vm3, %v9678_v13 }
 0x253   :  { %6409 = vmatprep.mubr.msk.f32.mxu0 %vm94_vm1, %v8673_v16  ;;  %3237 = vst.msk [vmem:[#allocation3 + $0x100] sm:$0xff] %vm3015_vm3, %v9678_v13  ;;  %3239 = vst.msk [vmem:[#allocation3 + $0x110] sm:$0xff] %vm3015_vm3, %v9678_v13  ;;  %v5698_v16 = vld [vmem:[%s9554_s6 + $0x8] sm:$0xff] }
 0x254   :  { %3241 = vst.msk [vmem:[#allocation3 + $0x120] sm:$0xff] %vm3015_vm3, %v9678_v13  ;;  %3243 = vst.msk [vmem:[#allocation3 + $0x130] sm:$0xff] %vm3015_vm3, %v9678_v13  ;;  %6684 = vmatprep.subr.mxu1 %v5698_v16  ;;  %6424 = vmatprep.subr.mxu0 %v5698_v16 }
 0x255   :  { %3232 = vst.msk [vmem:[#allocation3 + $0xd8] sm:$0x3] %vm3205_vm4, %v9678_v13  ;;  %3234 = vst.msk [vmem:[#allocation3 + $0xe8] sm:$0x3] %vm3205_vm4, %v9678_v13  ;;  %6685 = vmatpush3.msra.mxu1 %v5698_v16  ;;  %6425 = vmatpush3.msra.mxu0 %v5698_v16 }
 0x256   :  { %6410 = vmatmul.mubr.msk.f32.gmra.mrb[6].mxu0 %vm94_vm1, %v2792_v19  ;;  %3236 = vst.msk [vmem:[#allocation3 + $0xf8] sm:$0x3] %vm3205_vm4, %v9678_v13  ;;  %3238 = vst.msk [vmem:[#allocation3 + $0x108] sm:$0x3] %vm3205_vm4, %v9678_v13 }
 0x257   :  { %6412 = vmatprep.mubr.msk.f32.mxu0 %vm94_vm1, %v8680_v8  ;;  %3240 = vst.msk [vmem:[#allocation3 + $0x118] sm:$0x3] %vm3205_vm4, %v9678_v13  ;;  %3242 = vst.msk [vmem:[#allocation3 + $0x128] sm:$0x3] %vm3205_vm4, %v9678_v13  ;;  %v8962_v8 = vld [vmem:[%s9554_s6] sm:$0xff] }
 0x258   :  { %3206 = vst.msk [vmem:[#allocation3 + $0x8] sm:$0x3] %vm3205_vm4, %v9678_v13  ;;  %3208 = vst.msk [vmem:[#allocation3 + $0x18] sm:$0x3] %vm3205_vm4, %v9678_v13  ;;  %6450 = vmatprep.subr.mxu1 %v8962_v8 }
 0x259   :  { %3210 = vst.msk [vmem:[#allocation3 + $0x28] sm:$0x3] %vm3205_vm4, %v9678_v13  ;;  %3212 = vst.msk [vmem:[#allocation3 + $0x38] sm:$0x3] %vm3205_vm4, %v9678_v13 }
 0x25a   :  { %6413 = vmatmul.mubr.msk.f32.gmra.mrb[8].mxu0 %vm94_vm1, %v8682_v59  ;;  %3214 = vst.msk [vmem:[#allocation3 + $0x48] sm:$0x3] %vm3205_vm4, %v9678_v13  ;;  %3216 = vst.msk [vmem:[#allocation3 + $0x58] sm:$0x3] %vm3205_vm4, %v9678_v13 }
 0x25b   :  { %6415 = vmatprep.mubr.msk.f32.mxu0 %vm94_vm1, %v8690_v44  ;;  %3218 = vst.msk [vmem:[#allocation3 + $0x68] sm:$0x3] %vm3205_vm4, %v9678_v13  ;;  %3220 = vst.msk [vmem:[#allocation3 + $0x78] sm:$0x3] %vm3205_vm4, %v9678_v13 }
 0x25c   :  { %3222 = vst.msk [vmem:[#allocation3 + $0x88] sm:$0x3] %vm3205_vm4, %v9678_v13  ;;  %3224 = vst.msk [vmem:[#allocation3 + $0x98] sm:$0x3] %vm3205_vm4, %v9678_v13 }
 0x25d   :  { %3226 = vst.msk [vmem:[#allocation3 + $0xa8] sm:$0x3] %vm3205_vm4, %v9678_v13  ;;  %3228 = vst.msk [vmem:[#allocation3 + $0xb8] sm:$0x3] %vm3205_vm4, %v9678_v13 }
 0x25e   :  { %6416 = vmatmul.mubr.msk.f32.gmra.mrb[10].mxu0 %vm94_vm1, %v8692_v41  ;;  %3230 = vst.msk [vmem:[#allocation3 + $0xc8] sm:$0x3] %vm3205_vm4, %v9678_v13  ;;  %3244 = vst.msk [vmem:[#allocation3 + $0x138] sm:$0x3] %vm3205_vm4, %v9678_v13 }
 0x25f   :  { %6418 = vmatprep.mubr.msk.f32.mxu0 %vm94_vm1, %v8699_v45  ;;  %v3279_v5 = vld [vmem:[#allocation3 + $0x1] sm:$0xff] }
 0x262   :  { %6419 = vmatmul.mubr.msk.f32.gmra.mrb[12].mxu0 %vm94_vm1, %v8701_v30 }
 0x263   :  { %6421 = vmatprep.mubr.msk.f32.mxu0 %vm94_vm1, %v8707_v20 }
 0x264   :  { %v3287_v39 = vld [vmem:[#allocation3 + $0xa1] sm:$0xff] }
 0x265   :  { %6438 = vmatprep.mubr.msk.f32.mxu1 %vm3015_vm3, %v3287_v39 }
 0x266   :  { %6422 = vmatmul.mubr.msk.f32.gmra.mrb[14].mxu0 %vm94_vm1, %v2800_v53 }
 0x267   :  { %6426 = vmatprep.mubr.msk.f32.mxu0 %vm3015_vm3, %v3279_v5 }
 0x31d   :  { %v8906_v41 = vpop.f32.mrb[0].mxu0 }
 0x31e   :  { %v3017_v44 = vsel %vm3015_vm3, %v8906_v41, 0.0  ;;  %v8910_v26 = vpop.f32.mrb[1].mxu0 }
 0x31f   :  { %v3016_v14 = vsel %vm3015_vm3, %v8910_v26, 0.0 }
 0x320   :  { %v3018_v40 = vadd.f32 %v3017_v44, %v3016_v14 }
 0x321   :  { %v8954_v10 = vpop.f32.mrb[2].mxu0 }
 0x322   :  { %v2930_v59 = vpop.f32.mrb[3].mxu0  ;;  %v3021_v20 = vsel %vm3015_vm3, %v8954_v10, 0.0 }
 0x323   :  { %v3019_v45 = vsel %vm3015_vm3, %v2930_v59, 0.0 }
 0x324   :  { %v3020_v30 = vadd.f32 %v3019_v45, %v3018_v40 }
 0x325   :  { %v6408_v34 = vpop.f32.mrb[4].mxu0 }
 0x326   :  { %v2940_v38 = vpop.f32.mrb[5].mxu0  ;;  %v3022_v37 = vadd.f32 %v3021_v20, %v3020_v30  ;;  %v3025_v17 = vsel %vm3015_vm3, %v6408_v34, 0.0 }
 0x327   :  { %v3023_v60 = vsel %vm3015_vm3, %v2940_v38, 0.0 }
 0x328   :  { %v3024_v33 = vadd.f32 %v3023_v60, %v3022_v37 }
 0x329   :  { %v6411_v62 = vpop.f32.mrb[6].mxu0 }
 0x32a   :  { %v2950_v55 = vpop.f32.mrb[7].mxu0  ;;  %v3026_v24 = vadd.f32 %v3025_v17, %v3024_v33  ;;  %v3029_v54 = vsel %vm3015_vm3, %v6411_v62, 0.0 }
 0x32b   :  { %v3027_v56 = vsel %vm3015_vm3, %v2950_v55, 0.0 }
 0x32c   :  { %v3028_v18 = vadd.f32 %v3027_v56, %v3026_v24 }
 0x32d   :  { %v6414_v51 = vpop.f32.mrb[8].mxu0 }
 0x32e   :  { %v2960_v58 = vpop.f32.mrb[9].mxu0  ;;  %v3030_v6 = vadd.f32 %v3029_v54, %v3028_v18  ;;  %v3033_v21 = vsel %vm3015_vm3, %v6414_v51, 0.0 }
 0x32f   :  { %v3031_v46 = vsel %vm3015_vm3, %v2960_v58, 0.0 }
 0x330   :  { %v3032_v28 = vadd.f32 %v3031_v46, %v3030_v6 }
 0x331   :  { %v6417_v1 = vpop.f32.mrb[10].mxu0 }
 0x332   :  { %v2970_v22 = vpop.f32.mrb[11].mxu0  ;;  %v3034_v42 = vadd.f32 %v3033_v21, %v3032_v28  ;;  %v3037_v36 = vsel %vm3015_vm3, %v6417_v1, 0.0 }
 0x333   :  { %v3035_v27 = vsel %vm3015_vm3, %v2970_v22, 0.0 }
 0x334   :  { %v3036_v32 = vadd.f32 %v3035_v27, %v3034_v42 }
 0x335   :  { %v6420_v57 = vpop.f32.mrb[12].mxu0 }
 0x336   :  { %v2980_v63 = vpop.f32.mrb[13].mxu0  ;;  %v3038_v19 = vadd.f32 %v3037_v36, %v3036_v32  ;;  %v3041_v44 = vsel %vm3015_vm3, %v6420_v57, 0.0 }
 0x337   :  { %v3039_v53 = vsel %vm3015_vm3, %v2980_v63, 0.0 }
 0x338   :  { %v3040_v13 = vadd.f32 %v3039_v53, %v3038_v19 }
 0x339   :  { %v6423_v14 = vpop.f32.mrb[14].mxu0 }
 0x33a   :  { %v2990_v40 = vpop.f32.mrb[15].mxu0  ;;  %v3042_v16 = vadd.f32 %v3041_v44, %v3040_v13  ;;  %v3045_v20 = vsel %vm3015_vm3, %v6423_v14, 0.0 }
 0x33b   :  { %v3043_v45 = vsel %vm3015_vm3, %v2990_v40, 0.0 }
 0x33c   :  { %v3044_v30 = vadd.f32 %v3043_v45, %v3042_v16 }
 0x33e   :  { %v3046_v37 = vadd.f32 %v3045_v20, %v3044_v30 }
 0x340   :  { %v3047_v60 = vrot.slane %v3046_v37, 4 }
 0x342   :  { %v3048_v5 = vadd.f32 %v3047_v60, %v3046_v37 }
 0x344   :  { %v3049_v39 = vrot.slane %v3048_v5, 2 }
 0x346   :  { %v3050_v33 = vadd.f32 %v3049_v39, %v3048_v5 }
 0x348   :  { %v3051_v17 = vrot.slane %v3050_v33, 1 }
 0x34a   :  { %v3052_v24 = vadd.f32 %v3051_v17, %v3050_v33 }
 0x34c   :  { %v3053_v56 = vmul.f32 0.0078125, %v3052_v24 }
 0x34e   :  { %v8983_v18 = vsub.f32 %v8910_v26, %v3053_v56  ;;  %v8986_v54 = vsub.f32 %v8906_v41, %v3053_v56  ;;  %v8988_v6 = vsub.f32 %v2930_v59, %v3053_v56  ;;  %v8991_v46 = vsub.f32 %v8954_v10, %v3053_v56 }
 0x34f   :  { %v8993_v28 = vsub.f32 %v2940_v38, %v3053_v56  ;;  %v8995_v21 = vsub.f32 %v6408_v34, %v3053_v56  ;;  %v8997_v42 = vsub.f32 %v2950_v55, %v3053_v56  ;;  %v8999_v27 = vsub.f32 %v6411_v62, %v3053_v56 }
 0x350   :  { %v9001_v32 = vsub.f32 %v2960_v58, %v3053_v56  ;;  %v9003_v26 = vsub.f32 %v6414_v51, %v3053_v56  ;;  %v9005_v36 = vsub.f32 %v2970_v22, %v3053_v56  ;;  %v9007_v41 = vsub.f32 %v6417_v1, %v3053_v56 }
 0x351   :  { %v9009_v59 = vsub.f32 %v2980_v63, %v3053_v56  ;;  %v9011_v10 = vsub.f32 %v6420_v57, %v3053_v56  ;;  %v9013_v38 = vsub.f32 %v2990_v40, %v3053_v56  ;;  %v9015_v34 = vsub.f32 %v6423_v14, %v3053_v56 }
 0x352   :  { %v3070_v62 = vmul.f32 %v8983_v18, %v8983_v18  ;;  %v3071_v55 = vmul.f32 %v8986_v54, %v8986_v54  ;;  %v3072_v51 = vmul.f32 %v8988_v6, %v8988_v6  ;;  %v3073_v58 = vmul.f32 %v8991_v46, %v8991_v46 }
 0x353   :  { %v3074_v63 = vmul.f32 %v8993_v28, %v8993_v28  ;;  %v3075_v13 = vmul.f32 %v8995_v21, %v8995_v21  ;;  %v3076_v40 = vmul.f32 %v8997_v42, %v8997_v42  ;;  %v3077_v30 = vmul.f32 %v8999_v27, %v8999_v27 }
 0x354   :  { %v3086_v1 = vsel %vm3015_vm3, %v3070_v62, 0.0  ;;  %v3087_v22 = vsel %vm3015_vm3, %v3071_v55, 0.0  ;;  %v3089_v19 = vsel %vm3015_vm3, %v3072_v51, 0.0  ;;  %v3091_v44 = vsel %vm3015_vm3, %v3073_v58, 0.0 }
 0x355   :  { %v3088_v57 = vadd.f32 %v3087_v22, %v3086_v1  ;;  %v3093_v16 = vsel %vm3015_vm3, %v3074_v63, 0.0  ;;  %v3095_v20 = vsel %vm3015_vm3, %v3075_v13, 0.0  ;;  %v3078_v60 = vmul.f32 %v9001_v32, %v9001_v32 }
 0x356   :  { %v3097_v5 = vsel %vm3015_vm3, %v3076_v40, 0.0  ;;  %v3079_v33 = vmul.f32 %v9003_v26, %v9003_v26  ;;  %v3099_v17 = vsel %vm3015_vm3, %v3077_v30, 0.0  ;;  %v3080_v56 = vmul.f32 %v9005_v36, %v9005_v36 }
 0x357   :  { %v3090_v53 = vadd.f32 %v3089_v19, %v3088_v57  ;;  %v3101_v62 = vsel %vm3015_vm3, %v3078_v60, 0.0  ;;  %v3081_v51 = vmul.f32 %v9007_v41, %v9007_v41  ;;  %v3082_v22 = vmul.f32 %v9009_v59, %v9009_v59 }
 0x358   :  { %v3103_v58 = vsel %vm3015_vm3, %v3079_v33, 0.0  ;;  %v3105_v57 = vsel %vm3015_vm3, %v3080_v56, 0.0  ;;  %v3083_v19 = vmul.f32 %v9011_v10, %v9011_v10 }
 0x359   :  { %v3092_v14 = vadd.f32 %v3091_v44, %v3090_v53  ;;  %v3107_v53 = vsel %vm3015_vm3, %v3081_v51, 0.0  ;;  %v3084_v44 = vmul.f32 %v9013_v38, %v9013_v38 }
 0x35b   :  { %v3094_v45 = vadd.f32 %v3093_v16, %v3092_v14  ;;  %v3109_v14 = vsel %vm3015_vm3, %v3082_v22, 0.0  ;;  %v3085_v16 = vmul.f32 %v9015_v34, %v9015_v34 }
 0x35d   :  { %v3096_v37 = vadd.f32 %v3095_v20, %v3094_v45  ;;  %v3111_v45 = vsel %vm3015_vm3, %v3083_v19, 0.0  ;;  %v3113_v20 = vsel %vm3015_vm3, %v3084_v44, 0.0  ;;  %v3115_v60 = vsel %vm3015_vm3, %v3085_v16, 0.0 }
 0x35f   :  { %v3098_v39 = vadd.f32 %v3097_v5, %v3096_v37 }
 0x361   :  { %v3100_v24 = vadd.f32 %v3099_v17, %v3098_v39 }
 0x363   :  { %v3102_v55 = vadd.f32 %v3101_v62, %v3100_v24 }
 0x365   :  { %v3104_v1 = vadd.f32 %v3103_v58, %v3102_v55 }
 0x367   :  { %v3106_v63 = vadd.f32 %v3105_v57, %v3104_v1 }
 0x369   :  { %v3108_v13 = vadd.f32 %v3107_v53, %v3106_v63 }
 0x36b   :  { %v3110_v40 = vadd.f32 %v3109_v14, %v3108_v13  ;;  %v5696_v14 = vld [vmem:[%s9552_s4] ss:$0 sm:$0xff] }
 0x36d   :  { %v3112_v30 = vadd.f32 %v3111_v45, %v3110_v40 }
 0x36f   :  { %v3114_v37 = vadd.f32 %v3113_v20, %v3112_v30 }
 0x371   :  { %v3116_v5 = vadd.f32 %v3115_v60, %v3114_v37 }
 0x373   :  { %v3117_v39 = vrot.slane %v3116_v5, 4 }
 0x375   :  { %v3118_v33 = vadd.f32 %v3117_v39, %v3116_v5 }
 0x377   :  { %v3119_v17 = vrot.slane %v3118_v33, 2 }
 0x379   :  { %v3120_v24 = vadd.f32 %v3119_v17, %v3118_v33 }
 0x37b   :  { %v3121_v56 = vrot.slane %v3120_v24, 1 }
 0x37d   :  { %v3122_v62 = vadd.f32 %v3121_v56, %v3120_v24 }
 0x37f   :  { %v3123_v55 = vmul.f32 0.0078125, %v3122_v62 }
 0x381   :  { %v3124_v51 = vadd.f32 1e-05, %v3123_v55 }
 0x383   :  { %6962 = vrsqrt.f32 %v3124_v51 }
 0x38d   :  { %v6963_v58 = vpop.eup %6962 }
 0x38e   :  { %v3126_v1 = vmul.f32 %v6963_v58, %v8983_v18  ;;  %v3127_v22 = vmul.f32 %v6963_v58, %v8986_v54  ;;  %v3128_v57 = vmul.f32 %v6963_v58, %v8988_v6  ;;  %v3129_v63 = vmul.f32 %v6963_v58, %v8991_v46 }
 0x38f   :  { %v3130_v19 = vmul.f32 %v6963_v58, %v8993_v28  ;;  %v3131_v53 = vmul.f32 %v6963_v58, %v8995_v21  ;;  %v3132_v13 = vmul.f32 %v6963_v58, %v8997_v42  ;;  %v3133_v44 = vmul.f32 %v6963_v58, %v8999_v27 }
 0x390   :  { %v3134_v18 = vmul.f32 %v6963_v58, %v9001_v32  ;;  %v3135_v54 = vmul.f32 %v6963_v58, %v9003_v26  ;;  %v3136_v6 = vmul.f32 %v6963_v58, %v9005_v36  ;;  %v3137_v46 = vmul.f32 %v6963_v58, %v9007_v41  ;;  %v5697_v36 = vld [vmem:[%s9553_s5] ss:$0 sm:$0xff] }
 0x391   :  { %v3138_v28 = vmul.f32 %v6963_v58, %v9009_v59  ;;  %v3139_v21 = vmul.f32 %v6963_v58, %v9011_v10  ;;  %v3140_v42 = vmul.f32 %v6963_v58, %v9013_v38  ;;  %v3141_v27 = vmul.f32 %v6963_v58, %v9015_v34 }
 0x392   :  { %v3149_v40 = vmul.f32 %v5696_v14, %v3126_v1  ;;  %v3150_v16 = vmul.f32 %v5696_v14, %v3127_v22  ;;  %v3151_v45 = vmul.f32 %v5696_v14, %v3128_v57  ;;  %v3152_v30 = vmul.f32 %v5696_v14, %v3129_v63 }
 0x393   :  { %v3153_v20 = vmul.f32 %v5696_v14, %v3130_v19  ;;  %v3154_v32 = vmul.f32 %v5696_v14, %v3131_v53  ;;  %v3155_v37 = vmul.f32 %v5696_v14, %v3132_v13  ;;  %v3156_v26 = vmul.f32 %v5696_v14, %v3133_v44 }
 0x394   :  { %v3157_v41 = vmul.f32 %v5696_v14, %v3134_v18  ;;  %v3158_v59 = vmul.f32 %v5696_v14, %v3135_v54  ;;  %v3159_v60 = vmul.f32 %v5696_v14, %v3136_v6  ;;  %v3160_v10 = vmul.f32 %v5696_v14, %v3137_v46 }
 0x395   :  { %v3161_v5 = vmul.f32 %v5696_v14, %v3138_v28  ;;  %v3162_v38 = vmul.f32 %v5696_v14, %v3139_v21  ;;  %v3163_v39 = vmul.f32 %v5696_v14, %v3140_v42  ;;  %v3164_v34 = vmul.f32 %v5696_v14, %v3141_v27 }
 0x396   :  { %v3172_v33 = vadd.f32 %v5697_v36, %v3149_v40  ;;  %v3173_v17 = vadd.f32 %v5697_v36, %v3150_v16  ;;  %v3174_v24 = vadd.f32 %v5697_v36, %v3151_v45  ;;  %v3175_v56 = vadd.f32 %v5697_v36, %v3152_v30 }
 0x397   :  { %v3176_v62 = vadd.f32 %v5697_v36, %v3153_v20  ;;  %v3177_v55 = vadd.f32 %v5697_v36, %v3154_v32  ;;  %v3178_v51 = vadd.f32 %v5697_v36, %v3155_v37  ;;  %v3179_v58 = vadd.f32 %v5697_v36, %v3156_v26 }
 0x398   :  { %v3180_v1 = vadd.f32 %v5697_v36, %v3157_v41  ;;  %v3181_v22 = vadd.f32 %v5697_v36, %v3158_v59  ;;  %v3182_v57 = vadd.f32 %v5697_v36, %v3159_v60  ;;  %v3183_v63 = vadd.f32 %v5697_v36, %v3160_v10  ;;  %v5731_v41 = vld [vmem:[%s9554_s6 + $0x10] sm:$0xff] }
 0x399   :  { %v3184_v19 = vadd.f32 %v5697_v36, %v3161_v5  ;;  %v3185_v53 = vadd.f32 %v5697_v36, %v3162_v38  ;;  %v3186_v13 = vadd.f32 %v5697_v36, %v3163_v39  ;;  %v3187_v44 = vadd.f32 %v5697_v36, %v3164_v34 }
 0x39a   :  { %v3188_v18 = vmax.f32 %v3172_v33, 0.0  ;;  %v3190_v54 = vmax.f32 %v3174_v24, 0.0  ;;  %v3191_v6 = vmax.f32 %v3175_v56, 0.0  ;;  %v3192_v14 = vmax.f32 %v3176_v62, 0.0  ;;  %v3262_v56 = vld [vmem:[#allocation3] sm:$0xff] }
 0x39b   :  { %v3193_v46 = vmax.f32 %v3177_v55, 0.0  ;;  %v3194_v28 = vmax.f32 %v3178_v51, 0.0  ;;  %v3195_v21 = vmax.f32 %v3179_v58, 0.0  ;;  %v3196_v42 = vmax.f32 %v3180_v1, 0.0  ;;  %v5748_v51 = vld [vmem:[%s9554_s6 + $0x18] sm:$0xff] }
 0x39c   :  { %v3197_v27 = vmax.f32 %v3181_v22, 0.0  ;;  %v3198_v40 = vmax.f32 %v3182_v57, 0.0  ;;  %v3199_v16 = vmax.f32 %v3183_v63, 0.0  ;;  %v3200_v45 = vmax.f32 %v3184_v19, 0.0  ;;  %3246 = vst.msk [vmem:[#allocation3 + $0x11] sm:$0xff] %vm3015_vm3, %v3188_v18  ;;  %3248 = vst.msk [vmem:[#allocation3 + $0x31] sm:$0xff] %vm3015_vm3, %v3190_v54 }
 0x39d   :  { %3249 = vst.msk [vmem:[#allocation3 + $0x41] sm:$0xff] %vm3015_vm3, %v3191_v6  ;;  %3250 = vst.msk [vmem:[#allocation3 + $0x51] sm:$0xff] %vm3015_vm3, %v3192_v14  ;;  %v3201_v30 = vmax.f32 %v3185_v53, 0.0  ;;  %v3202_v20 = vmax.f32 %v3186_v13, 0.0  ;;  %v3203_v32 = vmax.f32 %v3187_v44, 0.0  ;;  %v3189_v37 = vmax.f32 %v3173_v17, 0.0 }
 0x39e   :  { %3251 = vst.msk [vmem:[#allocation3 + $0x61] sm:$0xff] %vm3015_vm3, %v3193_v46  ;;  %3252 = vst.msk [vmem:[#allocation3 + $0x71] sm:$0xff] %vm3015_vm3, %v3194_v28  ;;  %v3270_v19 = vld [vmem:[#allocation3 + $0xa0] sm:$0xff] }
 0x39f   :  { %3253 = vst.msk [vmem:[#allocation3 + $0x81] sm:$0xff] %vm3015_vm3, %v3195_v21  ;;  %3254 = vst.msk [vmem:[#allocation3 + $0xb1] sm:$0xff] %vm3015_vm3, %v3196_v42  ;;  %v3683_v46 = vld [vmem:[#allocation3 + $0x2] sm:$0xff] }
 0x3a0   :  { %3256 = vst.msk [vmem:[#allocation3 + $0xd1] sm:$0xff] %vm3015_vm3, %v3198_v40  ;;  %3257 = vst.msk [vmem:[#allocation3 + $0xe1] sm:$0xff] %vm3015_vm3, %v3199_v16  ;;  %v5765_v42 = vld [vmem:[%s9554_s6 + $0x20] sm:$0xff] }
 0x3a1   :  { %3258 = vst.msk [vmem:[#allocation3 + $0xf1] sm:$0xff] %vm3015_vm3, %v3200_v45  ;;  %3255 = vst.msk [vmem:[#allocation3 + $0xc1] sm:$0xff] %vm3015_vm3, %v3197_v27 }
 0x3a2   :  { %3259 = vst.msk [vmem:[#allocation3 + $0x101] sm:$0xff] %vm3015_vm3, %v3201_v30  ;;  %3260 = vst.msk [vmem:[#allocation3 + $0x111] sm:$0xff] %vm3015_vm3, %v3202_v20  ;;  %v3691_v20 = vld [vmem:[#allocation3 + $0xa2] sm:$0xff] }
 0x3a3   :  { %3261 = vst.msk [vmem:[#allocation3 + $0x121] sm:$0xff] %vm3015_vm3, %v3203_v32  ;;  %3247 = vst.msk [vmem:[#allocation3 + $0x21] sm:$0xff] %vm3015_vm3, %v3189_v37  ;;  %v9103_v26 = vld [vmem:[#allocation3 + $0x11] sm:$0xff] }
 0x3a4   :  { %6427 = vmatmul.mubr.msk.f32.vlgmr.msra.gmra.mrb[16].mxu0 %vm3015_vm3, %v9103_v26  ;;  %v9123_v10 = vld [vmem:[#allocation3 + $0x31] sm:$0xff]  ;;  %v9129_v38 = vld [vmem:[#allocation3 + $0x41] sm:$0xff] }
 0x3a5   :  { %v9139_v39 = vld [vmem:[#allocation3 + $0x51] sm:$0xff]  ;;  %v9145_v33 = vld [vmem:[#allocation3 + $0x61] sm:$0xff] }
 0x3a6   :  { %v9107_v36 = vld [vmem:[#allocation3 + $0xb1] sm:$0xff]  ;;  %v9179_v22 = vld [vmem:[#allocation3 + $0x40] sm:$0xff] }
 0x3a7   :  { %6439 = vmatmul.mubr.msk.f32.vlgmr.msra.gmra.mrb[0].mxu1 %vm3015_vm3, %v9107_v36  ;;  %v9127_v5 = vld [vmem:[#allocation3 + $0xd1] sm:$0xff]  ;;  %v9187_v63 = vld [vmem:[#allocation3 + $0x60] sm:$0xff] }
 0x3a8   :  { %v9114_v59 = vld [vmem:[#allocation3 + $0xc1] sm:$0xff]  ;;  %6451 = vmatpush3.msra.mxu1 %v8962_v8  ;;  %v9143_v34 = vld [vmem:[#allocation3 + $0xf1] sm:$0xff] }
 0x3a9   :  { %6441 = vmatprep.mubr.msk.f32.mxu1 %vm3015_vm3, %v9114_v59  ;;  %6476 = vmatprep.subr.mxu1 %v5731_v41  ;;  %v9135_v8 = vld [vmem:[#allocation3 + $0xe1] sm:$0xff]  ;;  %v9155_v24 = vld [vmem:[#allocation3 + $0x71] sm:$0xff] }
 0x3aa   :  { %v9117_v60 = vld [vmem:[#allocation3 + $0x21] sm:$0xff]  ;;  %v9159_v62 = vld [vmem:[#allocation3 + $0x111] sm:$0xff] }
 0x3ab   :  { %6429 = vmatprep.mubr.msk.f32.mxu0 %vm3015_vm3, %v9117_v60  ;;  %6442 = vmatmul.mubr.msk.f32.gmra.mrb[2].mxu1 %vm3015_vm3, %v9127_v5  ;;  %v9151_v17 = vld [vmem:[#allocation3 + $0x101] sm:$0xff]  ;;  %v9164_v55 = vld [vmem:[#allocation3 + $0x10] sm:$0xff] }
 0x3ac   :  { %6430 = vmatmul.mubr.msk.f32.gmra.mrb[18].mxu0 %vm3015_vm3, %v9123_v10  ;;  %6444 = vmatprep.mubr.msk.f32.mxu1 %vm3015_vm3, %v9135_v8  ;;  %v9171_v58 = vld [vmem:[#allocation3 + $0x20] sm:$0xff]  ;;  %v9175_v1 = vld [vmem:[#allocation3 + $0x30] sm:$0xff] }
 0x3ad   :  { %6432 = vmatprep.mubr.msk.f32.mxu0 %vm3015_vm3, %v9129_v38  ;;  %v9183_v57 = vld [vmem:[#allocation3 + $0x50] sm:$0xff]  ;;  %v9197_v44 = vld [vmem:[#allocation3 + $0xc0] sm:$0xff] }
 0x3ae   :  { %v9191_v53 = vld [vmem:[#allocation3 + $0x70] sm:$0xff]  ;;  %v9205_v54 = vld [vmem:[#allocation3 + $0xe0] sm:$0xff] }
 0x3af   :  { %6445 = vmatmul.mubr.msk.f32.gmra.mrb[4].mxu1 %vm3015_vm3, %v9143_v34  ;;  %v3271_v13 = vld [vmem:[#allocation3 + $0xb0] sm:$0xff]  ;;  %v9213_v14 = vld [vmem:[#allocation3 + $0x100] sm:$0xff] }
 0x3b0   :  { %6433 = vmatmul.mubr.msk.f32.gmra.mrb[20].mxu0 %vm3015_vm3, %v9139_v39  ;;  %6447 = vmatprep.mubr.msk.f32.mxu1 %vm3015_vm3, %v9151_v17  ;;  %v9201_v18 = vld [vmem:[#allocation3 + $0xd0] sm:$0xff]  ;;  %v9229_v27 = vld [vmem:[#allocation3 + $0x22] sm:$0xff] }
 0x3b1   :  { %6435 = vmatprep.mubr.msk.f32.mxu0 %vm3015_vm3, %v9145_v33  ;;  %v9209_v6 = vld [vmem:[#allocation3 + $0xf0] sm:$0xff]  ;;  %v9237_v16 = vld [vmem:[#allocation3 + $0x42] sm:$0xff] }
 0x3b2   :  { %v9217_v28 = vld [vmem:[#allocation3 + $0x110] sm:$0xff]  ;;  %v9245_v30 = vld [vmem:[#allocation3 + $0x62] sm:$0xff] }
 0x3b3   :  { %6448 = vmatmul.mubr.msk.f32.gmra.mrb[6].mxu1 %vm3015_vm3, %v9159_v62  ;;  %v9222_v21 = vld [vmem:[#allocation3 + $0x12] sm:$0xff] }
 0x3b4   :  { %6436 = vmatmul.mubr.msk.f32.gmra.mrb[22].mxu0 %vm3015_vm3, %v9155_v24  ;;  %6452 = vmatprep.mubr.msk.f32.mxu1 %vm3015_vm3, %v3262_v56  ;;  %v9233_v40 = vld [vmem:[#allocation3 + $0x32] sm:$0xff] }
 0x3b5   :  { %v9241_v45 = vld [vmem:[#allocation3 + $0x52] sm:$0xff] }
 0x3b6   :  { %v9249_v32 = vld [vmem:[#allocation3 + $0x72] sm:$0xff] }
 0x3b7   :  { %6453 = vmatmul.mubr.msk.f32.vlgmr.msra.gmra.mrb[8].mxu1 %vm3015_vm3, %v9164_v55  ;;  %v9254_v37 = vld [vmem:[#allocation3 + $0xb2] sm:$0xff] }
 0x3b8   :  { %6477 = vmatpush3.msra.mxu1 %v5731_v41  ;;  %6455 = vmatprep.mubr.msk.f32.mxu1 %vm3015_vm3, %v9171_v58  ;;  %v9258_v41 = vld [vmem:[#allocation3 + $0xc2] sm:$0xff]  ;;  %v9262_v56 = vld [vmem:[#allocation3 + $0xd2] sm:$0xff] }
 0x3b9   :  { %6502 = vmatprep.subr.mxu1 %v5748_v51 }
 0x3bb   :  { %6456 = vmatmul.mubr.msk.f32.gmra.mrb[10].mxu1 %vm3015_vm3, %v9175_v1 }
 0x3bc   :  { %6458 = vmatprep.mubr.msk.f32.mxu1 %vm3015_vm3, %v9179_v22 }
 0x3bf   :  { %6459 = vmatmul.mubr.msk.f32.gmra.mrb[12].mxu1 %vm3015_vm3, %v9183_v57 }
 0x3c0   :  { %6461 = vmatprep.mubr.msk.f32.mxu1 %vm3015_vm3, %v9187_v63 }
 0x3c3   :  { %6462 = vmatmul.mubr.msk.f32.gmra.mrb[14].mxu1 %vm3015_vm3, %v9191_v53 }
 0x3c4   :  { %6464 = vmatprep.mubr.msk.f32.mxu1 %vm3015_vm3, %v3270_v19  ;;  %v9270_v19 = vld [vmem:[#allocation3 + $0xf2] sm:$0xff] }
 0x3c7   :  { %6465 = vmatmul.mubr.msk.f32.gmra.mrb[0].mxu1 %vm3015_vm3, %v3271_v13 }
 0x3c8   :  { %6467 = vmatprep.mubr.msk.f32.mxu1 %vm3015_vm3, %v9197_v44 }
 0x3cb   :  { %6468 = vmatmul.mubr.msk.f32.gmra.mrb[2].mxu1 %vm3015_vm3, %v9201_v18 }
 0x3cc   :  { %6470 = vmatprep.mubr.msk.f32.mxu1 %vm3015_vm3, %v9205_v54 }
 0x3cf   :  { %6471 = vmatmul.mubr.msk.f32.gmra.mrb[4].mxu1 %vm3015_vm3, %v9209_v6 }
 0x3d0   :  { %6473 = vmatprep.mubr.msk.f32.mxu1 %vm3015_vm3, %v9213_v14 }
 0x3d3   :  { %6474 = vmatmul.mubr.msk.f32.gmra.mrb[6].mxu1 %vm3015_vm3, %v9217_v28 }
 0x3d4   :  { %6478 = vmatprep.mubr.msk.f32.mxu1 %vm3015_vm3, %v3683_v46  ;;  %v9274_v46 = vld [vmem:[#allocation3 + $0x102] sm:$0xff] }
 0x3d7   :  { %6479 = vmatmul.mubr.msk.f32.vlgmr.msra.gmra.mrb[8].mxu1 %vm3015_vm3, %v9222_v21 }
 0x3d8   :  { %6503 = vmatpush3.msra.mxu1 %v5748_v51  ;;  %6481 = vmatprep.mubr.msk.f32.mxu1 %vm3015_vm3, %v9229_v27  ;;  %v9266_v51 = vld [vmem:[#allocation3 + $0xe2] sm:$0xff] }
 0x3d9   :  { %6528 = vmatprep.subr.mxu1 %v5765_v42 }
 0x3db   :  { %6482 = vmatmul.mubr.msk.f32.gmra.mrb[10].mxu1 %vm3015_vm3, %v9233_v40 }
 0x3dc   :  { %6484 = vmatprep.mubr.msk.f32.mxu1 %vm3015_vm3, %v9237_v16 }
 0x3df   :  { %6485 = vmatmul.mubr.msk.f32.gmra.mrb[12].mxu1 %vm3015_vm3, %v9241_v45 }
 0x3e0   :  { %6487 = vmatprep.mubr.msk.f32.mxu1 %vm3015_vm3, %v9245_v30 }
 0x3e3   :  { %6488 = vmatmul.mubr.msk.f32.gmra.mrb[14].mxu1 %vm3015_vm3, %v9249_v32 }
 0x3e4   :  { %6490 = vmatprep.mubr.msk.f32.mxu1 %vm3015_vm3, %v3691_v20  ;;  %v9278_v20 = vld [vmem:[#allocation3 + $0x112] sm:$0xff] }
 0x3e7   :  { %6491 = vmatmul.mubr.msk.f32.gmra.mrb[0].mxu1 %vm3015_vm3, %v9254_v37 }
 0x3e8   :  { %6493 = vmatprep.mubr.msk.f32.mxu1 %vm3015_vm3, %v9258_v41 }
 0x3eb   :  { %6494 = vmatmul.mubr.msk.f32.gmra.mrb[2].mxu1 %vm3015_vm3, %v9262_v56 }
 0x3ec   :  { %6496 = vmatprep.mubr.msk.f32.mxu1 %vm3015_vm3, %v9266_v51 }
 0x3ef   :  { %6497 = vmatmul.mubr.msk.f32.gmra.mrb[4].mxu1 %vm3015_vm3, %v9270_v19 }
 0x3f0   :  { %6499 = vmatprep.mubr.msk.f32.mxu1 %vm3015_vm3, %v9274_v46 }
 0x3f3   :  { %6500 = vmatmul.mubr.msk.f32.gmra.mrb[6].mxu1 %vm3015_vm3, %v9278_v20 }
 0x3f4   :  { %6504 = vmatprep.mubr.msk.f32.mxu1 %vm3015_vm3, %v9164_v55  ;;  %v3917_v55 = vld [vmem:[#allocation3 + $0x80] sm:$0xff] }
 0x3f7   :  { %6505 = vmatmul.mubr.msk.f32.vlgmr.msra.gmra.mrb[8].mxu1 %vm3015_vm3, %v9171_v58 }
 0x3f8   :  { %6529 = vmatpush3.msra.mxu1 %v5765_v42  ;;  %6507 = vmatprep.mubr.msk.f32.mxu1 %vm3015_vm3, %v9175_v1  ;;  %v3925_v42 = vld [vmem:[#allocation3 + $0x120] sm:$0xff] }
 0x3f9   :  { %6554 = vmatprep.subr.mxu1 %v5782_v31 }
 0x3fb   :  { %6508 = vmatmul.mubr.msk.f32.gmra.mrb[10].mxu1 %vm3015_vm3, %v9179_v22 }
 0x3fc   :  { %6510 = vmatprep.mubr.msk.f32.mxu1 %vm3015_vm3, %v9183_v57 }
 0x3ff   :  { %6511 = vmatmul.mubr.msk.f32.gmra.mrb[12].mxu1 %vm3015_vm3, %v9187_v63 }
 0x400   :  { %6513 = vmatprep.mubr.msk.f32.mxu1 %vm3015_vm3, %v9191_v53 }
 0x403   :  { %6514 = vmatmul.mubr.msk.f32.gmra.mrb[14].mxu1 %vm3015_vm3, %v3917_v55 }
 0x404   :  { %6516 = vmatprep.mubr.msk.f32.mxu1 %vm3015_vm3, %v3271_v13  ;;  %v5799_v13 = vld [vmem:[%s9554_s6 + $0x30] sm:$0xff] }
 0x407   :  { %6517 = vmatmul.mubr.msk.f32.gmra.mrb[0].mxu1 %vm3015_vm3, %v9197_v44 }
 0x408   :  { %6519 = vmatprep.mubr.msk.f32.mxu1 %vm3015_vm3, %v9201_v18 }
 0x40b   :  { %6520 = vmatmul.mubr.msk.f32.gmra.mrb[2].mxu1 %vm3015_vm3, %v9205_v54 }
 0x40c   :  { %6522 = vmatprep.mubr.msk.f32.mxu1 %vm3015_vm3, %v9209_v6 }
 0x40f   :  { %6523 = vmatmul.mubr.msk.f32.gmra.mrb[4].mxu1 %vm3015_vm3, %v9213_v14 }
 0x410   :  { %6525 = vmatprep.mubr.msk.f32.mxu1 %vm3015_vm3, %v9217_v28 }
 0x413   :  { %6526 = vmatmul.mubr.msk.f32.gmra.mrb[6].mxu1 %vm3015_vm3, %v3925_v42 }
 0x414   :  { %6530 = vmatprep.mubr.msk.f32.mxu1 %vm3015_vm3, %v9103_v26  ;;  %v9331_v26 = vld [vmem:[#allocation3 + $0x81] sm:$0xff] }
 0x417   :  { %6531 = vmatmul.mubr.msk.f32.vlgmr.msra.gmra.mrb[8].mxu1 %vm3015_vm3, %v9117_v60 }
 0x418   :  { %6555 = vmatpush3.msra.mxu1 %v5782_v31  ;;  %6533 = vmatprep.mubr.msk.f32.mxu1 %vm3015_vm3, %v9123_v10  ;;  %v9349_v31 = vld [vmem:[#allocation3 + $0x121] sm:$0xff] }
 0x419   :  { %6580 = vmatprep.subr.mxu1 %v5799_v13 }
 0x41b   :  { %6534 = vmatmul.mubr.msk.f32.gmra.mrb[10].mxu1 %vm3015_vm3, %v9129_v38 }
 0x41c   :  { %6536 = vmatprep.mubr.msk.f32.mxu1 %vm3015_vm3, %v9139_v39 }
 0x41f   :  { %6537 = vmatmul.mubr.msk.f32.gmra.mrb[12].mxu1 %vm3015_vm3, %v9145_v33 }
 0x420   :  { %6539 = vmatprep.mubr.msk.f32.mxu1 %vm3015_vm3, %v9155_v24 }
 0x423   :  { %6540 = vmatmul.mubr.msk.f32.gmra.mrb[14].mxu1 %vm3015_vm3, %v9331_v26 }
 0x424   :  { %6542 = vmatprep.mubr.msk.f32.mxu1 %vm3015_vm3, %v9107_v36  ;;  %v5816_v36 = vld [vmem:[%s9554_s6 + $0x38] sm:$0xff] }
 0x427   :  { %6543 = vmatmul.mubr.msk.f32.gmra.mrb[0].mxu1 %vm3015_vm3, %v9114_v59 }
 0x428   :  { %6545 = vmatprep.mubr.msk.f32.mxu1 %vm3015_vm3, %v9127_v5 }
 0x42b   :  { %6546 = vmatmul.mubr.msk.f32.gmra.mrb[2].mxu1 %vm3015_vm3, %v9135_v8 }
 0x42c   :  { %6548 = vmatprep.mubr.msk.f32.mxu1 %vm3015_vm3, %v9143_v34 }
 0x42f   :  { %6549 = vmatmul.mubr.msk.f32.gmra.mrb[4].mxu1 %vm3015_vm3, %v9151_v17 }
 0x430   :  { %6551 = vmatprep.mubr.msk.f32.mxu1 %vm3015_vm3, %v9159_v62 }
 0x433   :  { %6552 = vmatmul.mubr.msk.f32.gmra.mrb[6].mxu1 %vm3015_vm3, %v9349_v31 }
 0x434   :  { %6556 = vmatprep.mubr.msk.f32.mxu1 %vm3015_vm3, %v9222_v21  ;;  %v9370_v21 = vld [vmem:[#allocation3 + $0x82] sm:$0xff] }
 0x437   :  { %6557 = vmatmul.mubr.msk.f32.vlgmr.msra.gmra.mrb[8].mxu1 %vm3015_vm3, %v9229_v27 }
 0x438   :  { %6581 = vmatpush3.msra.mxu1 %v5799_v13  ;;  %6559 = vmatprep.mubr.msk.f32.mxu1 %vm3015_vm3, %v9233_v40  ;;  %v9388_v13 = vld [vmem:[#allocation3 + $0x122] sm:$0xff] }
 0x439   :  { %6606 = vmatprep.subr.mxu1 %v5816_v36 }
 0x43b   :  { %6560 = vmatmul.mubr.msk.f32.gmra.mrb[10].mxu1 %vm3015_vm3, %v9237_v16 }
 0x43c   :  { %6562 = vmatprep.mubr.msk.f32.mxu1 %vm3015_vm3, %v9241_v45 }
 0x43f   :  { %6563 = vmatmul.mubr.msk.f32.gmra.mrb[12].mxu1 %vm3015_vm3, %v9245_v30 }
 0x440   :  { %6565 = vmatprep.mubr.msk.f32.mxu1 %vm3015_vm3, %v9249_v32 }
 0x443   :  { %6566 = vmatmul.mubr.msk.f32.gmra.mrb[14].mxu1 %vm3015_vm3, %v9370_v21 }
 0x444   :  { %6568 = vmatprep.mubr.msk.f32.mxu1 %vm3015_vm3, %v9254_v37  ;;  %v5833_v37 = vld [vmem:[%s9554_s6 + $0x40] sm:$0xff] }
 0x447   :  { %6569 = vmatmul.mubr.msk.f32.gmra.mrb[0].mxu1 %vm3015_vm3, %v9258_v41 }
 0x448   :  { %6571 = vmatprep.mubr.msk.f32.mxu1 %vm3015_vm3, %v9262_v56 }
 0x44b   :  { %6572 = vmatmul.mubr.msk.f32.gmra.mrb[2].mxu1 %vm3015_vm3, %v9266_v51 }
 0x44c   :  { %6574 = vmatprep.mubr.msk.f32.mxu1 %vm3015_vm3, %v9270_v19 }
 0x44f   :  { %6575 = vmatmul.mubr.msk.f32.gmra.mrb[4].mxu1 %vm3015_vm3, %v9274_v46 }
 0x450   :  { %6577 = vmatprep.mubr.msk.f32.mxu1 %vm3015_vm3, %v9278_v20 }
 0x453   :  { %6578 = vmatmul.mubr.msk.f32.gmra.mrb[6].mxu1 %vm3015_vm3, %v9388_v13 }
 0x454   :  { %6582 = vmatprep.mubr.msk.f32.mxu1 %vm3015_vm3, %v9171_v58  ;;  %v4599_v58 = vld [vmem:[#allocation3 + $0x90] sm:$0xff] }
 0x457   :  { %6583 = vmatmul.mubr.msk.f32.vlgmr.msra.gmra.mrb[8].mxu1 %vm3015_vm3, %v9175_v1  ;;  %v4607_v1 = vld [vmem:[#allocation3 + $0x130] sm:$0xff] }
 0x458   :  { %6607 = vmatpush3.msra.mxu1 %v5816_v36  ;;  %6585 = vmatprep.mubr.msk.f32.mxu1 %vm3015_vm3, %v9179_v22  ;;  %v5273_v22 = vld [vmem:[%s9555_s7] sm:$0xf]  ;;  %s6990_s7 = smov [#allocation4]  }
 0x459   :  { %6632 = vmatprep.subr.mxu1 %v5833_v37  ;;  %s5525_s17 = sshll.u32 %s6990_s7, 4  ;;  %s5526_s17 = int_to_ptr.vmem [resolvable:$true] %s5525_s17 }
 0x45a   :  { %s6965_s18 = scalar_lea.vmem %s5526_s17, 128  ;;  %p6970_p1 = scmp.lt.s32.totalorder %s5526_s17, %s5526_s17 }
 0x45b   :  { %6586 = vmatmul.mubr.msk.f32.gmra.mrb[10].mxu1 %vm3015_vm3, %v9183_v57  ;;  %p6966_p0 = scmp.ne.s32.totalorder %s5526_s17, %s6965_s18  ;;  %p6971_p2 = scmp.lt.s32.totalorder %s6965_s18, %s6965_s18 }
 0x45c   :  { %6588 = vmatprep.mubr.msk.f32.mxu1 %vm3015_vm3, %v9187_v63 }
 0x45d   :  { %p6972_p3 = por %p6971_p2, %p6970_p1 }
 0x45f   :  { %6589 = vmatmul.mubr.msk.f32.gmra.mrb[12].mxu1 %vm3015_vm3, %v9191_v53  ;;  %p6973_p4 = pnand %p6972_p3, %p6966_p0 }
 0x460   :  { %6591 = vmatprep.mubr.msk.f32.mxu1 %vm3015_vm3, %v3917_v55 }
 0x463   :  { %6592 = vmatmul.mubr.msk.f32.gmra.mrb[14].mxu1 %vm3015_vm3, %v4599_v58 }
 0x464   :  { %6594 = vmatprep.mubr.msk.f32.mxu1 %vm3015_vm3, %v9197_v44 }
 0x467   :  { %6595 = vmatmul.mubr.msk.f32.gmra.mrb[0].mxu1 %vm3015_vm3, %v9201_v18 }
 0x468   :  { %6597 = vmatprep.mubr.msk.f32.mxu1 %vm3015_vm3, %v9205_v54 }
 0x46b   :  { %6598 = vmatmul.mubr.msk.f32.gmra.mrb[2].mxu1 %vm3015_vm3, %v9209_v6 }
 0x46c   :  { %6600 = vmatprep.mubr.msk.f32.mxu1 %vm3015_vm3, %v9213_v14 }
 0x46f   :  { %6601 = vmatmul.mubr.msk.f32.gmra.mrb[4].mxu1 %vm3015_vm3, %v9217_v28 }
 0x470   :  { %6603 = vmatprep.mubr.msk.f32.mxu1 %vm3015_vm3, %v3925_v42 }
 0x473   :  { %6604 = vmatmul.mubr.msk.f32.gmra.mrb[6].mxu1 %vm3015_vm3, %v4607_v1 }
 0x474   :  { %6608 = vmatprep.mubr.msk.f32.mxu1 %vm3015_vm3, %v9117_v60 }
 0x477   :  { %6609 = vmatmul.mubr.msk.f32.vlgmr.msra.gmra.mrb[8].mxu1 %vm3015_vm3, %v9123_v10  ;;  %v6428_v57 = vpop.f32.mrb[16].mxu0  ;;  %v4826_v10 = vld [vmem:[#allocation3 + $0x91] sm:$0xff] }
 0x478   :  { %6633 = vmatpush3.msra.mxu1 %v5833_v37  ;;  %6611 = vmatprep.mubr.msk.f32.mxu1 %vm3015_vm3, %v9129_v38  ;;  %v3411_v63 = vpop.f32.mrb[17].mxu0 }
 0x479   :  { %6658 = vmatprep.subr.msk.mxu1 %vm1060_vm0, %v5273_v22 }
 0x47b   :  { %6612 = vmatmul.mubr.msk.f32.gmra.mrb[10].mxu1 %vm3015_vm3, %v9139_v39 }
 0x47c   :  { %6614 = vmatprep.mubr.msk.f32.mxu1 %vm3015_vm3, %v9145_v33 }
 0x47f   :  { %v6431_v60 = vpop.f32.mrb[18].mxu0  ;;  %6615 = vmatmul.mubr.msk.f32.gmra.mrb[12].mxu1 %vm3015_vm3, %v9155_v24 }
 0x480   :  { %v3421_v53 = vpop.f32.mrb[19].mxu0  ;;  %6617 = vmatprep.mubr.msk.f32.mxu1 %vm3015_vm3, %v9331_v26 }
 0x483   :  { %v6434_v38 = vpop.f32.mrb[20].mxu0  ;;  %6618 = vmatmul.mubr.msk.f32.gmra.mrb[14].mxu1 %vm3015_vm3, %v4826_v10 }
 0x484   :  { %v3431_v44 = vpop.f32.mrb[21].mxu0  ;;  %6620 = vmatprep.mubr.msk.f32.mxu1 %vm3015_vm3, %v9114_v59  ;;  %v4834_v59 = vld [vmem:[#allocation3 + $0x131] sm:$0xff] }
 0x487   :  { %v6437_v39 = vpop.f32.mrb[22].mxu0  ;;  %6621 = vmatmul.mubr.msk.f32.gmra.mrb[0].mxu1 %vm3015_vm3, %v9127_v5  ;;  %v5053_v5 = vld [vmem:[#allocation3 + $0x92] sm:$0xff] }
 0x488   :  { %v3441_v18 = vpop.f32.mrb[23].mxu0  ;;  %6623 = vmatprep.mubr.msk.f32.mxu1 %vm3015_vm3, %v9135_v8  ;;  %v5061_v8 = vld [vmem:[#allocation3 + $0x132] sm:$0xff] }
 0x48b   :  { %6624 = vmatmul.mubr.msk.f32.gmra.mrb[2].mxu1 %vm3015_vm3, %v9143_v34  ;;  %v9679_v34 = vmax.f32 %v8491_v0, 0.0  ;;  %v9688_v0 = vmax.f32 %v8584_v4, 0.0 }
 0x48c   :  { %6626 = vmatprep.mubr.msk.f32.mxu1 %vm3015_vm3, %v9151_v17 }
 0x48f   :  { %6627 = vmatmul.mubr.msk.f32.gmra.mrb[4].mxu1 %vm3015_vm3, %v9159_v62 }
 0x490   :  { %6629 = vmatprep.mubr.msk.f32.mxu1 %vm3015_vm3, %v9349_v31 }
 0x493   :  { %6630 = vmatmul.mubr.msk.f32.gmra.mrb[6].mxu1 %vm3015_vm3, %v4834_v59 }
 0x494   :  { %6634 = vmatprep.mubr.msk.f32.mxu1 %vm3015_vm3, %v9229_v27 }
 0x497   :  { %6635 = vmatmul.mubr.msk.f32.vlgmr.msra.gmra.mrb[8].mxu1 %vm3015_vm3, %v9233_v40 }
 0x498   :  { %6659 = vmatpush3.msk.msra.mxu1 %vm1060_vm0, %v5273_v22  ;;  %6637 = vmatprep.mubr.msk.f32.mxu1 %vm3015_vm3, %v9237_v16 }
 0x49b   :  { %6638 = vmatmul.mubr.msk.f32.gmra.mrb[10].mxu1 %vm3015_vm3, %v9241_v45 }
 0x49c   :  { %6640 = vmatprep.mubr.msk.f32.mxu1 %vm3015_vm3, %v9245_v30 }
 0x49f   :  { %6641 = vmatmul.mubr.msk.f32.gmra.mrb[12].mxu1 %vm3015_vm3, %v9249_v32 }
 0x4a0   :  { %6643 = vmatprep.mubr.msk.f32.mxu1 %vm3015_vm3, %v9370_v21 }
 0x4a3   :  { %6644 = vmatmul.mubr.msk.f32.gmra.mrb[14].mxu1 %vm3015_vm3, %v5053_v5 }
 0x4a4   :  { %6646 = vmatprep.mubr.msk.f32.mxu1 %vm3015_vm3, %v9258_v41 }
 0x4a7   :  { %6647 = vmatmul.mubr.msk.f32.gmra.mrb[0].mxu1 %vm3015_vm3, %v9262_v56 }
 0x4a8   :  { %6649 = vmatprep.mubr.msk.f32.mxu1 %vm3015_vm3, %v9266_v51 }
 0x4ab   :  { %6650 = vmatmul.mubr.msk.f32.gmra.mrb[2].mxu1 %vm3015_vm3, %v9270_v19 }
 0x4ac   :  { %6652 = vmatprep.mubr.msk.f32.mxu1 %vm3015_vm3, %v9274_v46 }
 0x4af   :  { %6653 = vmatmul.mubr.msk.f32.gmra.mrb[4].mxu1 %vm3015_vm3, %v9278_v20 }
 0x4b0   :  { %6655 = vmatprep.mubr.msk.f32.mxu1 %vm3015_vm3, %v9388_v13 }
 0x4b3   :  { %6656 = vmatmul.mubr.msk.f32.gmra.mrb[6].mxu1 %vm3015_vm3, %v5061_v8 }
 0x4b4   :  { %6660 = vmatprep.mubr.msk.f32.mxu1 %vm94_vm1, %v699_v12  ;;  %v9683_v12 = vmax.f32 %v8515_v23, 0.0 }
 0x4b7   :  { %6661 = vmatmul.mubr.msk.f32.vlgmr.msra.gmra.mrb[8].mxu1 %vm94_vm1, %v700_v3  ;;  %v9684_v3 = vmax.f32 %v8518_v50, 0.0 }
 0x4b8   :  { %6663 = vmatprep.mubr.msk.f32.mxu1 %vm94_vm1, %v701_v2  ;;  %v9686_v2 = vmax.f32 %v8535_v43, 0.0 }
 0x4bb   :  { %6664 = vmatmul.mubr.msk.f32.gmra.mrb[10].mxu1 %vm94_vm1, %v702_v49  ;;  %v9687_v49 = vmax.f32 %v8579_v35, 0.0 }
 0x4bc   :  { %6666 = vmatprep.mubr.msk.f32.mxu1 %vm94_vm1, %v9679_v34 }
 0x4bf   :  { %6667 = vmatmul.mubr.msk.f32.gmra.mrb[12].mxu1 %vm94_vm1, %v9680_v25 }
 0x4c0   :  { %6669 = vmatprep.mubr.msk.f32.mxu1 %vm94_vm1, %v9681_v52 }
 0x4c3   :  { %6670 = vmatmul.mubr.msk.f32.gmra.mrb[14].mxu1 %vm94_vm1, %v9682_v29 }
 0x4c4   :  { %6672 = vmatprep.mubr.msk.f32.mxu1 %vm94_vm1, %v9683_v12 }
 0x4c7   :  { %6673 = vmatmul.mubr.msk.f32.gmra.mrb[0].mxu1 %vm94_vm1, %v9684_v3 }
 0x4c8   :  { %6675 = vmatprep.mubr.msk.f32.mxu1 %vm94_vm1, %v9685_v9 }
 0x4cb   :  { %6676 = vmatmul.mubr.msk.f32.gmra.mrb[2].mxu1 %vm94_vm1, %v9686_v2 }
 0x4cc   :  { %6678 = vmatprep.mubr.msk.f32.mxu1 %vm94_vm1, %v9687_v49 }
 0x4cf   :  { %6679 = vmatmul.mubr.msk.f32.gmra.mrb[4].mxu1 %vm94_vm1, %v9688_v0 }
 0x4d0   :  { %6681 = vmatprep.mubr.msk.f32.mxu1 %vm94_vm1, %v9689_v47 }
 0x4d3   :  { %6682 = vmatmul.mubr.msk.f32.gmra.mrb[6].mxu1 %vm94_vm1, %v9690_v48 }
 0x58a   :  { %v6662_v11 = vpop.f32.mrb[8].mxu1 }
 0x58b   :  { %v6686_v23 = vadd.f32 %v6662_v11, %v6428_v57  ;;  %v5391_v50 = vpop.f32.mrb[9].mxu1 }
 0x58c   :  { %v6687_v61 = vadd.f32 %v5391_v50, %v3411_v63 }
 0x58e   :  { %v6665_v43 = vpop.f32.mrb[10].mxu1  ;;  %5486 = vxpose.xlu0.b32.start [1/16] (narrow) %v6687_v61, 8 }
 0x58f   :  { %v6688_v35 = vadd.f32 %v6665_v43, %v6431_v60  ;;  %v5401_v33 = vpop.f32.mrb[11].mxu1 }
 0x590   :  { %v6689_v17 = vadd.f32 %v5401_v33, %v3421_v53 }
 0x592   :  { %v6668_v4 = vpop.f32.mrb[12].mxu1  ;;  %5487 = vxpose.xlu0.b32.cont [2/16] (narrow) %v6686_v23, 8 }
 0x593   :  { %v6690_v24 = vadd.f32 %v6668_v4, %v6434_v38  ;;  %v5411_v62 = vpop.f32.mrb[13].mxu1 }
 0x594   :  { %v6691_v15 = vadd.f32 %v5411_v62, %v3431_v44 }
 0x596   :  { %v6671_v54 = vpop.f32.mrb[14].mxu1  ;;  %5488 = vxpose.xlu0.b32.cont [3/16] (narrow) %v6689_v17, 8 }
 0x597   :  { %v6692_v6 = vadd.f32 %v6671_v54, %v6437_v39  ;;  %v5421_v7 = vpop.f32.mrb[15].mxu1 }
 0x598   :  { %v6693_v14 = vadd.f32 %v5421_v7, %v3441_v18 }
 0x59a   :  { %v6674_v28 = vpop.f32.mrb[0].mxu1  ;;  %5489 = vxpose.xlu0.b32.cont [4/16] (narrow) %v6688_v35, 8 }
 0x59b   :  { %v5431_v27 = vpop.f32.mrb[1].mxu1 }
 0x59e   :  { %v6677_v40 = vpop.f32.mrb[2].mxu1  ;;  %5490 = vxpose.xlu0.b32.cont [5/16] (narrow) %v6691_v15, 8 }
 0x59f   :  { %v5441_v16 = vpop.f32.mrb[3].mxu1 }
 0x5a2   :  { %v6680_v45 = vpop.f32.mrb[4].mxu1  ;;  %5491 = vxpose.xlu0.b32.cont [6/16] (narrow) %v6690_v24, 8 }
 0x5a3   :  { %v5451_v30 = vpop.f32.mrb[5].mxu1 }
 0x5a6   :  { %v6683_v32 = vpop.f32.mrb[6].mxu1  ;;  %5492 = vxpose.xlu0.b32.cont [7/16] (narrow) %v6693_v14, 8 }
 0x5a7   :  { %v5461_v41 = vpop.f32.mrb[7].mxu1 }
 0x5aa   :  { %5493 = vxpose.xlu0.b32.cont [8/16] (narrow) %v6692_v6, 8 }
 0x5ae   :  { %5494 = vxpose.xlu0.b32.cont [9/16] (narrow) %v5431_v27, 8 }
 0x5b2   :  { %5495 = vxpose.xlu0.b32.cont [10/16] (narrow) %v6674_v28, 8 }
 0x5b6   :  { %5496 = vxpose.xlu0.b32.cont [11/16] (narrow) %v5441_v16, 8 }
 0x5ba   :  { %5497 = vxpose.xlu0.b32.cont [12/16] (narrow) %v6677_v40, 8 }
 0x5be   :  { %5498 = vxpose.xlu0.b32.cont [13/16] (narrow) %v5451_v30, 8 }
 0x5c2   :  { %5499 = vxpose.xlu0.b32.cont [14/16] (narrow) %v6680_v45, 8 }
 0x5c6   :  { %5500 = vxpose.xlu0.b32.cont [15/16] (narrow) %v5461_v41, 8 }
 0x5ca   :  { %5501 = vxpose.xlu0.b32.end [16/16] (narrow) %v6683_v32, 8 }
 0x60e   :  { %v5502_v56 = vpop.trf.xlu0 }
 0x60f   :  { %5518 = vst [vmem:[#allocation4] sm:$0xff] %v5502_v56 }
 0x610   :  { %6976 = shalt.err (!%p6973_p4)
}
 0x611   :  { %s6977_s21 = scalar_lea.hbm %s9556_s8, 128 }
 0x612   :  { %p6978_p5 = scmp.ne.s32.totalorder %s9556_s8, %s6977_s21  ;;  %p6981_p6 = scmp.lt.u32.totalorder %s6977_s21, %s9556_s8 }
 0x614   :  { %p6983_p7 = pnand %p6981_p6, %p6978_p5 }
 0x616   :  { %6986 = shalt.err (!%p6983_p7)
}
 0x617   :  { %5528 = dma.vmem_to_hbm [thread:$0]  %s5526_s17, 128, %s9556_s8, [#allocation5]  }
 0x618   :  { %6987 = dma.done.wait [#allocation5], 128  }
 0x619   :  { %6988 = vsyncadd [#allocation5], 4294967168 }
 0x61a   :  { %5532 = vsyncpa [#allocation5], 1 }

</bundles_post_ra>
